<compile_context>
chip_gen: v7x
topology: tpu7x:2x2x1
jax: 0.10.0
libtpu: 0.0.40
codegen_flags: <defaults>
</compile_context>

<pallas_src>
import math
import functools
from dataclasses import dataclass

import jax
import jax.numpy as jnp
from jax import lax
from jax.experimental import pallas as pl
from jax.experimental.pallas import tpu as pltpu


# ----------------------------- config ---------------------------------------

@dataclass
class GPTConfig:
    block_size: int = 16
    vocab_size: int = 256
    n_layer: int = 2
    n_head: int = 4
    d_model: int = 32


# MXU operand dtype (accumulation is always f32). bf16 is native on v5e/v6e/v7x MXUs.
MXU_DTYPE = jnp.bfloat16


# ----------------------------- math helpers (f32 elementwise) ----------------

def _layernorm(x, gamma, beta, eps=1e-5):
    # x: (N, D); gamma/beta: (1, D). Matches torch.nn.LayerNorm (biased variance).
    mu = jnp.mean(x, axis=-1, keepdims=True)
    var = jnp.mean((x - mu) * (x - mu), axis=-1, keepdims=True)
    return (x - mu) * lax.rsqrt(var + eps) * gamma + beta


def _new_gelu(x):
    # NewGelu: 0.5 * x * (1 + tanh(sqrt(2/pi) * (x + 0.044715 * x^3)))
    c = math.sqrt(2.0 / math.pi)
    return 0.5 * x * (1.0 + jnp.tanh(c * (x + 0.044715 * x * x * x)))


def _mm(a, b):
    # 2-D MXU matmul: bf16 operands, f32 accumulation.
    return jnp.dot(a.astype(MXU_DTYPE), b.astype(MXU_DTYPE),
                   preferred_element_type=jnp.float32)


def _bmm_qk(q, k):
    # (B, Tq, hd) x (B, Tk, hd) -> (B, Tq, Tk); batched MXU matmul, key axis lane-last.
    return jnp.einsum('bqd,bkd->bqk', q.astype(MXU_DTYPE), k.astype(MXU_DTYPE),
                      preferred_element_type=jnp.float32)


def _bmm_pv(p, v):
    # (B, Tq, Tk) x (B, Tk, hd) -> (B, Tq, hd); batched MXU matmul.
    return jnp.einsum('bqk,bkd->bqd', p.astype(MXU_DTYPE), v.astype(MXU_DTYPE),
                      preferred_element_type=jnp.float32)


# ----------------------------- fused GPT kernel ------------------------------

def gpt_kernel(x_ref,
               ln1g_ref, ln1b_ref, wq_ref, wk_ref, wv_ref, wo_ref, bo_ref,
               ln2g_ref, ln2b_ref, wfc_ref, bfc_ref, wpr_ref, bpr_ref,
               lnfg_ref, lnfb_ref, wteT_ref,
               out_ref,
               *, n_layer, n_head, B, T):
    x = x_ref[...]                                   # (B*T, D) f32 residual stream
    D = x.shape[-1]
    hd = D // n_head
    scale = 1.0 / math.sqrt(hd)

    # Additive causal mask in the lane-last score layout (1, T_q, T_k); hoisted out of loops.
    rq = lax.broadcasted_iota(jnp.int32, (1, T, T), 1)
    ck = lax.broadcasted_iota(jnp.int32, (1, T, T), 2)
    neg_mask = jnp.where(ck > rq, jnp.float32(-1e30), jnp.float32(0.0))   # (1, T, T)

    for l in range(n_layer):                                  # static: all layers fused
        # --- LN1 + causal multi-head self-attention (all matmuls on the MXU) ---
        h = _layernorm(x, ln1g_ref[l], ln1b_ref[l])           # (B*T, D) f32
        h_b = h.astype(MXU_DTYPE)                             # cast once per layer

        attn_out = jnp.zeros_like(x)                          # (B*T, D) f32 accumulator
        for hh in range(n_head):                              # static, tiny head loop
            widx = l * n_head + hh
            q = _mm(h_b, wq_ref[widx]).reshape(B, T, hd)      # (B, T, hd)
            k = _mm(h_b, wk_ref[widx]).reshape(B, T, hd)
            v = _mm(h_b, wv_ref[widx]).reshape(B, T, hd)

            s = _bmm_qk(q, k) * scale + neg_mask              # (B, Tq, Tk), key lane-last
            m = jnp.max(s, axis=-1, keepdims=True)            # lane reduce
            e = jnp.exp(s - m)                                # f32 softmax
            p = e / jnp.sum(e, axis=-1, keepdims=True)        # exact division

            ctx = _bmm_pv(p, v)                               # (B, T, hd)
            # Fold this head straight back to D lanes via its (hd, D) slice of W_o:
            attn_out = attn_out + _mm(ctx.reshape(B * T, hd), wo_ref[widx])   # (B*T, D)

        x = x + attn_out + bo_ref[l]

        # --- LN2 + MLP (Linear -> NewGelu -> Linear) ---
        h2 = _layernorm(x, ln2g_ref[l], ln2b_ref[l])
        fc = _mm(h2, wfc_ref[l]) + bfc_ref[l]                 # (B*T, 4D) -- 128 lanes
        x = x + _mm(_new_gelu(fc), wpr_ref[l]) + bpr_ref[l]

    # --- final LN + tied lm_head on the last token of each sequence (targets=None path) ---
    x_last = x.reshape(B, T, D)[:, T - 1, :]                  # (B, D)
    hf = _layernorm(x_last, lnfg_ref[...], lnfb_ref[...])
    out_ref[...] = _mm(hf, wteT_ref[...])                     # (B, V), lane-dense, K-last


# ----------------------------- parameter init / packing ----------------------

def init_params(config, key):
    D, V, H4 = config.d_model, config.vocab_size, 4 * config.d_model
    ks = iter(jax.random.split(key, 64))
    norm = lambda shape: (0.02 * jax.random.normal(next(ks), shape, jnp.float32))

    params = {
        'wte': norm((V, D)),                      # tied with lm_head
        'wpe': norm((config.block_size, D)),
        'lnf_g': jnp.ones((1, D), jnp.float32),
        'lnf_b': jnp.zeros((1, D), jnp.float32),
        'blocks': [],
    }
    for _ in range(config.n_layer):
        params['blocks'].append({
            'ln1_g': jnp.ones((1, D), jnp.float32),
            'ln1_b': jnp.zeros((1, D), jnp.float32),
            'wq': norm((D, D)), 'wk': norm((D, D)), 'wv': norm((D, D)),
            'wo': norm((D, D)), 'bo': jnp.zeros((1, D), jnp.float32),
            'ln2_g': jnp.ones((1, D), jnp.float32),
            'ln2_b': jnp.zeros((1, D), jnp.float32),
            'wfc': norm((D, H4)), 'bfc': jnp.zeros((1, H4), jnp.float32),
            'wpr': norm((H4, D)), 'bpr': jnp.zeros((1, D), jnp.float32),
        })
    return params


def pack_params(params, config):
    """One-time host-side packing: per-head Q/K/V/O weight slabs (no in-kernel lane slicing),
    bf16 matmul weights (f32 biases / LN params), pre-transposed tied embedding."""
    blocks = params['blocks']
    D = config.d_model
    H = config.n_head
    hd = D // H

    st = lambda name: jnp.stack([blk[name] for blk in blocks], axis=0)

    def per_head_in(name):   # (L*H, D, hd): column slice h*hd:(h+1)*hd of each (D, D) weight
        w = jnp.stack([blk[name].reshape(D, H, hd).transpose(1, 0, 2) for blk in blocks], 0)
        return w.reshape(config.n_layer * H, D, hd).astype(MXU_DTYPE)

    wo = jnp.stack([blk['wo'].reshape(H, hd, D) for blk in blocks], 0)   # row slices of W_o
    wo = wo.reshape(config.n_layer * H, hd, D).astype(MXU_DTYPE)

    return {
        'ln1_g': st('ln1_g'), 'ln1_b': st('ln1_b'),
        'wq': per_head_in('wq'), 'wk': per_head_in('wk'), 'wv': per_head_in('wv'),
        'wo': wo, 'bo': st('bo'),
        'ln2_g': st('ln2_g'), 'ln2_b': st('ln2_b'),
        'wfc': st('wfc').astype(MXU_DTYPE), 'bfc': st('bfc'),
        'wpr': st('wpr').astype(MXU_DTYPE), 'bpr': st('bpr'),
        'lnf_g': params['lnf_g'], 'lnf_b': params['lnf_b'],
        'wte_T': params['wte'].T.astype(MXU_DTYPE),          # (D, V), tied lm_head weight
    }


# ----------------------------- forward (wrapper) -----------------------------

def gpt_forward(idx, params, packed, config):
    B, T = idx.shape
    D, V = config.d_model, config.vocab_size
    assert T <= config.block_size
    # Embedding gathers: plain-JAX glue; everything else is one fused Pallas kernel.
    x = params['wte'][idx] + params['wpe'][jnp.arange(T)][None, :, :]     # (B, T, D)
    x_flat = x.reshape(B * T, D)

    vmem = pl.BlockSpec(memory_space=pltpu.MemorySpace.VMEM)
    args = (x_flat,
            packed['ln1_g'], packed['ln1_b'],
            packed['wq'], packed['wk'], packed['wv'], packed['wo'], packed['bo'],
            packed['ln2_g'], packed['ln2_b'],
            packed['wfc'], packed['bfc'], packed['wpr'], packed['bpr'],
            packed['lnf_g'], packed['lnf_b'], packed['wte_T'])

    logits = pl.pallas_call(
        functools.partial(gpt_kernel, n_layer=config.n_layer,
                          n_head=config.n_head, B=B, T=T),
        out_shape=jax.ShapeDtypeStruct((B, V), jnp.float32),
        in_specs=[vmem] * len(args),
        out_specs=vmem,
    )(*args)
    return logits[:, None, :]                                             # (B, 1, V) to match torch


# ----------------------------- pure-JAX reference (check) --------------------
# Standard full-head formulation; uses the same bf16-operand / f32-accumulate matmul
# policy so the comparison validates the kernel's restructuring rather than dtype choice.

def _ref_forward(idx, params, config):
    B, T = idx.shape
    D = config.d_model
    H = config.n_head
    hd = D // H
    x = params['wte'][idx] + params['wpe'][jnp.arange(T)][None, :, :]
    mask = jnp.triu(jnp.ones((T, T), bool), k=1)
    for L in params['blocks']:
        h = _layernorm(x, L['ln1_g'], L['ln1_b']).reshape(B * T, D)
        q = _mm(h, L['wq']).reshape(B, T, H, hd).transpose(0, 2, 1, 3)
        k = _mm(h, L['wk']).reshape(B, T, H, hd).transpose(0, 2, 1, 3)
        v = _mm(h, L['wv']).reshape(B, T, H, hd).transpose(0, 2, 1, 3)
        s = jnp.einsum('bhqd,bhkd->bhqk', q.astype(MXU_DTYPE), k.astype(MXU_DTYPE),
                       preferred_element_type=jnp.float32) / math.sqrt(hd)
        s = jnp.where(mask[None, None], -jnp.inf, s)
        p = jax.nn.softmax(s, axis=-1)
        ctx = jnp.einsum('bhqk,bhkd->bhqd', p.astype(MXU_DTYPE), v.astype(MXU_DTYPE),
                         preferred_element_type=jnp.float32)
        ctx = ctx.transpose(0, 2, 1, 3).reshape(B * T, D)
        x = x + (_mm(ctx, L['wo']).reshape(B, T, D) + L['bo'])
        h2 = _layernorm(x, L['ln2_g'], L['ln2_b']).reshape(B * T, D)
        fc = _mm(h2, L['wfc']) + L['bfc']
        x = x + (_mm(_new_gelu(fc), L['wpr']).reshape(B, T, D) + L['bpr'])
    x = _layernorm(x, params['lnf_g'], params['lnf_b'])
    return _mm(x[:, -1, :], params['wte'].T)[:, None, :]


# ----------------------------- main ------------------------------------------

if __name__ == "__main__":
    config = GPTConfig(block_size=16, vocab_size=256, n_layer=2, n_head=4, d_model=32)
    B, T = 2, 8

    key = jax.random.PRNGKey(0)
    k_params, k_idx = jax.random.split(key)
    params = init_params(config, k_params)
    packed = pack_params(params, config)      # one-time weight packing (not per forward call)
    idx = jax.random.randint(k_idx, (B, T), 0, config.vocab_size, dtype=jnp.int32)

    fwd = jax.jit(functools.partial(gpt_forward, config=config))
    logits = jax.block_until_ready(fwd(idx, params, packed))
    assert logits.shape == (B, 1, config.vocab_size)

    ref = _ref_forward(idx, params, config)
    assert jnp.allclose(logits, ref, rtol=1e-2, atol=1e-2), "mismatch vs pure-JAX reference"

    print("KERNEL_OK")
</pallas_src>

<mosaic_0001>
module attributes {stable_mosaic.version = 11 : i64} {
  func.func @gpt_kernel(%arg0: memref<16x32xf32, #tpu.memory_space<vmem>>, %arg1: memref<2x1x32xf32, #tpu.memory_space<vmem>>, %arg2: memref<2x1x32xf32, #tpu.memory_space<vmem>>, %arg3: memref<8x32x8xbf16, #tpu.memory_space<vmem>>, %arg4: memref<8x32x8xbf16, #tpu.memory_space<vmem>>, %arg5: memref<8x32x8xbf16, #tpu.memory_space<vmem>>, %arg6: memref<8x8x32xbf16, #tpu.memory_space<vmem>>, %arg7: memref<2x1x32xf32, #tpu.memory_space<vmem>>, %arg8: memref<2x1x32xf32, #tpu.memory_space<vmem>>, %arg9: memref<2x1x32xf32, #tpu.memory_space<vmem>>, %arg10: memref<2x32x128xbf16, #tpu.memory_space<vmem>>, %arg11: memref<2x1x128xf32, #tpu.memory_space<vmem>>, %arg12: memref<2x128x32xbf16, #tpu.memory_space<vmem>>, %arg13: memref<2x1x32xf32, #tpu.memory_space<vmem>>, %arg14: memref<1x32xf32, #tpu.memory_space<vmem>>, %arg15: memref<1x32xf32, #tpu.memory_space<vmem>>, %arg16: memref<32x256xbf16, #tpu.memory_space<vmem>>, %arg17: memref<2x256xf32, #tpu.memory_space<vmem>>) attributes {dimension_semantics = [], scalar_prefetch = 0 : i64, scratch_operands = 0 : i64, tpu.core_type = #tpu.core_type<tc>} {
    %c0 = arith.constant 0 : index
    %c0_0 = arith.constant 0 : index
    %0 = vector.load %arg0[%c0, %c0_0] : memref<16x32xf32, #tpu.memory_space<vmem>>, vector<16x32xf32>
    %1 = tpu.iota {dimensions = array<i32: 1>} : vector<1x8x8xi32>
    %2 = tpu.iota {dimensions = array<i32: 2>} : vector<1x8x8xi32>
    %3 = arith.cmpi sgt, %2, %1 : vector<1x8x8xi32>
    %cst = arith.constant -1.000000e+30 : f32
    %cst_1 = arith.constant 0.000000e+00 : f32
    %4 = vector.broadcast %cst : f32 to vector<1x8x8xf32>
    %5 = vector.broadcast %cst_1 : f32 to vector<1x8x8xf32>
    %6 = arith.select %3, %4, %5 : vector<1x8x8xi1>, vector<1x8x8xf32>
    %c0_2 = arith.constant 0 : index
    %c0_3 = arith.constant 0 : index
    %c0_4 = arith.constant 0 : index
    %7 = vector.load %arg1[%c0_2, %c0_3, %c0_4] : memref<2x1x32xf32, #tpu.memory_space<vmem>>, vector<1x1x32xf32>
    %8 = vector.shape_cast %7 : vector<1x1x32xf32> to vector<1x32xf32>
    %c0_5 = arith.constant 0 : index
    %c0_6 = arith.constant 0 : index
    %c0_7 = arith.constant 0 : index
    %9 = vector.load %arg2[%c0_5, %c0_6, %c0_7] : memref<2x1x32xf32, #tpu.memory_space<vmem>>, vector<1x1x32xf32>
    %10 = vector.shape_cast %9 : vector<1x1x32xf32> to vector<1x32xf32>
    %cst_8 = arith.constant dense<0.000000e+00> : vector<16xf32>
    %11 = vector.multi_reduction <add>, %0, %cst_8 [1] : vector<16x32xf32> to vector<16xf32>
    %12 = vector.shape_cast %11 : vector<16xf32> to vector<16x1xf32>
    %cst_9 = arith.constant 3.200000e+01 : f32
    %13 = vector.broadcast %cst_9 : f32 to vector<16x1xf32>
    %14 = arith.divf %12, %13 : vector<16x1xf32>
    %15 = vector.broadcast %14 : vector<16x1xf32> to vector<16x32xf32>
    %16 = arith.subf %0, %15 : vector<16x32xf32>
    %17 = vector.broadcast %14 : vector<16x1xf32> to vector<16x32xf32>
    %18 = arith.subf %0, %17 : vector<16x32xf32>
    %19 = arith.mulf %16, %18 : vector<16x32xf32>
    %cst_10 = arith.constant dense<0.000000e+00> : vector<16xf32>
    %20 = vector.multi_reduction <add>, %19, %cst_10 [1] : vector<16x32xf32> to vector<16xf32>
    %21 = vector.shape_cast %20 : vector<16xf32> to vector<16x1xf32>
    %cst_11 = arith.constant 3.200000e+01 : f32
    %22 = vector.broadcast %cst_11 : f32 to vector<16x1xf32>
    %23 = arith.divf %21, %22 : vector<16x1xf32>
    %24 = vector.broadcast %14 : vector<16x1xf32> to vector<16x32xf32>
    %25 = arith.subf %0, %24 : vector<16x32xf32>
    %cst_12 = arith.constant 9.99999974E-6 : f32
    %26 = vector.broadcast %cst_12 : f32 to vector<16x1xf32>
    %27 = arith.addf %23, %26 : vector<16x1xf32>
    %28 = math.rsqrt %27 : vector<16x1xf32>
    %29 = vector.broadcast %28 : vector<16x1xf32> to vector<16x32xf32>
    %30 = arith.mulf %25, %29 : vector<16x32xf32>
    %31 = vector.broadcast %8 : vector<1x32xf32> to vector<16x32xf32>
    %32 = arith.mulf %30, %31 : vector<16x32xf32>
    %33 = vector.broadcast %10 : vector<1x32xf32> to vector<16x32xf32>
    %34 = arith.addf %32, %33 : vector<16x32xf32>
    %35 = arith.truncf %34 : vector<16x32xf32> to vector<16x32xbf16>
    %cst_13 = arith.constant 0.000000e+00 : f32
    %36 = vector.broadcast %cst_13 : f32 to vector<16x32xf32>
    %c0_14 = arith.constant 0 : index
    %c0_15 = arith.constant 0 : index
    %c0_16 = arith.constant 0 : index
    %37 = vector.load %arg3[%c0_14, %c0_15, %c0_16] : memref<8x32x8xbf16, #tpu.memory_space<vmem>>, vector<1x32x8xbf16>
    %38 = vector.shape_cast %37 : vector<1x32x8xbf16> to vector<32x8xbf16>
    %cst_17 = arith.constant dense<0.000000e+00> : vector<16x8xf32>
    %39 = tpu.matmul %35, %38, %cst_17 {dimension_numbers = #tpu.dot_dimension_numbers<[1], [0], [0], [1], [0, 0, 1, 1], [], []>} : vector<16x32xbf16>, vector<32x8xbf16>, vector<16x8xf32> -> vector<16x8xf32>
    %40 = vector.shape_cast %39 : vector<16x8xf32> to vector<2x8x8xf32>
    %c0_18 = arith.constant 0 : index
    %c0_19 = arith.constant 0 : index
    %c0_20 = arith.constant 0 : index
    %41 = vector.load %arg4[%c0_18, %c0_19, %c0_20] : memref<8x32x8xbf16, #tpu.memory_space<vmem>>, vector<1x32x8xbf16>
    %42 = vector.shape_cast %41 : vector<1x32x8xbf16> to vector<32x8xbf16>
    %cst_21 = arith.constant dense<0.000000e+00> : vector<16x8xf32>
    %43 = tpu.matmul %35, %42, %cst_21 {dimension_numbers = #tpu.dot_dimension_numbers<[1], [0], [0], [1], [0, 0, 1, 1], [], []>} : vector<16x32xbf16>, vector<32x8xbf16>, vector<16x8xf32> -> vector<16x8xf32>
    %44 = vector.shape_cast %43 : vector<16x8xf32> to vector<2x8x8xf32>
    %c0_22 = arith.constant 0 : index
    %c0_23 = arith.constant 0 : index
    %c0_24 = arith.constant 0 : index
    %45 = vector.load %arg5[%c0_22, %c0_23, %c0_24] : memref<8x32x8xbf16, #tpu.memory_space<vmem>>, vector<1x32x8xbf16>
    %46 = vector.shape_cast %45 : vector<1x32x8xbf16> to vector<32x8xbf16>
    %cst_25 = arith.constant dense<0.000000e+00> : vector<16x8xf32>
    %47 = tpu.matmul %35, %46, %cst_25 {dimension_numbers = #tpu.dot_dimension_numbers<[1], [0], [0], [1], [0, 0, 1, 1], [], []>} : vector<16x32xbf16>, vector<32x8xbf16>, vector<16x8xf32> -> vector<16x8xf32>
    %48 = vector.shape_cast %47 : vector<16x8xf32> to vector<2x8x8xf32>
    %49 = arith.truncf %40 : vector<2x8x8xf32> to vector<2x8x8xbf16>
    %50 = arith.truncf %44 : vector<2x8x8xf32> to vector<2x8x8xbf16>
    "tpu.trace_start"() <{level = 10 : i32, message = "bqd,bkd->bqk"}> : () -> ()
    %cst_26 = arith.constant dense<0.000000e+00> : vector<2x8x8xf32>
    %51 = tpu.matmul %49, %50, %cst_26 {dimension_numbers = #tpu.dot_dimension_numbers<[2], [2], [1], [1], [0, 0, 0, 1, 1, 1], [0], [0]>} : vector<2x8x8xbf16>, vector<2x8x8xbf16>, vector<2x8x8xf32> -> vector<2x8x8xf32>
    "tpu.trace_stop"() : () -> ()
    %cst_27 = arith.constant 0.353553385 : f32
    %52 = vector.broadcast %cst_27 : f32 to vector<2x8x8xf32>
    %53 = arith.mulf %51, %52 : vector<2x8x8xf32>
    %54 = vector.broadcast %6 : vector<1x8x8xf32> to vector<2x8x8xf32>
    %55 = arith.addf %53, %54 : vector<2x8x8xf32>
    %cst_28 = arith.constant dense<0xFF800000> : vector<2x8xf32>
    %56 = vector.multi_reduction <maximumf>, %55, %cst_28 [2] : vector<2x8x8xf32> to vector<2x8xf32>
    %57 = vector.shape_cast %56 : vector<2x8xf32> to vector<2x8x1xf32>
    %58 = vector.broadcast %57 : vector<2x8x1xf32> to vector<2x8x8xf32>
    %59 = arith.subf %55, %58 : vector<2x8x8xf32>
    %60 = math.exp %59 : vector<2x8x8xf32>
    %cst_29 = arith.constant dense<0.000000e+00> : vector<2x8xf32>
    %61 = vector.multi_reduction <add>, %60, %cst_29 [2] : vector<2x8x8xf32> to vector<2x8xf32>
    %62 = vector.shape_cast %61 : vector<2x8xf32> to vector<2x8x1xf32>
    %63 = vector.broadcast %62 : vector<2x8x1xf32> to vector<2x8x8xf32>
    %64 = arith.divf %60, %63 : vector<2x8x8xf32>
    %65 = arith.truncf %64 : vector<2x8x8xf32> to vector<2x8x8xbf16>
    %66 = arith.truncf %48 : vector<2x8x8xf32> to vector<2x8x8xbf16>
    "tpu.trace_start"() <{level = 10 : i32, message = "bqk,bkd->bqd"}> : () -> ()
    %cst_30 = arith.constant dense<0.000000e+00> : vector<2x8x8xf32>
    %67 = tpu.matmul %65, %66, %cst_30 {dimension_numbers = #tpu.dot_dimension_numbers<[2], [1], [1], [2], [0, 0, 0, 1, 1, 2], [0], [0]>} : vector<2x8x8xbf16>, vector<2x8x8xbf16>, vector<2x8x8xf32> -> vector<2x8x8xf32>
    "tpu.trace_stop"() : () -> ()
    %68 = vector.shape_cast %67 : vector<2x8x8xf32> to vector<16x8xf32>
    %c0_31 = arith.constant 0 : index
    %c0_32 = arith.constant 0 : index
    %c0_33 = arith.constant 0 : index
    %69 = vector.load %arg6[%c0_31, %c0_32, %c0_33] : memref<8x8x32xbf16, #tpu.memory_space<vmem>>, vector<1x8x32xbf16>
    %70 = vector.shape_cast %69 : vector<1x8x32xbf16> to vector<8x32xbf16>
    %71 = arith.truncf %68 : vector<16x8xf32> to vector<16x8xbf16>
    %cst_34 = arith.constant dense<0.000000e+00> : vector<16x32xf32>
    %72 = tpu.matmul %71, %70, %cst_34 {dimension_numbers = #tpu.dot_dimension_numbers<[1], [0], [0], [1], [0, 0, 1, 1], [], []>} : vector<16x8xbf16>, vector<8x32xbf16>, vector<16x32xf32> -> vector<16x32xf32>
    %73 = arith.addf %36, %72 : vector<16x32xf32>
    %c1 = arith.constant 1 : index
    %c0_35 = arith.constant 0 : index
    %c0_36 = arith.constant 0 : index
    %74 = vector.load %arg3[%c1, %c0_35, %c0_36] : memref<8x32x8xbf16, #tpu.memory_space<vmem>>, vector<1x32x8xbf16>
    %75 = vector.shape_cast %74 : vector<1x32x8xbf16> to vector<32x8xbf16>
    %cst_37 = arith.constant dense<0.000000e+00> : vector<16x8xf32>
    %76 = tpu.matmul %35, %75, %cst_37 {dimension_numbers = #tpu.dot_dimension_numbers<[1], [0], [0], [1], [0, 0, 1, 1], [], []>} : vector<16x32xbf16>, vector<32x8xbf16>, vector<16x8xf32> -> vector<16x8xf32>
    %77 = vector.shape_cast %76 : vector<16x8xf32> to vector<2x8x8xf32>
    %c1_38 = arith.constant 1 : index
    %c0_39 = arith.constant 0 : index
    %c0_40 = arith.constant 0 : index
    %78 = vector.load %arg4[%c1_38, %c0_39, %c0_40] : memref<8x32x8xbf16, #tpu.memory_space<vmem>>, vector<1x32x8xbf16>
    %79 = vector.shape_cast %78 : vector<1x32x8xbf16> to vector<32x8xbf16>
    %cst_41 = arith.constant dense<0.000000e+00> : vector<16x8xf32>
    %80 = tpu.matmul %35, %79, %cst_41 {dimension_numbers = #tpu.dot_dimension_numbers<[1], [0], [0], [1], [0, 0, 1, 1], [], []>} : vector<16x32xbf16>, vector<32x8xbf16>, vector<16x8xf32> -> vector<16x8xf32>
    %81 = vector.shape_cast %80 : vector<16x8xf32> to vector<2x8x8xf32>
    %c1_42 = arith.constant 1 : index
    %c0_43 = arith.constant 0 : index
    %c0_44 = arith.constant 0 : index
    %82 = vector.load %arg5[%c1_42, %c0_43, %c0_44] : memref<8x32x8xbf16, #tpu.memory_space<vmem>>, vector<1x32x8xbf16>
    %83 = vector.shape_cast %82 : vector<1x32x8xbf16> to vector<32x8xbf16>
    %cst_45 = arith.constant dense<0.000000e+00> : vector<16x8xf32>
    %84 = tpu.matmul %35, %83, %cst_45 {dimension_numbers = #tpu.dot_dimension_numbers<[1], [0], [0], [1], [0, 0, 1, 1], [], []>} : vector<16x32xbf16>, vector<32x8xbf16>, vector<16x8xf32> -> vector<16x8xf32>
    %85 = vector.shape_cast %84 : vector<16x8xf32> to vector<2x8x8xf32>
    %86 = arith.truncf %77 : vector<2x8x8xf32> to vector<2x8x8xbf16>
    %87 = arith.truncf %81 : vector<2x8x8xf32> to vector<2x8x8xbf16>
    "tpu.trace_start"() <{level = 10 : i32, message = "bqd,bkd->bqk"}> : () -> ()
    %cst_46 = arith.constant dense<0.000000e+00> : vector<2x8x8xf32>
    %88 = tpu.matmul %86, %87, %cst_46 {dimension_numbers = #tpu.dot_dimension_numbers<[2], [2], [1], [1], [0, 0, 0, 1, 1, 1], [0], [0]>} : vector<2x8x8xbf16>, vector<2x8x8xbf16>, vector<2x8x8xf32> -> vector<2x8x8xf32>
    "tpu.trace_stop"() : () -> ()
    %cst_47 = arith.constant 0.353553385 : f32
    %89 = vector.broadcast %cst_47 : f32 to vector<2x8x8xf32>
    %90 = arith.mulf %88, %89 : vector<2x8x8xf32>
    %91 = vector.broadcast %6 : vector<1x8x8xf32> to vector<2x8x8xf32>
    %92 = arith.addf %90, %91 : vector<2x8x8xf32>
    %cst_48 = arith.constant dense<0xFF800000> : vector<2x8xf32>
    %93 = vector.multi_reduction <maximumf>, %92, %cst_48 [2] : vector<2x8x8xf32> to vector<2x8xf32>
    %94 = vector.shape_cast %93 : vector<2x8xf32> to vector<2x8x1xf32>
    %95 = vector.broadcast %94 : vector<2x8x1xf32> to vector<2x8x8xf32>
    %96 = arith.subf %92, %95 : vector<2x8x8xf32>
    %97 = math.exp %96 : vector<2x8x8xf32>
    %cst_49 = arith.constant dense<0.000000e+00> : vector<2x8xf32>
    %98 = vector.multi_reduction <add>, %97, %cst_49 [2] : vector<2x8x8xf32> to vector<2x8xf32>
    %99 = vector.shape_cast %98 : vector<2x8xf32> to vector<2x8x1xf32>
    %100 = vector.broadcast %99 : vector<2x8x1xf32> to vector<2x8x8xf32>
    %101 = arith.divf %97, %100 : vector<2x8x8xf32>
    %102 = arith.truncf %101 : vector<2x8x8xf32> to vector<2x8x8xbf16>
    %103 = arith.truncf %85 : vector<2x8x8xf32> to vector<2x8x8xbf16>
    "tpu.trace_start"() <{level = 10 : i32, message = "bqk,bkd->bqd"}> : () -> ()
    %cst_50 = arith.constant dense<0.000000e+00> : vector<2x8x8xf32>
    %104 = tpu.matmul %102, %103, %cst_50 {dimension_numbers = #tpu.dot_dimension_numbers<[2], [1], [1], [2], [0, 0, 0, 1, 1, 2], [0], [0]>} : vector<2x8x8xbf16>, vector<2x8x8xbf16>, vector<2x8x8xf32> -> vector<2x8x8xf32>
    "tpu.trace_stop"() : () -> ()
    %105 = vector.shape_cast %104 : vector<2x8x8xf32> to vector<16x8xf32>
    %c1_51 = arith.constant 1 : index
    %c0_52 = arith.constant 0 : index
    %c0_53 = arith.constant 0 : index
    %106 = vector.load %arg6[%c1_51, %c0_52, %c0_53] : memref<8x8x32xbf16, #tpu.memory_space<vmem>>, vector<1x8x32xbf16>
    %107 = vector.shape_cast %106 : vector<1x8x32xbf16> to vector<8x32xbf16>
    %108 = arith.truncf %105 : vector<16x8xf32> to vector<16x8xbf16>
    %cst_54 = arith.constant dense<0.000000e+00> : vector<16x32xf32>
    %109 = tpu.matmul %108, %107, %cst_54 {dimension_numbers = #tpu.dot_dimension_numbers<[1], [0], [0], [1], [0, 0, 1, 1], [], []>} : vector<16x8xbf16>, vector<8x32xbf16>, vector<16x32xf32> -> vector<16x32xf32>
    %110 = arith.addf %73, %109 : vector<16x32xf32>
    %c2 = arith.constant 2 : index
    %c0_55 = arith.constant 0 : index
    %c0_56 = arith.constant 0 : index
    %111 = vector.load %arg3[%c2, %c0_55, %c0_56] : memref<8x32x8xbf16, #tpu.memory_space<vmem>>, vector<1x32x8xbf16>
    %112 = vector.shape_cast %111 : vector<1x32x8xbf16> to vector<32x8xbf16>
    %cst_57 = arith.constant dense<0.000000e+00> : vector<16x8xf32>
    %113 = tpu.matmul %35, %112, %cst_57 {dimension_numbers = #tpu.dot_dimension_numbers<[1], [0], [0], [1], [0, 0, 1, 1], [], []>} : vector<16x32xbf16>, vector<32x8xbf16>, vector<16x8xf32> -> vector<16x8xf32>
    %114 = vector.shape_cast %113 : vector<16x8xf32> to vector<2x8x8xf32>
    %c2_58 = arith.constant 2 : index
    %c0_59 = arith.constant 0 : index
    %c0_60 = arith.constant 0 : index
    %115 = vector.load %arg4[%c2_58, %c0_59, %c0_60] : memref<8x32x8xbf16, #tpu.memory_space<vmem>>, vector<1x32x8xbf16>
    %116 = vector.shape_cast %115 : vector<1x32x8xbf16> to vector<32x8xbf16>
    %cst_61 = arith.constant dense<0.000000e+00> : vector<16x8xf32>
    %117 = tpu.matmul %35, %116, %cst_61 {dimension_numbers = #tpu.dot_dimension_numbers<[1], [0], [0], [1], [0, 0, 1, 1], [], []>} : vector<16x32xbf16>, vector<32x8xbf16>, vector<16x8xf32> -> vector<16x8xf32>
    %118 = vector.shape_cast %117 : vector<16x8xf32> to vector<2x8x8xf32>
    %c2_62 = arith.constant 2 : index
    %c0_63 = arith.constant 0 : index
    %c0_64 = arith.constant 0 : index
    %119 = vector.load %arg5[%c2_62, %c0_63, %c0_64] : memref<8x32x8xbf16, #tpu.memory_space<vmem>>, vector<1x32x8xbf16>
    %120 = vector.shape_cast %119 : vector<1x32x8xbf16> to vector<32x8xbf16>
    %cst_65 = arith.constant dense<0.000000e+00> : vector<16x8xf32>
    %121 = tpu.matmul %35, %120, %cst_65 {dimension_numbers = #tpu.dot_dimension_numbers<[1], [0], [0], [1], [0, 0, 1, 1], [], []>} : vector<16x32xbf16>, vector<32x8xbf16>, vector<16x8xf32> -> vector<16x8xf32>
    %122 = vector.shape_cast %121 : vector<16x8xf32> to vector<2x8x8xf32>
    %123 = arith.truncf %114 : vector<2x8x8xf32> to vector<2x8x8xbf16>
    %124 = arith.truncf %118 : vector<2x8x8xf32> to vector<2x8x8xbf16>
    "tpu.trace_start"() <{level = 10 : i32, message = "bqd,bkd->bqk"}> : () -> ()
    %cst_66 = arith.constant dense<0.000000e+00> : vector<2x8x8xf32>
    %125 = tpu.matmul %123, %124, %cst_66 {dimension_numbers = #tpu.dot_dimension_numbers<[2], [2], [1], [1], [0, 0, 0, 1, 1, 1], [0], [0]>} : vector<2x8x8xbf16>, vector<2x8x8xbf16>, vector<2x8x8xf32> -> vector<2x8x8xf32>
    "tpu.trace_stop"() : () -> ()
    %cst_67 = arith.constant 0.353553385 : f32
    %126 = vector.broadcast %cst_67 : f32 to vector<2x8x8xf32>
    %127 = arith.mulf %125, %126 : vector<2x8x8xf32>
    %128 = vector.broadcast %6 : vector<1x8x8xf32> to vector<2x8x8xf32>
    %129 = arith.addf %127, %128 : vector<2x8x8xf32>
    %cst_68 = arith.constant dense<0xFF800000> : vector<2x8xf32>
    %130 = vector.multi_reduction <maximumf>, %129, %cst_68 [2] : vector<2x8x8xf32> to vector<2x8xf32>
    %131 = vector.shape_cast %130 : vector<2x8xf32> to vector<2x8x1xf32>
    %132 = vector.broadcast %131 : vector<2x8x1xf32> to vector<2x8x8xf32>
    %133 = arith.subf %129, %132 : vector<2x8x8xf32>
    %134 = math.exp %133 : vector<2x8x8xf32>
    %cst_69 = arith.constant dense<0.000000e+00> : vector<2x8xf32>
    %135 = vector.multi_reduction <add>, %134, %cst_69 [2] : vector<2x8x8xf32> to vector<2x8xf32>
    %136 = vector.shape_cast %135 : vector<2x8xf32> to vector<2x8x1xf32>
    %137 = vector.broadcast %136 : vector<2x8x1xf32> to vector<2x8x8xf32>
    %138 = arith.divf %134, %137 : vector<2x8x8xf32>
    %139 = arith.truncf %138 : vector<2x8x8xf32> to vector<2x8x8xbf16>
    %140 = arith.truncf %122 : vector<2x8x8xf32> to vector<2x8x8xbf16>
    "tpu.trace_start"() <{level = 10 : i32, message = "bqk,bkd->bqd"}> : () -> ()
    %cst_70 = arith.constant dense<0.000000e+00> : vector<2x8x8xf32>
    %141 = tpu.matmul %139, %140, %cst_70 {dimension_numbers = #tpu.dot_dimension_numbers<[2], [1], [1], [2], [0, 0, 0, 1, 1, 2], [0], [0]>} : vector<2x8x8xbf16>, vector<2x8x8xbf16>, vector<2x8x8xf32> -> vector<2x8x8xf32>
    "tpu.trace_stop"() : () -> ()
    %142 = vector.shape_cast %141 : vector<2x8x8xf32> to vector<16x8xf32>
    %c2_71 = arith.constant 2 : index
    %c0_72 = arith.constant 0 : index
    %c0_73 = arith.constant 0 : index
    %143 = vector.load %arg6[%c2_71, %c0_72, %c0_73] : memref<8x8x32xbf16, #tpu.memory_space<vmem>>, vector<1x8x32xbf16>
    %144 = vector.shape_cast %143 : vector<1x8x32xbf16> to vector<8x32xbf16>
    %145 = arith.truncf %142 : vector<16x8xf32> to vector<16x8xbf16>
    %cst_74 = arith.constant dense<0.000000e+00> : vector<16x32xf32>
    %146 = tpu.matmul %145, %144, %cst_74 {dimension_numbers = #tpu.dot_dimension_numbers<[1], [0], [0], [1], [0, 0, 1, 1], [], []>} : vector<16x8xbf16>, vector<8x32xbf16>, vector<16x32xf32> -> vector<16x32xf32>
    %147 = arith.addf %110, %146 : vector<16x32xf32>
    %c3 = arith.constant 3 : index
    %c0_75 = arith.constant 0 : index
    %c0_76 = arith.constant 0 : index
    %148 = vector.load %arg3[%c3, %c0_75, %c0_76] : memref<8x32x8xbf16, #tpu.memory_space<vmem>>, vector<1x32x8xbf16>
    %149 = vector.shape_cast %148 : vector<1x32x8xbf16> to vector<32x8xbf16>
    %cst_77 = arith.constant dense<0.000000e+00> : vector<16x8xf32>
    %150 = tpu.matmul %35, %149, %cst_77 {dimension_numbers = #tpu.dot_dimension_numbers<[1], [0], [0], [1], [0, 0, 1, 1], [], []>} : vector<16x32xbf16>, vector<32x8xbf16>, vector<16x8xf32> -> vector<16x8xf32>
    %151 = vector.shape_cast %150 : vector<16x8xf32> to vector<2x8x8xf32>
    %c3_78 = arith.constant 3 : index
    %c0_79 = arith.constant 0 : index
    %c0_80 = arith.constant 0 : index
    %152 = vector.load %arg4[%c3_78, %c0_79, %c0_80] : memref<8x32x8xbf16, #tpu.memory_space<vmem>>, vector<1x32x8xbf16>
    %153 = vector.shape_cast %152 : vector<1x32x8xbf16> to vector<32x8xbf16>
    %cst_81 = arith.constant dense<0.000000e+00> : vector<16x8xf32>
    %154 = tpu.matmul %35, %153, %cst_81 {dimension_numbers = #tpu.dot_dimension_numbers<[1], [0], [0], [1], [0, 0, 1, 1], [], []>} : vector<16x32xbf16>, vector<32x8xbf16>, vector<16x8xf32> -> vector<16x8xf32>
    %155 = vector.shape_cast %154 : vector<16x8xf32> to vector<2x8x8xf32>
    %c3_82 = arith.constant 3 : index
    %c0_83 = arith.constant 0 : index
    %c0_84 = arith.constant 0 : index
    %156 = vector.load %arg5[%c3_82, %c0_83, %c0_84] : memref<8x32x8xbf16, #tpu.memory_space<vmem>>, vector<1x32x8xbf16>
    %157 = vector.shape_cast %156 : vector<1x32x8xbf16> to vector<32x8xbf16>
    %cst_85 = arith.constant dense<0.000000e+00> : vector<16x8xf32>
    %158 = tpu.matmul %35, %157, %cst_85 {dimension_numbers = #tpu.dot_dimension_numbers<[1], [0], [0], [1], [0, 0, 1, 1], [], []>} : vector<16x32xbf16>, vector<32x8xbf16>, vector<16x8xf32> -> vector<16x8xf32>
    %159 = vector.shape_cast %158 : vector<16x8xf32> to vector<2x8x8xf32>
    %160 = arith.truncf %151 : vector<2x8x8xf32> to vector<2x8x8xbf16>
    %161 = arith.truncf %155 : vector<2x8x8xf32> to vector<2x8x8xbf16>
    "tpu.trace_start"() <{level = 10 : i32, message = "bqd,bkd->bqk"}> : () -> ()
    %cst_86 = arith.constant dense<0.000000e+00> : vector<2x8x8xf32>
    %162 = tpu.matmul %160, %161, %cst_86 {dimension_numbers = #tpu.dot_dimension_numbers<[2], [2], [1], [1], [0, 0, 0, 1, 1, 1], [0], [0]>} : vector<2x8x8xbf16>, vector<2x8x8xbf16>, vector<2x8x8xf32> -> vector<2x8x8xf32>
    "tpu.trace_stop"() : () -> ()
    %cst_87 = arith.constant 0.353553385 : f32
    %163 = vector.broadcast %cst_87 : f32 to vector<2x8x8xf32>
    %164 = arith.mulf %162, %163 : vector<2x8x8xf32>
    %165 = vector.broadcast %6 : vector<1x8x8xf32> to vector<2x8x8xf32>
    %166 = arith.addf %164, %165 : vector<2x8x8xf32>
    %cst_88 = arith.constant dense<0xFF800000> : vector<2x8xf32>
    %167 = vector.multi_reduction <maximumf>, %166, %cst_88 [2] : vector<2x8x8xf32> to vector<2x8xf32>
    %168 = vector.shape_cast %167 : vector<2x8xf32> to vector<2x8x1xf32>
    %169 = vector.broadcast %168 : vector<2x8x1xf32> to vector<2x8x8xf32>
    %170 = arith.subf %166, %169 : vector<2x8x8xf32>
    %171 = math.exp %170 : vector<2x8x8xf32>
    %cst_89 = arith.constant dense<0.000000e+00> : vector<2x8xf32>
    %172 = vector.multi_reduction <add>, %171, %cst_89 [2] : vector<2x8x8xf32> to vector<2x8xf32>
    %173 = vector.shape_cast %172 : vector<2x8xf32> to vector<2x8x1xf32>
    %174 = vector.broadcast %173 : vector<2x8x1xf32> to vector<2x8x8xf32>
    %175 = arith.divf %171, %174 : vector<2x8x8xf32>
    %176 = arith.truncf %175 : vector<2x8x8xf32> to vector<2x8x8xbf16>
    %177 = arith.truncf %159 : vector<2x8x8xf32> to vector<2x8x8xbf16>
    "tpu.trace_start"() <{level = 10 : i32, message = "bqk,bkd->bqd"}> : () -> ()
    %cst_90 = arith.constant dense<0.000000e+00> : vector<2x8x8xf32>
    %178 = tpu.matmul %176, %177, %cst_90 {dimension_numbers = #tpu.dot_dimension_numbers<[2], [1], [1], [2], [0, 0, 0, 1, 1, 2], [0], [0]>} : vector<2x8x8xbf16>, vector<2x8x8xbf16>, vector<2x8x8xf32> -> vector<2x8x8xf32>
    "tpu.trace_stop"() : () -> ()
    %179 = vector.shape_cast %178 : vector<2x8x8xf32> to vector<16x8xf32>
    %c3_91 = arith.constant 3 : index
    %c0_92 = arith.constant 0 : index
    %c0_93 = arith.constant 0 : index
    %180 = vector.load %arg6[%c3_91, %c0_92, %c0_93] : memref<8x8x32xbf16, #tpu.memory_space<vmem>>, vector<1x8x32xbf16>
    %181 = vector.shape_cast %180 : vector<1x8x32xbf16> to vector<8x32xbf16>
    %182 = arith.truncf %179 : vector<16x8xf32> to vector<16x8xbf16>
    %cst_94 = arith.constant dense<0.000000e+00> : vector<16x32xf32>
    %183 = tpu.matmul %182, %181, %cst_94 {dimension_numbers = #tpu.dot_dimension_numbers<[1], [0], [0], [1], [0, 0, 1, 1], [], []>} : vector<16x8xbf16>, vector<8x32xbf16>, vector<16x32xf32> -> vector<16x32xf32>
    %184 = arith.addf %147, %183 : vector<16x32xf32>
    %185 = arith.addf %0, %184 : vector<16x32xf32>
    %c0_95 = arith.constant 0 : index
    %c0_96 = arith.constant 0 : index
    %c0_97 = arith.constant 0 : index
    %186 = vector.load %arg7[%c0_95, %c0_96, %c0_97] : memref<2x1x32xf32, #tpu.memory_space<vmem>>, vector<1x1x32xf32>
    %187 = vector.shape_cast %186 : vector<1x1x32xf32> to vector<1x32xf32>
    %188 = vector.broadcast %187 : vector<1x32xf32> to vector<16x32xf32>
    %189 = arith.addf %185, %188 : vector<16x32xf32>
    %c0_98 = arith.constant 0 : index
    %c0_99 = arith.constant 0 : index
    %c0_100 = arith.constant 0 : index
    %190 = vector.load %arg8[%c0_98, %c0_99, %c0_100] : memref<2x1x32xf32, #tpu.memory_space<vmem>>, vector<1x1x32xf32>
    %191 = vector.shape_cast %190 : vector<1x1x32xf32> to vector<1x32xf32>
    %c0_101 = arith.constant 0 : index
    %c0_102 = arith.constant 0 : index
    %c0_103 = arith.constant 0 : index
    %192 = vector.load %arg9[%c0_101, %c0_102, %c0_103] : memref<2x1x32xf32, #tpu.memory_space<vmem>>, vector<1x1x32xf32>
    %193 = vector.shape_cast %192 : vector<1x1x32xf32> to vector<1x32xf32>
    %cst_104 = arith.constant dense<0.000000e+00> : vector<16xf32>
    %194 = vector.multi_reduction <add>, %189, %cst_104 [1] : vector<16x32xf32> to vector<16xf32>
    %195 = vector.shape_cast %194 : vector<16xf32> to vector<16x1xf32>
    %cst_105 = arith.constant 3.200000e+01 : f32
    %196 = vector.broadcast %cst_105 : f32 to vector<16x1xf32>
    %197 = arith.divf %195, %196 : vector<16x1xf32>
    %198 = vector.broadcast %197 : vector<16x1xf32> to vector<16x32xf32>
    %199 = arith.subf %189, %198 : vector<16x32xf32>
    %200 = vector.broadcast %197 : vector<16x1xf32> to vector<16x32xf32>
    %201 = arith.subf %189, %200 : vector<16x32xf32>
    %202 = arith.mulf %199, %201 : vector<16x32xf32>
    %cst_106 = arith.constant dense<0.000000e+00> : vector<16xf32>
    %203 = vector.multi_reduction <add>, %202, %cst_106 [1] : vector<16x32xf32> to vector<16xf32>
    %204 = vector.shape_cast %203 : vector<16xf32> to vector<16x1xf32>
    %cst_107 = arith.constant 3.200000e+01 : f32
    %205 = vector.broadcast %cst_107 : f32 to vector<16x1xf32>
    %206 = arith.divf %204, %205 : vector<16x1xf32>
    %207 = vector.broadcast %197 : vector<16x1xf32> to vector<16x32xf32>
    %208 = arith.subf %189, %207 : vector<16x32xf32>
    %cst_108 = arith.constant 9.99999974E-6 : f32
    %209 = vector.broadcast %cst_108 : f32 to vector<16x1xf32>
    %210 = arith.addf %206, %209 : vector<16x1xf32>
    %211 = math.rsqrt %210 : vector<16x1xf32>
    %212 = vector.broadcast %211 : vector<16x1xf32> to vector<16x32xf32>
    %213 = arith.mulf %208, %212 : vector<16x32xf32>
    %214 = vector.broadcast %191 : vector<1x32xf32> to vector<16x32xf32>
    %215 = arith.mulf %213, %214 : vector<16x32xf32>
    %216 = vector.broadcast %193 : vector<1x32xf32> to vector<16x32xf32>
    %217 = arith.addf %215, %216 : vector<16x32xf32>
    %c0_109 = arith.constant 0 : index
    %c0_110 = arith.constant 0 : index
    %c0_111 = arith.constant 0 : index
    %218 = vector.load %arg10[%c0_109, %c0_110, %c0_111] : memref<2x32x128xbf16, #tpu.memory_space<vmem>>, vector<1x32x128xbf16>
    %219 = vector.shape_cast %218 : vector<1x32x128xbf16> to vector<32x128xbf16>
    %220 = arith.truncf %217 : vector<16x32xf32> to vector<16x32xbf16>
    %cst_112 = arith.constant dense<0.000000e+00> : vector<16x128xf32>
    %221 = tpu.matmul %220, %219, %cst_112 {dimension_numbers = #tpu.dot_dimension_numbers<[1], [0], [0], [1], [0, 0, 1, 1], [], []>} : vector<16x32xbf16>, vector<32x128xbf16>, vector<16x128xf32> -> vector<16x128xf32>
    %c0_113 = arith.constant 0 : index
    %c0_114 = arith.constant 0 : index
    %c0_115 = arith.constant 0 : index
    %222 = vector.load %arg11[%c0_113, %c0_114, %c0_115] : memref<2x1x128xf32, #tpu.memory_space<vmem>>, vector<1x1x128xf32>
    %223 = vector.shape_cast %222 : vector<1x1x128xf32> to vector<1x128xf32>
    %224 = vector.broadcast %223 : vector<1x128xf32> to vector<16x128xf32>
    %225 = arith.addf %221, %224 : vector<16x128xf32>
    %cst_116 = arith.constant 5.000000e-01 : f32
    %226 = vector.broadcast %cst_116 : f32 to vector<16x128xf32>
    %227 = arith.mulf %226, %225 : vector<16x128xf32>
    %cst_117 = arith.constant 4.471500e-02 : f32
    %228 = vector.broadcast %cst_117 : f32 to vector<16x128xf32>
    %229 = arith.mulf %228, %225 : vector<16x128xf32>
    %230 = arith.mulf %229, %225 : vector<16x128xf32>
    %231 = arith.mulf %230, %225 : vector<16x128xf32>
    %232 = arith.addf %225, %231 : vector<16x128xf32>
    %cst_118 = arith.constant 0.797884583 : f32
    %233 = vector.broadcast %cst_118 : f32 to vector<16x128xf32>
    %234 = arith.mulf %233, %232 : vector<16x128xf32>
    %235 = math.tanh %234 : vector<16x128xf32>
    %cst_119 = arith.constant 1.000000e+00 : f32
    %236 = vector.broadcast %cst_119 : f32 to vector<16x128xf32>
    %237 = arith.addf %236, %235 : vector<16x128xf32>
    %238 = arith.mulf %227, %237 : vector<16x128xf32>
    %c0_120 = arith.constant 0 : index
    %c0_121 = arith.constant 0 : index
    %c0_122 = arith.constant 0 : index
    %239 = vector.load %arg12[%c0_120, %c0_121, %c0_122] : memref<2x128x32xbf16, #tpu.memory_space<vmem>>, vector<1x128x32xbf16>
    %240 = vector.shape_cast %239 : vector<1x128x32xbf16> to vector<128x32xbf16>
    %241 = arith.truncf %238 : vector<16x128xf32> to vector<16x128xbf16>
    %cst_123 = arith.constant dense<0.000000e+00> : vector<16x32xf32>
    %242 = tpu.matmul %241, %240, %cst_123 {dimension_numbers = #tpu.dot_dimension_numbers<[1], [0], [0], [1], [0, 0, 1, 1], [], []>} : vector<16x128xbf16>, vector<128x32xbf16>, vector<16x32xf32> -> vector<16x32xf32>
    %243 = arith.addf %189, %242 : vector<16x32xf32>
    %c0_124 = arith.constant 0 : index
    %c0_125 = arith.constant 0 : index
    %c0_126 = arith.constant 0 : index
    %244 = vector.load %arg13[%c0_124, %c0_125, %c0_126] : memref<2x1x32xf32, #tpu.memory_space<vmem>>, vector<1x1x32xf32>
    %245 = vector.shape_cast %244 : vector<1x1x32xf32> to vector<1x32xf32>
    %246 = vector.broadcast %245 : vector<1x32xf32> to vector<16x32xf32>
    %247 = arith.addf %243, %246 : vector<16x32xf32>
    %c1_127 = arith.constant 1 : index
    %c0_128 = arith.constant 0 : index
    %c0_129 = arith.constant 0 : index
    %248 = vector.load %arg1[%c1_127, %c0_128, %c0_129] : memref<2x1x32xf32, #tpu.memory_space<vmem>>, vector<1x1x32xf32>
    %249 = vector.shape_cast %248 : vector<1x1x32xf32> to vector<1x32xf32>
    %c1_130 = arith.constant 1 : index
    %c0_131 = arith.constant 0 : index
    %c0_132 = arith.constant 0 : index
    %250 = vector.load %arg2[%c1_130, %c0_131, %c0_132] : memref<2x1x32xf32, #tpu.memory_space<vmem>>, vector<1x1x32xf32>
    %251 = vector.shape_cast %250 : vector<1x1x32xf32> to vector<1x32xf32>
    %cst_133 = arith.constant dense<0.000000e+00> : vector<16xf32>
    %252 = vector.multi_reduction <add>, %247, %cst_133 [1] : vector<16x32xf32> to vector<16xf32>
    %253 = vector.shape_cast %252 : vector<16xf32> to vector<16x1xf32>
    %cst_134 = arith.constant 3.200000e+01 : f32
    %254 = vector.broadcast %cst_134 : f32 to vector<16x1xf32>
    %255 = arith.divf %253, %254 : vector<16x1xf32>
    %256 = vector.broadcast %255 : vector<16x1xf32> to vector<16x32xf32>
    %257 = arith.subf %247, %256 : vector<16x32xf32>
    %258 = vector.broadcast %255 : vector<16x1xf32> to vector<16x32xf32>
    %259 = arith.subf %247, %258 : vector<16x32xf32>
    %260 = arith.mulf %257, %259 : vector<16x32xf32>
    %cst_135 = arith.constant dense<0.000000e+00> : vector<16xf32>
    %261 = vector.multi_reduction <add>, %260, %cst_135 [1] : vector<16x32xf32> to vector<16xf32>
    %262 = vector.shape_cast %261 : vector<16xf32> to vector<16x1xf32>
    %cst_136 = arith.constant 3.200000e+01 : f32
    %263 = vector.broadcast %cst_136 : f32 to vector<16x1xf32>
    %264 = arith.divf %262, %263 : vector<16x1xf32>
    %265 = vector.broadcast %255 : vector<16x1xf32> to vector<16x32xf32>
    %266 = arith.subf %247, %265 : vector<16x32xf32>
    %cst_137 = arith.constant 9.99999974E-6 : f32
    %267 = vector.broadcast %cst_137 : f32 to vector<16x1xf32>
    %268 = arith.addf %264, %267 : vector<16x1xf32>
    %269 = math.rsqrt %268 : vector<16x1xf32>
    %270 = vector.broadcast %269 : vector<16x1xf32> to vector<16x32xf32>
    %271 = arith.mulf %266, %270 : vector<16x32xf32>
    %272 = vector.broadcast %249 : vector<1x32xf32> to vector<16x32xf32>
    %273 = arith.mulf %271, %272 : vector<16x32xf32>
    %274 = vector.broadcast %251 : vector<1x32xf32> to vector<16x32xf32>
    %275 = arith.addf %273, %274 : vector<16x32xf32>
    %276 = arith.truncf %275 : vector<16x32xf32> to vector<16x32xbf16>
    %cst_138 = arith.constant 0.000000e+00 : f32
    %277 = vector.broadcast %cst_138 : f32 to vector<16x32xf32>
    %c4 = arith.constant 4 : index
    %c0_139 = arith.constant 0 : index
    %c0_140 = arith.constant 0 : index
    %278 = vector.load %arg3[%c4, %c0_139, %c0_140] : memref<8x32x8xbf16, #tpu.memory_space<vmem>>, vector<1x32x8xbf16>
    %279 = vector.shape_cast %278 : vector<1x32x8xbf16> to vector<32x8xbf16>
    %cst_141 = arith.constant dense<0.000000e+00> : vector<16x8xf32>
    %280 = tpu.matmul %276, %279, %cst_141 {dimension_numbers = #tpu.dot_dimension_numbers<[1], [0], [0], [1], [0, 0, 1, 1], [], []>} : vector<16x32xbf16>, vector<32x8xbf16>, vector<16x8xf32> -> vector<16x8xf32>
    %281 = vector.shape_cast %280 : vector<16x8xf32> to vector<2x8x8xf32>
    %c4_142 = arith.constant 4 : index
    %c0_143 = arith.constant 0 : index
    %c0_144 = arith.constant 0 : index
    %282 = vector.load %arg4[%c4_142, %c0_143, %c0_144] : memref<8x32x8xbf16, #tpu.memory_space<vmem>>, vector<1x32x8xbf16>
    %283 = vector.shape_cast %282 : vector<1x32x8xbf16> to vector<32x8xbf16>
    %cst_145 = arith.constant dense<0.000000e+00> : vector<16x8xf32>
    %284 = tpu.matmul %276, %283, %cst_145 {dimension_numbers = #tpu.dot_dimension_numbers<[1], [0], [0], [1], [0, 0, 1, 1], [], []>} : vector<16x32xbf16>, vector<32x8xbf16>, vector<16x8xf32> -> vector<16x8xf32>
    %285 = vector.shape_cast %284 : vector<16x8xf32> to vector<2x8x8xf32>
    %c4_146 = arith.constant 4 : index
    %c0_147 = arith.constant 0 : index
    %c0_148 = arith.constant 0 : index
    %286 = vector.load %arg5[%c4_146, %c0_147, %c0_148] : memref<8x32x8xbf16, #tpu.memory_space<vmem>>, vector<1x32x8xbf16>
    %287 = vector.shape_cast %286 : vector<1x32x8xbf16> to vector<32x8xbf16>
    %cst_149 = arith.constant dense<0.000000e+00> : vector<16x8xf32>
    %288 = tpu.matmul %276, %287, %cst_149 {dimension_numbers = #tpu.dot_dimension_numbers<[1], [0], [0], [1], [0, 0, 1, 1], [], []>} : vector<16x32xbf16>, vector<32x8xbf16>, vector<16x8xf32> -> vector<16x8xf32>
    %289 = vector.shape_cast %288 : vector<16x8xf32> to vector<2x8x8xf32>
    %290 = arith.truncf %281 : vector<2x8x8xf32> to vector<2x8x8xbf16>
    %291 = arith.truncf %285 : vector<2x8x8xf32> to vector<2x8x8xbf16>
    "tpu.trace_start"() <{level = 10 : i32, message = "bqd,bkd->bqk"}> : () -> ()
    %cst_150 = arith.constant dense<0.000000e+00> : vector<2x8x8xf32>
    %292 = tpu.matmul %290, %291, %cst_150 {dimension_numbers = #tpu.dot_dimension_numbers<[2], [2], [1], [1], [0, 0, 0, 1, 1, 1], [0], [0]>} : vector<2x8x8xbf16>, vector<2x8x8xbf16>, vector<2x8x8xf32> -> vector<2x8x8xf32>
    "tpu.trace_stop"() : () -> ()
    %cst_151 = arith.constant 0.353553385 : f32
    %293 = vector.broadcast %cst_151 : f32 to vector<2x8x8xf32>
    %294 = arith.mulf %292, %293 : vector<2x8x8xf32>
    %295 = vector.broadcast %6 : vector<1x8x8xf32> to vector<2x8x8xf32>
    %296 = arith.addf %294, %295 : vector<2x8x8xf32>
    %cst_152 = arith.constant dense<0xFF800000> : vector<2x8xf32>
    %297 = vector.multi_reduction <maximumf>, %296, %cst_152 [2] : vector<2x8x8xf32> to vector<2x8xf32>
    %298 = vector.shape_cast %297 : vector<2x8xf32> to vector<2x8x1xf32>
    %299 = vector.broadcast %298 : vector<2x8x1xf32> to vector<2x8x8xf32>
    %300 = arith.subf %296, %299 : vector<2x8x8xf32>
    %301 = math.exp %300 : vector<2x8x8xf32>
    %cst_153 = arith.constant dense<0.000000e+00> : vector<2x8xf32>
    %302 = vector.multi_reduction <add>, %301, %cst_153 [2] : vector<2x8x8xf32> to vector<2x8xf32>
    %303 = vector.shape_cast %302 : vector<2x8xf32> to vector<2x8x1xf32>
    %304 = vector.broadcast %303 : vector<2x8x1xf32> to vector<2x8x8xf32>
    %305 = arith.divf %301, %304 : vector<2x8x8xf32>
    %306 = arith.truncf %305 : vector<2x8x8xf32> to vector<2x8x8xbf16>
    %307 = arith.truncf %289 : vector<2x8x8xf32> to vector<2x8x8xbf16>
    "tpu.trace_start"() <{level = 10 : i32, message = "bqk,bkd->bqd"}> : () -> ()
    %cst_154 = arith.constant dense<0.000000e+00> : vector<2x8x8xf32>
    %308 = tpu.matmul %306, %307, %cst_154 {dimension_numbers = #tpu.dot_dimension_numbers<[2], [1], [1], [2], [0, 0, 0, 1, 1, 2], [0], [0]>} : vector<2x8x8xbf16>, vector<2x8x8xbf16>, vector<2x8x8xf32> -> vector<2x8x8xf32>
    "tpu.trace_stop"() : () -> ()
    %309 = vector.shape_cast %308 : vector<2x8x8xf32> to vector<16x8xf32>
    %c4_155 = arith.constant 4 : index
    %c0_156 = arith.constant 0 : index
    %c0_157 = arith.constant 0 : index
    %310 = vector.load %arg6[%c4_155, %c0_156, %c0_157] : memref<8x8x32xbf16, #tpu.memory_space<vmem>>, vector<1x8x32xbf16>
    %311 = vector.shape_cast %310 : vector<1x8x32xbf16> to vector<8x32xbf16>
    %312 = arith.truncf %309 : vector<16x8xf32> to vector<16x8xbf16>
    %cst_158 = arith.constant dense<0.000000e+00> : vector<16x32xf32>
    %313 = tpu.matmul %312, %311, %cst_158 {dimension_numbers = #tpu.dot_dimension_numbers<[1], [0], [0], [1], [0, 0, 1, 1], [], []>} : vector<16x8xbf16>, vector<8x32xbf16>, vector<16x32xf32> -> vector<16x32xf32>
    %314 = arith.addf %277, %313 : vector<16x32xf32>
    %c5 = arith.constant 5 : index
    %c0_159 = arith.constant 0 : index
    %c0_160 = arith.constant 0 : index
    %315 = vector.load %arg3[%c5, %c0_159, %c0_160] : memref<8x32x8xbf16, #tpu.memory_space<vmem>>, vector<1x32x8xbf16>
    %316 = vector.shape_cast %315 : vector<1x32x8xbf16> to vector<32x8xbf16>
    %cst_161 = arith.constant dense<0.000000e+00> : vector<16x8xf32>
    %317 = tpu.matmul %276, %316, %cst_161 {dimension_numbers = #tpu.dot_dimension_numbers<[1], [0], [0], [1], [0, 0, 1, 1], [], []>} : vector<16x32xbf16>, vector<32x8xbf16>, vector<16x8xf32> -> vector<16x8xf32>
    %318 = vector.shape_cast %317 : vector<16x8xf32> to vector<2x8x8xf32>
    %c5_162 = arith.constant 5 : index
    %c0_163 = arith.constant 0 : index
    %c0_164 = arith.constant 0 : index
    %319 = vector.load %arg4[%c5_162, %c0_163, %c0_164] : memref<8x32x8xbf16, #tpu.memory_space<vmem>>, vector<1x32x8xbf16>
    %320 = vector.shape_cast %319 : vector<1x32x8xbf16> to vector<32x8xbf16>
    %cst_165 = arith.constant dense<0.000000e+00> : vector<16x8xf32>
    %321 = tpu.matmul %276, %320, %cst_165 {dimension_numbers = #tpu.dot_dimension_numbers<[1], [0], [0], [1], [0, 0, 1, 1], [], []>} : vector<16x32xbf16>, vector<32x8xbf16>, vector<16x8xf32> -> vector<16x8xf32>
    %322 = vector.shape_cast %321 : vector<16x8xf32> to vector<2x8x8xf32>
    %c5_166 = arith.constant 5 : index
    %c0_167 = arith.constant 0 : index
    %c0_168 = arith.constant 0 : index
    %323 = vector.load %arg5[%c5_166, %c0_167, %c0_168] : memref<8x32x8xbf16, #tpu.memory_space<vmem>>, vector<1x32x8xbf16>
    %324 = vector.shape_cast %323 : vector<1x32x8xbf16> to vector<32x8xbf16>
    %cst_169 = arith.constant dense<0.000000e+00> : vector<16x8xf32>
    %325 = tpu.matmul %276, %324, %cst_169 {dimension_numbers = #tpu.dot_dimension_numbers<[1], [0], [0], [1], [0, 0, 1, 1], [], []>} : vector<16x32xbf16>, vector<32x8xbf16>, vector<16x8xf32> -> vector<16x8xf32>
    %326 = vector.shape_cast %325 : vector<16x8xf32> to vector<2x8x8xf32>
    %327 = arith.truncf %318 : vector<2x8x8xf32> to vector<2x8x8xbf16>
    %328 = arith.truncf %322 : vector<2x8x8xf32> to vector<2x8x8xbf16>
    "tpu.trace_start"() <{level = 10 : i32, message = "bqd,bkd->bqk"}> : () -> ()
    %cst_170 = arith.constant dense<0.000000e+00> : vector<2x8x8xf32>
    %329 = tpu.matmul %327, %328, %cst_170 {dimension_numbers = #tpu.dot_dimension_numbers<[2], [2], [1], [1], [0, 0, 0, 1, 1, 1], [0], [0]>} : vector<2x8x8xbf16>, vector<2x8x8xbf16>, vector<2x8x8xf32> -> vector<2x8x8xf32>
    "tpu.trace_stop"() : () -> ()
    %cst_171 = arith.constant 0.353553385 : f32
    %330 = vector.broadcast %cst_171 : f32 to vector<2x8x8xf32>
    %331 = arith.mulf %329, %330 : vector<2x8x8xf32>
    %332 = vector.broadcast %6 : vector<1x8x8xf32> to vector<2x8x8xf32>
    %333 = arith.addf %331, %332 : vector<2x8x8xf32>
    %cst_172 = arith.constant dense<0xFF800000> : vector<2x8xf32>
    %334 = vector.multi_reduction <maximumf>, %333, %cst_172 [2] : vector<2x8x8xf32> to vector<2x8xf32>
    %335 = vector.shape_cast %334 : vector<2x8xf32> to vector<2x8x1xf32>
    %336 = vector.broadcast %335 : vector<2x8x1xf32> to vector<2x8x8xf32>
    %337 = arith.subf %333, %336 : vector<2x8x8xf32>
    %338 = math.exp %337 : vector<2x8x8xf32>
    %cst_173 = arith.constant dense<0.000000e+00> : vector<2x8xf32>
    %339 = vector.multi_reduction <add>, %338, %cst_173 [2] : vector<2x8x8xf32> to vector<2x8xf32>
    %340 = vector.shape_cast %339 : vector<2x8xf32> to vector<2x8x1xf32>
    %341 = vector.broadcast %340 : vector<2x8x1xf32> to vector<2x8x8xf32>
    %342 = arith.divf %338, %341 : vector<2x8x8xf32>
    %343 = arith.truncf %342 : vector<2x8x8xf32> to vector<2x8x8xbf16>
    %344 = arith.truncf %326 : vector<2x8x8xf32> to vector<2x8x8xbf16>
    "tpu.trace_start"() <{level = 10 : i32, message = "bqk,bkd->bqd"}> : () -> ()
    %cst_174 = arith.constant dense<0.000000e+00> : vector<2x8x8xf32>
    %345 = tpu.matmul %343, %344, %cst_174 {dimension_numbers = #tpu.dot_dimension_numbers<[2], [1], [1], [2], [0, 0, 0, 1, 1, 2], [0], [0]>} : vector<2x8x8xbf16>, vector<2x8x8xbf16>, vector<2x8x8xf32> -> vector<2x8x8xf32>
    "tpu.trace_stop"() : () -> ()
    %346 = vector.shape_cast %345 : vector<2x8x8xf32> to vector<16x8xf32>
    %c5_175 = arith.constant 5 : index
    %c0_176 = arith.constant 0 : index
    %c0_177 = arith.constant 0 : index
    %347 = vector.load %arg6[%c5_175, %c0_176, %c0_177] : memref<8x8x32xbf16, #tpu.memory_space<vmem>>, vector<1x8x32xbf16>
    %348 = vector.shape_cast %347 : vector<1x8x32xbf16> to vector<8x32xbf16>
    %349 = arith.truncf %346 : vector<16x8xf32> to vector<16x8xbf16>
    %cst_178 = arith.constant dense<0.000000e+00> : vector<16x32xf32>
    %350 = tpu.matmul %349, %348, %cst_178 {dimension_numbers = #tpu.dot_dimension_numbers<[1], [0], [0], [1], [0, 0, 1, 1], [], []>} : vector<16x8xbf16>, vector<8x32xbf16>, vector<16x32xf32> -> vector<16x32xf32>
    %351 = arith.addf %314, %350 : vector<16x32xf32>
    %c6 = arith.constant 6 : index
    %c0_179 = arith.constant 0 : index
    %c0_180 = arith.constant 0 : index
    %352 = vector.load %arg3[%c6, %c0_179, %c0_180] : memref<8x32x8xbf16, #tpu.memory_space<vmem>>, vector<1x32x8xbf16>
    %353 = vector.shape_cast %352 : vector<1x32x8xbf16> to vector<32x8xbf16>
    %cst_181 = arith.constant dense<0.000000e+00> : vector<16x8xf32>
    %354 = tpu.matmul %276, %353, %cst_181 {dimension_numbers = #tpu.dot_dimension_numbers<[1], [0], [0], [1], [0, 0, 1, 1], [], []>} : vector<16x32xbf16>, vector<32x8xbf16>, vector<16x8xf32> -> vector<16x8xf32>
    %355 = vector.shape_cast %354 : vector<16x8xf32> to vector<2x8x8xf32>
    %c6_182 = arith.constant 6 : index
    %c0_183 = arith.constant 0 : index
    %c0_184 = arith.constant 0 : index
    %356 = vector.load %arg4[%c6_182, %c0_183, %c0_184] : memref<8x32x8xbf16, #tpu.memory_space<vmem>>, vector<1x32x8xbf16>
    %357 = vector.shape_cast %356 : vector<1x32x8xbf16> to vector<32x8xbf16>
    %cst_185 = arith.constant dense<0.000000e+00> : vector<16x8xf32>
    %358 = tpu.matmul %276, %357, %cst_185 {dimension_numbers = #tpu.dot_dimension_numbers<[1], [0], [0], [1], [0, 0, 1, 1], [], []>} : vector<16x32xbf16>, vector<32x8xbf16>, vector<16x8xf32> -> vector<16x8xf32>
    %359 = vector.shape_cast %358 : vector<16x8xf32> to vector<2x8x8xf32>
    %c6_186 = arith.constant 6 : index
    %c0_187 = arith.constant 0 : index
    %c0_188 = arith.constant 0 : index
    %360 = vector.load %arg5[%c6_186, %c0_187, %c0_188] : memref<8x32x8xbf16, #tpu.memory_space<vmem>>, vector<1x32x8xbf16>
    %361 = vector.shape_cast %360 : vector<1x32x8xbf16> to vector<32x8xbf16>
    %cst_189 = arith.constant dense<0.000000e+00> : vector<16x8xf32>
    %362 = tpu.matmul %276, %361, %cst_189 {dimension_numbers = #tpu.dot_dimension_numbers<[1], [0], [0], [1], [0, 0, 1, 1], [], []>} : vector<16x32xbf16>, vector<32x8xbf16>, vector<16x8xf32> -> vector<16x8xf32>
    %363 = vector.shape_cast %362 : vector<16x8xf32> to vector<2x8x8xf32>
    %364 = arith.truncf %355 : vector<2x8x8xf32> to vector<2x8x8xbf16>
    %365 = arith.truncf %359 : vector<2x8x8xf32> to vector<2x8x8xbf16>
    "tpu.trace_start"() <{level = 10 : i32, message = "bqd,bkd->bqk"}> : () -> ()
    %cst_190 = arith.constant dense<0.000000e+00> : vector<2x8x8xf32>
    %366 = tpu.matmul %364, %365, %cst_190 {dimension_numbers = #tpu.dot_dimension_numbers<[2], [2], [1], [1], [0, 0, 0, 1, 1, 1], [0], [0]>} : vector<2x8x8xbf16>, vector<2x8x8xbf16>, vector<2x8x8xf32> -> vector<2x8x8xf32>
    "tpu.trace_stop"() : () -> ()
    %cst_191 = arith.constant 0.353553385 : f32
    %367 = vector.broadcast %cst_191 : f32 to vector<2x8x8xf32>
    %368 = arith.mulf %366, %367 : vector<2x8x8xf32>
    %369 = vector.broadcast %6 : vector<1x8x8xf32> to vector<2x8x8xf32>
    %370 = arith.addf %368, %369 : vector<2x8x8xf32>
    %cst_192 = arith.constant dense<0xFF800000> : vector<2x8xf32>
    %371 = vector.multi_reduction <maximumf>, %370, %cst_192 [2] : vector<2x8x8xf32> to vector<2x8xf32>
    %372 = vector.shape_cast %371 : vector<2x8xf32> to vector<2x8x1xf32>
    %373 = vector.broadcast %372 : vector<2x8x1xf32> to vector<2x8x8xf32>
    %374 = arith.subf %370, %373 : vector<2x8x8xf32>
    %375 = math.exp %374 : vector<2x8x8xf32>
    %cst_193 = arith.constant dense<0.000000e+00> : vector<2x8xf32>
    %376 = vector.multi_reduction <add>, %375, %cst_193 [2] : vector<2x8x8xf32> to vector<2x8xf32>
    %377 = vector.shape_cast %376 : vector<2x8xf32> to vector<2x8x1xf32>
    %378 = vector.broadcast %377 : vector<2x8x1xf32> to vector<2x8x8xf32>
    %379 = arith.divf %375, %378 : vector<2x8x8xf32>
    %380 = arith.truncf %379 : vector<2x8x8xf32> to vector<2x8x8xbf16>
    %381 = arith.truncf %363 : vector<2x8x8xf32> to vector<2x8x8xbf16>
    "tpu.trace_start"() <{level = 10 : i32, message = "bqk,bkd->bqd"}> : () -> ()
    %cst_194 = arith.constant dense<0.000000e+00> : vector<2x8x8xf32>
    %382 = tpu.matmul %380, %381, %cst_194 {dimension_numbers = #tpu.dot_dimension_numbers<[2], [1], [1], [2], [0, 0, 0, 1, 1, 2], [0], [0]>} : vector<2x8x8xbf16>, vector<2x8x8xbf16>, vector<2x8x8xf32> -> vector<2x8x8xf32>
    "tpu.trace_stop"() : () -> ()
    %383 = vector.shape_cast %382 : vector<2x8x8xf32> to vector<16x8xf32>
    %c6_195 = arith.constant 6 : index
    %c0_196 = arith.constant 0 : index
    %c0_197 = arith.constant 0 : index
    %384 = vector.load %arg6[%c6_195, %c0_196, %c0_197] : memref<8x8x32xbf16, #tpu.memory_space<vmem>>, vector<1x8x32xbf16>
    %385 = vector.shape_cast %384 : vector<1x8x32xbf16> to vector<8x32xbf16>
    %386 = arith.truncf %383 : vector<16x8xf32> to vector<16x8xbf16>
    %cst_198 = arith.constant dense<0.000000e+00> : vector<16x32xf32>
    %387 = tpu.matmul %386, %385, %cst_198 {dimension_numbers = #tpu.dot_dimension_numbers<[1], [0], [0], [1], [0, 0, 1, 1], [], []>} : vector<16x8xbf16>, vector<8x32xbf16>, vector<16x32xf32> -> vector<16x32xf32>
    %388 = arith.addf %351, %387 : vector<16x32xf32>
    %c7 = arith.constant 7 : index
    %c0_199 = arith.constant 0 : index
    %c0_200 = arith.constant 0 : index
    %389 = vector.load %arg3[%c7, %c0_199, %c0_200] : memref<8x32x8xbf16, #tpu.memory_space<vmem>>, vector<1x32x8xbf16>
    %390 = vector.shape_cast %389 : vector<1x32x8xbf16> to vector<32x8xbf16>
    %cst_201 = arith.constant dense<0.000000e+00> : vector<16x8xf32>
    %391 = tpu.matmul %276, %390, %cst_201 {dimension_numbers = #tpu.dot_dimension_numbers<[1], [0], [0], [1], [0, 0, 1, 1], [], []>} : vector<16x32xbf16>, vector<32x8xbf16>, vector<16x8xf32> -> vector<16x8xf32>
    %392 = vector.shape_cast %391 : vector<16x8xf32> to vector<2x8x8xf32>
    %c7_202 = arith.constant 7 : index
    %c0_203 = arith.constant 0 : index
    %c0_204 = arith.constant 0 : index
    %393 = vector.load %arg4[%c7_202, %c0_203, %c0_204] : memref<8x32x8xbf16, #tpu.memory_space<vmem>>, vector<1x32x8xbf16>
    %394 = vector.shape_cast %393 : vector<1x32x8xbf16> to vector<32x8xbf16>
    %cst_205 = arith.constant dense<0.000000e+00> : vector<16x8xf32>
    %395 = tpu.matmul %276, %394, %cst_205 {dimension_numbers = #tpu.dot_dimension_numbers<[1], [0], [0], [1], [0, 0, 1, 1], [], []>} : vector<16x32xbf16>, vector<32x8xbf16>, vector<16x8xf32> -> vector<16x8xf32>
    %396 = vector.shape_cast %395 : vector<16x8xf32> to vector<2x8x8xf32>
    %c7_206 = arith.constant 7 : index
    %c0_207 = arith.constant 0 : index
    %c0_208 = arith.constant 0 : index
    %397 = vector.load %arg5[%c7_206, %c0_207, %c0_208] : memref<8x32x8xbf16, #tpu.memory_space<vmem>>, vector<1x32x8xbf16>
    %398 = vector.shape_cast %397 : vector<1x32x8xbf16> to vector<32x8xbf16>
    %cst_209 = arith.constant dense<0.000000e+00> : vector<16x8xf32>
    %399 = tpu.matmul %276, %398, %cst_209 {dimension_numbers = #tpu.dot_dimension_numbers<[1], [0], [0], [1], [0, 0, 1, 1], [], []>} : vector<16x32xbf16>, vector<32x8xbf16>, vector<16x8xf32> -> vector<16x8xf32>
    %400 = vector.shape_cast %399 : vector<16x8xf32> to vector<2x8x8xf32>
    %401 = arith.truncf %392 : vector<2x8x8xf32> to vector<2x8x8xbf16>
    %402 = arith.truncf %396 : vector<2x8x8xf32> to vector<2x8x8xbf16>
    "tpu.trace_start"() <{level = 10 : i32, message = "bqd,bkd->bqk"}> : () -> ()
    %cst_210 = arith.constant dense<0.000000e+00> : vector<2x8x8xf32>
    %403 = tpu.matmul %401, %402, %cst_210 {dimension_numbers = #tpu.dot_dimension_numbers<[2], [2], [1], [1], [0, 0, 0, 1, 1, 1], [0], [0]>} : vector<2x8x8xbf16>, vector<2x8x8xbf16>, vector<2x8x8xf32> -> vector<2x8x8xf32>
    "tpu.trace_stop"() : () -> ()
    %cst_211 = arith.constant 0.353553385 : f32
    %404 = vector.broadcast %cst_211 : f32 to vector<2x8x8xf32>
    %405 = arith.mulf %403, %404 : vector<2x8x8xf32>
    %406 = vector.broadcast %6 : vector<1x8x8xf32> to vector<2x8x8xf32>
    %407 = arith.addf %405, %406 : vector<2x8x8xf32>
    %cst_212 = arith.constant dense<0xFF800000> : vector<2x8xf32>
    %408 = vector.multi_reduction <maximumf>, %407, %cst_212 [2] : vector<2x8x8xf32> to vector<2x8xf32>
    %409 = vector.shape_cast %408 : vector<2x8xf32> to vector<2x8x1xf32>
    %410 = vector.broadcast %409 : vector<2x8x1xf32> to vector<2x8x8xf32>
    %411 = arith.subf %407, %410 : vector<2x8x8xf32>
    %412 = math.exp %411 : vector<2x8x8xf32>
    %cst_213 = arith.constant dense<0.000000e+00> : vector<2x8xf32>
    %413 = vector.multi_reduction <add>, %412, %cst_213 [2] : vector<2x8x8xf32> to vector<2x8xf32>
    %414 = vector.shape_cast %413 : vector<2x8xf32> to vector<2x8x1xf32>
    %415 = vector.broadcast %414 : vector<2x8x1xf32> to vector<2x8x8xf32>
    %416 = arith.divf %412, %415 : vector<2x8x8xf32>
    %417 = arith.truncf %416 : vector<2x8x8xf32> to vector<2x8x8xbf16>
    %418 = arith.truncf %400 : vector<2x8x8xf32> to vector<2x8x8xbf16>
    "tpu.trace_start"() <{level = 10 : i32, message = "bqk,bkd->bqd"}> : () -> ()
    %cst_214 = arith.constant dense<0.000000e+00> : vector<2x8x8xf32>
    %419 = tpu.matmul %417, %418, %cst_214 {dimension_numbers = #tpu.dot_dimension_numbers<[2], [1], [1], [2], [0, 0, 0, 1, 1, 2], [0], [0]>} : vector<2x8x8xbf16>, vector<2x8x8xbf16>, vector<2x8x8xf32> -> vector<2x8x8xf32>
    "tpu.trace_stop"() : () -> ()
    %420 = vector.shape_cast %419 : vector<2x8x8xf32> to vector<16x8xf32>
    %c7_215 = arith.constant 7 : index
    %c0_216 = arith.constant 0 : index
    %c0_217 = arith.constant 0 : index
    %421 = vector.load %arg6[%c7_215, %c0_216, %c0_217] : memref<8x8x32xbf16, #tpu.memory_space<vmem>>, vector<1x8x32xbf16>
    %422 = vector.shape_cast %421 : vector<1x8x32xbf16> to vector<8x32xbf16>
    %423 = arith.truncf %420 : vector<16x8xf32> to vector<16x8xbf16>
    %cst_218 = arith.constant dense<0.000000e+00> : vector<16x32xf32>
    %424 = tpu.matmul %423, %422, %cst_218 {dimension_numbers = #tpu.dot_dimension_numbers<[1], [0], [0], [1], [0, 0, 1, 1], [], []>} : vector<16x8xbf16>, vector<8x32xbf16>, vector<16x32xf32> -> vector<16x32xf32>
    %425 = arith.addf %388, %424 : vector<16x32xf32>
    %426 = arith.addf %247, %425 : vector<16x32xf32>
    %c1_219 = arith.constant 1 : index
    %c0_220 = arith.constant 0 : index
    %c0_221 = arith.constant 0 : index
    %427 = vector.load %arg7[%c1_219, %c0_220, %c0_221] : memref<2x1x32xf32, #tpu.memory_space<vmem>>, vector<1x1x32xf32>
    %428 = vector.shape_cast %427 : vector<1x1x32xf32> to vector<1x32xf32>
    %429 = vector.broadcast %428 : vector<1x32xf32> to vector<16x32xf32>
    %430 = arith.addf %426, %429 : vector<16x32xf32>
    %c1_222 = arith.constant 1 : index
    %c0_223 = arith.constant 0 : index
    %c0_224 = arith.constant 0 : index
    %431 = vector.load %arg8[%c1_222, %c0_223, %c0_224] : memref<2x1x32xf32, #tpu.memory_space<vmem>>, vector<1x1x32xf32>
    %432 = vector.shape_cast %431 : vector<1x1x32xf32> to vector<1x32xf32>
    %c1_225 = arith.constant 1 : index
    %c0_226 = arith.constant 0 : index
    %c0_227 = arith.constant 0 : index
    %433 = vector.load %arg9[%c1_225, %c0_226, %c0_227] : memref<2x1x32xf32, #tpu.memory_space<vmem>>, vector<1x1x32xf32>
    %434 = vector.shape_cast %433 : vector<1x1x32xf32> to vector<1x32xf32>
    %cst_228 = arith.constant dense<0.000000e+00> : vector<16xf32>
    %435 = vector.multi_reduction <add>, %430, %cst_228 [1] : vector<16x32xf32> to vector<16xf32>
    %436 = vector.shape_cast %435 : vector<16xf32> to vector<16x1xf32>
    %cst_229 = arith.constant 3.200000e+01 : f32
    %437 = vector.broadcast %cst_229 : f32 to vector<16x1xf32>
    %438 = arith.divf %436, %437 : vector<16x1xf32>
    %439 = vector.broadcast %438 : vector<16x1xf32> to vector<16x32xf32>
    %440 = arith.subf %430, %439 : vector<16x32xf32>
    %441 = vector.broadcast %438 : vector<16x1xf32> to vector<16x32xf32>
    %442 = arith.subf %430, %441 : vector<16x32xf32>
    %443 = arith.mulf %440, %442 : vector<16x32xf32>
    %cst_230 = arith.constant dense<0.000000e+00> : vector<16xf32>
    %444 = vector.multi_reduction <add>, %443, %cst_230 [1] : vector<16x32xf32> to vector<16xf32>
    %445 = vector.shape_cast %444 : vector<16xf32> to vector<16x1xf32>
    %cst_231 = arith.constant 3.200000e+01 : f32
    %446 = vector.broadcast %cst_231 : f32 to vector<16x1xf32>
    %447 = arith.divf %445, %446 : vector<16x1xf32>
    %448 = vector.broadcast %438 : vector<16x1xf32> to vector<16x32xf32>
    %449 = arith.subf %430, %448 : vector<16x32xf32>
    %cst_232 = arith.constant 9.99999974E-6 : f32
    %450 = vector.broadcast %cst_232 : f32 to vector<16x1xf32>
    %451 = arith.addf %447, %450 : vector<16x1xf32>
    %452 = math.rsqrt %451 : vector<16x1xf32>
    %453 = vector.broadcast %452 : vector<16x1xf32> to vector<16x32xf32>
    %454 = arith.mulf %449, %453 : vector<16x32xf32>
    %455 = vector.broadcast %432 : vector<1x32xf32> to vector<16x32xf32>
    %456 = arith.mulf %454, %455 : vector<16x32xf32>
    %457 = vector.broadcast %434 : vector<1x32xf32> to vector<16x32xf32>
    %458 = arith.addf %456, %457 : vector<16x32xf32>
    %c1_233 = arith.constant 1 : index
    %c0_234 = arith.constant 0 : index
    %c0_235 = arith.constant 0 : index
    %459 = vector.load %arg10[%c1_233, %c0_234, %c0_235] : memref<2x32x128xbf16, #tpu.memory_space<vmem>>, vector<1x32x128xbf16>
    %460 = vector.shape_cast %459 : vector<1x32x128xbf16> to vector<32x128xbf16>
    %461 = arith.truncf %458 : vector<16x32xf32> to vector<16x32xbf16>
    %cst_236 = arith.constant dense<0.000000e+00> : vector<16x128xf32>
    %462 = tpu.matmul %461, %460, %cst_236 {dimension_numbers = #tpu.dot_dimension_numbers<[1], [0], [0], [1], [0, 0, 1, 1], [], []>} : vector<16x32xbf16>, vector<32x128xbf16>, vector<16x128xf32> -> vector<16x128xf32>
    %c1_237 = arith.constant 1 : index
    %c0_238 = arith.constant 0 : index
    %c0_239 = arith.constant 0 : index
    %463 = vector.load %arg11[%c1_237, %c0_238, %c0_239] : memref<2x1x128xf32, #tpu.memory_space<vmem>>, vector<1x1x128xf32>
    %464 = vector.shape_cast %463 : vector<1x1x128xf32> to vector<1x128xf32>
    %465 = vector.broadcast %464 : vector<1x128xf32> to vector<16x128xf32>
    %466 = arith.addf %462, %465 : vector<16x128xf32>
    %cst_240 = arith.constant 5.000000e-01 : f32
    %467 = vector.broadcast %cst_240 : f32 to vector<16x128xf32>
    %468 = arith.mulf %467, %466 : vector<16x128xf32>
    %cst_241 = arith.constant 4.471500e-02 : f32
    %469 = vector.broadcast %cst_241 : f32 to vector<16x128xf32>
    %470 = arith.mulf %469, %466 : vector<16x128xf32>
    %471 = arith.mulf %470, %466 : vector<16x128xf32>
    %472 = arith.mulf %471, %466 : vector<16x128xf32>
    %473 = arith.addf %466, %472 : vector<16x128xf32>
    %cst_242 = arith.constant 0.797884583 : f32
    %474 = vector.broadcast %cst_242 : f32 to vector<16x128xf32>
    %475 = arith.mulf %474, %473 : vector<16x128xf32>
    %476 = math.tanh %475 : vector<16x128xf32>
    %cst_243 = arith.constant 1.000000e+00 : f32
    %477 = vector.broadcast %cst_243 : f32 to vector<16x128xf32>
    %478 = arith.addf %477, %476 : vector<16x128xf32>
    %479 = arith.mulf %468, %478 : vector<16x128xf32>
    %c1_244 = arith.constant 1 : index
    %c0_245 = arith.constant 0 : index
    %c0_246 = arith.constant 0 : index
    %480 = vector.load %arg12[%c1_244, %c0_245, %c0_246] : memref<2x128x32xbf16, #tpu.memory_space<vmem>>, vector<1x128x32xbf16>
    %481 = vector.shape_cast %480 : vector<1x128x32xbf16> to vector<128x32xbf16>
    %482 = arith.truncf %479 : vector<16x128xf32> to vector<16x128xbf16>
    %cst_247 = arith.constant dense<0.000000e+00> : vector<16x32xf32>
    %483 = tpu.matmul %482, %481, %cst_247 {dimension_numbers = #tpu.dot_dimension_numbers<[1], [0], [0], [1], [0, 0, 1, 1], [], []>} : vector<16x128xbf16>, vector<128x32xbf16>, vector<16x32xf32> -> vector<16x32xf32>
    %484 = arith.addf %430, %483 : vector<16x32xf32>
    %c1_248 = arith.constant 1 : index
    %c0_249 = arith.constant 0 : index
    %c0_250 = arith.constant 0 : index
    %485 = vector.load %arg13[%c1_248, %c0_249, %c0_250] : memref<2x1x32xf32, #tpu.memory_space<vmem>>, vector<1x1x32xf32>
    %486 = vector.shape_cast %485 : vector<1x1x32xf32> to vector<1x32xf32>
    %487 = vector.broadcast %486 : vector<1x32xf32> to vector<16x32xf32>
    %488 = arith.addf %484, %487 : vector<16x32xf32>
    %489 = vector.shape_cast %488 : vector<16x32xf32> to vector<2x8x32xf32>
    %490 = vector.extract_strided_slice %489 {offsets = [0, 7, 0], sizes = [2, 1, 32], strides = [1, 1, 1]} : vector<2x8x32xf32> to vector<2x1x32xf32>
    %491 = vector.shape_cast %490 : vector<2x1x32xf32> to vector<2x32xf32>
    %c0_251 = arith.constant 0 : index
    %c0_252 = arith.constant 0 : index
    %492 = vector.load %arg14[%c0_251, %c0_252] : memref<1x32xf32, #tpu.memory_space<vmem>>, vector<1x32xf32>
    %c0_253 = arith.constant 0 : index
    %c0_254 = arith.constant 0 : index
    %493 = vector.load %arg15[%c0_253, %c0_254] : memref<1x32xf32, #tpu.memory_space<vmem>>, vector<1x32xf32>
    %cst_255 = arith.constant dense<0.000000e+00> : vector<2xf32>
    %494 = vector.multi_reduction <add>, %491, %cst_255 [1] : vector<2x32xf32> to vector<2xf32>
    %495 = vector.shape_cast %494 : vector<2xf32> to vector<2x1xf32>
    %cst_256 = arith.constant 3.200000e+01 : f32
    %496 = vector.broadcast %cst_256 : f32 to vector<2x1xf32>
    %497 = arith.divf %495, %496 : vector<2x1xf32>
    %498 = vector.broadcast %497 : vector<2x1xf32> to vector<2x32xf32>
    %499 = arith.subf %491, %498 : vector<2x32xf32>
    %500 = vector.broadcast %497 : vector<2x1xf32> to vector<2x32xf32>
    %501 = arith.subf %491, %500 : vector<2x32xf32>
    %502 = arith.mulf %499, %501 : vector<2x32xf32>
    %cst_257 = arith.constant dense<0.000000e+00> : vector<2xf32>
    %503 = vector.multi_reduction <add>, %502, %cst_257 [1] : vector<2x32xf32> to vector<2xf32>
    %504 = vector.shape_cast %503 : vector<2xf32> to vector<2x1xf32>
    %cst_258 = arith.constant 3.200000e+01 : f32
    %505 = vector.broadcast %cst_258 : f32 to vector<2x1xf32>
    %506 = arith.divf %504, %505 : vector<2x1xf32>
    %507 = vector.broadcast %497 : vector<2x1xf32> to vector<2x32xf32>
    %508 = arith.subf %491, %507 : vector<2x32xf32>
    %cst_259 = arith.constant 9.99999974E-6 : f32
    %509 = vector.broadcast %cst_259 : f32 to vector<2x1xf32>
    %510 = arith.addf %506, %509 : vector<2x1xf32>
    %511 = math.rsqrt %510 : vector<2x1xf32>
    %512 = vector.broadcast %511 : vector<2x1xf32> to vector<2x32xf32>
    %513 = arith.mulf %508, %512 : vector<2x32xf32>
    %514 = vector.broadcast %492 : vector<1x32xf32> to vector<2x32xf32>
    %515 = arith.mulf %513, %514 : vector<2x32xf32>
    %516 = vector.broadcast %493 : vector<1x32xf32> to vector<2x32xf32>
    %517 = arith.addf %515, %516 : vector<2x32xf32>
    %c0_260 = arith.constant 0 : index
    %c0_261 = arith.constant 0 : index
    %518 = vector.load %arg16[%c0_260, %c0_261] : memref<32x256xbf16, #tpu.memory_space<vmem>>, vector<32x256xbf16>
    %519 = arith.truncf %517 : vector<2x32xf32> to vector<2x32xbf16>
    %cst_262 = arith.constant dense<0.000000e+00> : vector<2x256xf32>
    %520 = tpu.matmul %519, %518, %cst_262 {dimension_numbers = #tpu.dot_dimension_numbers<[1], [0], [0], [1], [0, 0, 1, 1], [], []>} : vector<2x32xbf16>, vector<32x256xbf16>, vector<2x256xf32> -> vector<2x256xf32>
    %c0_263 = arith.constant 0 : index
    %c0_264 = arith.constant 0 : index
    %521 = vector.load %arg17[%c0_263, %c0_264] : memref<2x256xf32, #tpu.memory_space<vmem>>, vector<2x256xf32>
    tpu.vector_store %arg17[%c0_263, %c0_264], %520 {strides = array<i32>} : memref<2x256xf32, #tpu.memory_space<vmem>>, vector<2x256xf32>,
    return
  }
}

</mosaic_0001>

<bundles_post_ra>
// kernel: gpt_forward.1
= control target key start
LH: loop header
LB: loop body
LE: loop exit
PB: predicated region body
PF: predicated region fallthrough
CT: control target
= control target key end

     0   :  { %vm67_vm0 = vcmask 261120   ;;  %v5500_v15 = vmov 0.0   ;;  %vm5501_vm1 = vmmov 0   ;;  %vm290_vm2 = vcmask 64512   ;;  %s6418_s0 = inlined_call_operand.vmem [shape: f32[16,32], index: 0, kind: input, shape index: {}]   ;;  %s6419_s3 = inlined_call_operand.vmem [shape: bf16[8,32,8], index: 3, kind: input, shape index: {}]   ;;  %s6420_s5 = inlined_call_operand.vmem [shape: bf16[8,32,8], index: 5, kind: input, shape index: {}]   ;;  %s6421_s4 = inlined_call_operand.vmem [shape: bf16[8,32,8], index: 4, kind: input, shape index: {}]   ;;  %s6422_s1 = inlined_call_operand.vmem [shape: f32[2,1,32], index: 1, kind: input, shape index: {}]   ;;  %s6423_s2 = inlined_call_operand.vmem [shape: f32[2,1,32], index: 2, kind: input, shape index: {}]   ;;  %s6424_s6 = inlined_call_operand.vmem [shape: bf16[8,8,32], index: 6, kind: input, shape index: {}]   ;;  %s6425_s7 = inlined_call_operand.vmem [shape: f32[2,1,32], index: 7, kind: input, shape index: {}]   ;;  %s6426_s10 = inlined_call_operand.vmem [shape: bf16[2,32,128], index: 10, kind: input, shape index: {}]   ;;  %s6427_s8 = inlined_call_operand.vmem [shape: f32[2,1,32], index: 8, kind: input, shape index: {}]   ;;  %s6428_s9 = inlined_call_operand.vmem [shape: f32[2,1,32], index: 9, kind: input, shape index: {}]   ;;  %s6429_s12 = inlined_call_operand.vmem [shape: bf16[2,128,32], index: 12, kind: input, shape index: {}]   ;;  %s6430_s11 = inlined_call_operand.vmem [shape: f32[2,1,128], index: 11, kind: input, shape index: {}]   ;;  %s6431_s13 = inlined_call_operand.vmem [shape: f32[2,1,32], index: 13, kind: input, shape index: {}]   ;;  %s6432_s16 = inlined_call_operand.vmem [shape: bf16[32,256], index: 16, kind: input, shape index: {}]   ;;  %s6433_s14 = inlined_call_operand.vmem [shape: f32[1,32], index: 14, kind: input, shape index: {}]   ;;  %s6434_s15 = inlined_call_operand.vmem [shape: f32[1,32], index: 15, kind: input, shape index: {}]   ;;  %s6435_s17 = inlined_call_operand.vmem [shape: f32[2,256], index: 17, kind: output, shape index: {}]  }
   0x1   :  { %6438 = sst [smem:[#allocation2_spill]] %s6418_s0  ;;  %4841 = vmatprep.subr.bf16.mxu1 %v5500_v15  ;;  %4857 = vmatprep.subr.bf16.mxu0 %v5500_v15  ;;  %v5333_v16 = vld [vmem:[%s6420_s5] sm:$0xff]   ;;  %v5335_v18 = vld [vmem:[%s6420_s5 + $0x8] sm:$0xff]   ;;  %vm416_vm3 = vcmask 1043456   ;;  %v59_v60 = vlaneseq  ;;  %vm4237_vm5 = vcmask 261127   ;;  %vm4241_vm6 = vcmask 253952  }
   0x2   :  { %6439 = sst [smem:[#allocation3_spill]] %s6419_s3  ;;  %s6440_s26 = sld [smem:[#allocation2_spill]]  ;;  %4858 = vmatpush3.bf16.msra.mxu0 %v5333_v16  ;;  %4845 = vmatprep.mubr.msk.bf16.mxu1 %vm5501_vm1, %v5500_v15  ;;  %v4391_v27 = vld [vmem:[%s6422_s1] ss:$0 sm:$0xff]  ;;  %v5337_v37 = vld [vmem:[%s6421_s4 + $0x8] sm:$0xff]   ;;  %vm4308_vm7 = vcmask 1041409  }
   0x3   :  { %s6441_s30 = sld [smem:[#allocation3_spill]]  ;;  %4859 = vmatprep.subr.bf16.mxu0 %v5500_v15  ;;  %4861 = vmatprep.mubr.msk.bf16.mxu0 %vm5501_vm1, %v5500_v15  ;;  %v4392_v31 = vld [vmem:[%s6423_s2] ss:$0 sm:$0xff]  ;;  %v60_v61 = vshrl.u32 %v59_v60, 7  ;;  %v62_v62 = vand.u32 127, %v59_v60 }
   0x4   :  { %v5336_v35 = vld [vmem:[%s6421_s4] sm:$0xff]  }
   0x5   :  { %vm63_vm4 = vcmp.gt.s32.totalorder %v62_v62, %v60_v61 }
   0x6   :  { %4860 = vmatpush3.bf16.msra.mxu0 %v5335_v18 }
   0x7   :  { %4871 = vmatprep.subr.bf16.mxu0 %v5500_v15 }
   0x8   :  { %v57_v0 = vld [vmem:[%s6440_s26] sm:$0xff]  ;;  %v58_v1 = vld [vmem:[%s6440_s26 + $0x8] sm:$0xff] }
   0x9   :  { %v68_v2 = vsel %vm67_vm0, %v57_v0, 0.0  ;;  %v71_v3 = vsel %vm67_vm0, %v58_v1, 0.0  ;;  %v5332_v14 = vld [vmem:[%s6441_s30] sm:$0xff]   ;;  %v5334_v17 = vld [vmem:[%s6441_s30 + $0x8] sm:$0xff]  }
   0xa   :  { %69 = vadd.xlane.f32.xlu0 %v68_v2  ;;  %4842 = vmatpush3.bf16.msra.mxu1 %v5332_v14 }
   0xb   :  { %4843 = vmatprep.subr.bf16.mxu1 %v5500_v15 }
   0xe   :  { %72 = vadd.xlane.f32.xlu0 %v71_v3  ;;  %4844 = vmatpush3.bf16.msra.mxu1 %v5334_v17 }
   0xf   :  { %4849 = vmatprep.subr.bf16.mxu1 %v5500_v15 }
  0x97   :  { %v70_v4 = vpop.xlane.xlu0 %69 }
  0x98   :  { %v75_v5 = vmul.f32 0.03125, %v70_v4 }
  0x9a   :  { %v77_v6 = vsub.f32 %v57_v0, %v75_v5  ;;  %v5668_v0 = vsel %vm63_vm4, -1e+30, %v5500_v15 }
  0x9b   :  { %v73_v7 = vpop.xlane.xlu0 %72 }
  0x9c   :  { %v76_v8 = vmul.f32 0.03125, %v73_v7  ;;  %v79_v9 = vmul.f32 %v77_v6, %v77_v6 }
  0x9e   :  { %v78_v10 = vsub.f32 %v58_v1, %v76_v8  ;;  %v81_v11 = vsel %vm67_vm0, %v79_v9, 0.0 }
  0x9f   :  { %82 = vadd.xlane.f32.xlu1 %v81_v11 }
  0xa0   :  { %v80_v12 = vmul.f32 %v78_v10, %v78_v10 }
  0xa2   :  { %v84_v13 = vsel %vm67_vm0, %v80_v12, 0.0 }
  0xa3   :  { %85 = vadd.xlane.f32.xlu1 %v84_v13 }
 0x12c   :  { %v83_v19 = vpop.xlane.xlu1 %82 }
 0x12d   :  { %v87_v20 = vmul.f32 0.03125, %v83_v19 }
 0x12f   :  { %v89_v21 = vadd.f32 1e-05, %v87_v20 }
 0x130   :  { %v86_v22 = vpop.xlane.xlu1 %85 }
 0x131   :  { %5406 = vrsqrt.f32 %v89_v21  ;;  %v88_v23 = vmul.f32 0.03125, %v86_v22 }
 0x133   :  { %v90_v24 = vadd.f32 1e-05, %v88_v23 }
 0x135   :  { %5408 = vrsqrt.f32 %v90_v24 }
 0x13b   :  { %v5407_v25 = vpop.eup %5406 }
 0x13c   :  { %v93_v26 = vmul.f32 %v5407_v25, %v77_v6 }
 0x13e   :  { %v101_v29 = vmul.f32 %v4391_v27, %v93_v26 }
 0x13f   :  { %v5409_v28 = vpop.eup %5408 }
 0x140   :  { %v94_v30 = vmul.f32 %v5409_v28, %v78_v10  ;;  %v109_v33 = vadd.f32 %v4392_v31, %v101_v29 }
 0x142   :  { %v102_v32 = vmul.f32 %v4391_v27, %v94_v30  ;;  %v5338_v30 = vld [vmem:[%s6441_s30 + $0x10] sm:$0xff]  }
 0x144   :  { %v110_v34 = vadd.f32 %v4392_v31, %v102_v32 }
 0x146   :  { %v5634_v36 = vpack.c.bf16 %v110_v34, %v109_v33  ;;  %v5339_v33 = vld [vmem:[%s6421_s4 + $0x10] sm:$0xff]  }
 0x148   :  { %4846 = vmatmul.mubr.msk.bf16.vlgmr.msra.gmra.mrb[0].mxu1 %vm67_vm0, %v5634_v36  ;;  %4862 = vmatmul.mubr.msk.bf16.vlgmr.msra.gmra.mrb[0].mxu0 %vm67_vm0, %v5634_v36 }
 0x149   :  { %4850 = vmatpush3.bf16.msra.mxu1 %v5336_v35  ;;  %4853 = vmatprep.mubr.msk.bf16.mxu1 %vm5501_vm1, %v5500_v15  ;;  %v5340_v35 = vld [vmem:[%s6441_s30 + $0x18] sm:$0xff]  }
 0x14a   :  { %4851 = vmatprep.subr.bf16.mxu1 %v5500_v15  ;;  %4873 = vmatprep.mubr.msk.bf16.mxu0 %vm5501_vm1, %v5500_v15 }
 0x14d   :  { %4852 = vmatpush3.bf16.msra.mxu1 %v5337_v37  ;;  %v5341_v37 = vld [vmem:[%s6421_s4 + $0x18] sm:$0xff]  }
 0x14e   :  { %4865 = vmatprep.subr.bf16.mxu1 %v5500_v15 }
 0x150   :  { %4854 = vmatmul.mubr.msk.bf16.vlgmr.msra.gmra.mrb[4].mxu1 %vm67_vm0, %v5634_v36 }
 0x151   :  { %4867 = vmatprep.mubr.msk.bf16.mxu1 %vm5501_vm1, %v5500_v15 }
 0x21b   :  { %v165_v38 = vpop.f32.mrb[0].mxu1  ;;  %v279_v39 = vpop.f32.mrb[0].mxu0 }
 0x21c   :  { %v4847_v40 = vpop.f32.mrb[1].mxu1  ;;  %v4863_v41 = vpop.f32.mrb[1].mxu0  ;;  %v411_v54 = vpack.c.bf16 %v279_v39, %v279_v39  ;;  %v286_v55 = vpack.c.bf16 %v165_v38, %v165_v38  ;;  %v5342_v38 = vld [vmem:[%s6420_s5 + $0x10] sm:$0xff]   ;;  %v5343_v39 = vld [vmem:[%s6420_s5 + $0x18] sm:$0xff]  }
 0x21d   :  { %v168_v42 = vpop.f32.mrb[2].mxu1  ;;  %v282_v43 = vpop.f32.mrb[2].mxu0 }
 0x21e   :  { %v4848_v44 = vpop.f32.mrb[3].mxu1  ;;  %v4864_v45 = vpop.f32.mrb[3].mxu0  ;;  %v412_v56 = vpack.c.bf16 %v282_v43, %v282_v43  ;;  %v418_v57 = vsel %vm416_vm3, %v411_v54, 0  ;;  %v287_v58 = vpack.c.bf16 %v168_v42, %v168_v42 }
 0x220   :  { %v464_v59 = vsel %vm416_vm3, %v412_v56, 0 }
 0x223   :  { %v222_v46 = vpop.f32.mrb[4].mxu1 }
 0x224   :  { %v288_v47 = vpack.c.bf16 %v222_v46, %v222_v46  ;;  %v4855_v48 = vpop.f32.mrb[5].mxu1 }
 0x225   :  { %v225_v49 = vpop.f32.mrb[6].mxu1 }
 0x226   :  { %v295_v50 = vsel %vm290_vm2, %v288_v47, 0  ;;  %v289_v51 = vpack.c.bf16 %v225_v49, %v225_v49  ;;  %v4856_v52 = vpop.f32.mrb[7].mxu1 }
 0x227   :  { %4866 = vmatpush3.bf16.xpose.msra.mxu1 %v295_v50 }
 0x228   :  { %v341_v53 = vsel %vm290_vm2, %v289_v51, 0  ;;  %4877 = vmatprep.subr.bf16.mxu1 %v5500_v15 }
 0x229   :  { %4872 = vmatpush3.bf16.xpose.msra.mxu0 %v341_v53 }
 0x22a   :  { %4883 = vmatprep.subr.bf16.mxu0 %v5500_v15 }
 0x22e   :  { %4868 = vmatmul.mubr.msk.bf16.vlgmr.msra.gmra.mrb[8].mxu1 %vm290_vm2, %v286_v55 }
 0x22f   :  { %4878 = vmatpush3.bf16.msra.mxu1 %v418_v57  ;;  %4879 = vmatprep.mubr.msk.bf16.mxu1 %vm5501_vm1, %v5500_v15 }
 0x230   :  { %4874 = vmatmul.mubr.msk.bf16.vlgmr.msra.gmra.mrb[4].mxu0 %vm290_vm2, %v287_v58  ;;  %4889 = vmatprep.subr.bf16.mxu1 %v5500_v15 }
 0x231   :  { %4884 = vmatpush3.bf16.msra.mxu0 %v464_v59  ;;  %4885 = vmatprep.mubr.msk.bf16.mxu0 %vm5501_vm1, %v5500_v15 }
 0x232   :  { %4897 = vmatprep.subr.bf16.mxu0 %v5500_v15 }
 0x301   :  { %v331_v63 = vpop.f32.mrb[8].mxu1 }
 0x302   :  { %v383_v1 = vmul.f32 0.35355338, %v331_v63  ;;  %v4869_v2 = vpop.f32.mrb[9].mxu1 }
 0x303   :  { %v334_v3 = vpop.f32.mrb[10].mxu1  ;;  %v377_v4 = vpop.f32.mrb[4].mxu0 }
 0x304   :  { %v384_v5 = vmul.f32 0.35355338, %v377_v4  ;;  %v4870_v6 = vpop.f32.mrb[11].mxu1  ;;  %v4875_v7 = vpop.f32.mrb[5].mxu0  ;;  %v385_v8 = vadd.f32 %v383_v1, %v5668_v0 }
 0x305   :  { %v380_v9 = vpop.f32.mrb[6].mxu0 }
 0x306   :  { %v4876_v10 = vpop.f32.mrb[7].mxu0  ;;  %v387_v11 = vsel %vm290_vm2, %v385_v8, -inf  ;;  %v386_v12 = vadd.f32 %v384_v5, %v5668_v0 }
 0x307   :  { %388 = vmax.xlane.f32.xlu1 %v387_v11 }
 0x308   :  { %v390_v13 = vsel %vm290_vm2, %v386_v12, -inf }
 0x309   :  { %391 = vmax.xlane.f32.xlu0 %v390_v13 }
 0x394   :  { %v389_v14 = vpop.xlane.xlu1 %388 }
 0x395   :  { %v393_v16 = vsub.f32 %v385_v8, %v389_v14 }
 0x396   :  { %v392_v17 = vpop.xlane.xlu0 %391 }
 0x397   :  { %v395_v18 = vmul.f32 1.442695, %v393_v16  ;;  %v394_v19 = vsub.f32 %v386_v12, %v392_v17 }
 0x399   :  { %5410 = vpow2.f32 %v395_v18  ;;  %v397_v20 = vmul.f32 1.442695, %v394_v19 }
 0x39b   :  { %5412 = vpow2.f32 %v397_v20 }
 0x3a3   :  { %v5411_v21 = vpop.eup %5410 }
 0x3a4   :  { %v399_v22 = vsel %vm290_vm2, %v5411_v21, 0.0 }
 0x3a5   :  { %v5413_v23 = vpop.eup %5412  ;;  %400 = vadd.xlane.f32.xlu1 %v399_v22 }
 0x3a6   :  { %v402_v24 = vsel %vm290_vm2, %v5413_v23, 0.0 }
 0x3a7   :  { %403 = vadd.xlane.f32.xlu0 %v402_v24 }
 0x432   :  { %v401_v25 = vpop.xlane.xlu1 %400 }
 0x433   :  { %5414 = vrcp.f32 %v401_v25 }
 0x434   :  { %v404_v26 = vpop.xlane.xlu0 %403 }
 0x435   :  { %5416 = vrcp.f32 %v404_v26 }
 0x43d   :  { %v5415_v27 = vpop.eup %5414 }
 0x43e   :  { %v406_v28 = vmul.f32 %v5415_v27, %v5411_v21 }
 0x43f   :  { %v5417_v29 = vpop.eup %5416 }
 0x440   :  { %v408_v31 = vmul.f32 %v5417_v29, %v5413_v23  ;;  %v409_v32 = vpack.c.bf16 %v406_v28, %v406_v28 }
 0x442   :  { %4880 = vmatmul.mubr.msk.bf16.vlgmr.msra.gmra.mrb[12].mxu1 %vm290_vm2, %v409_v32  ;;  %v410_v34 = vpack.c.bf16 %v408_v31, %v408_v31 }
 0x443   :  { %4890 = vmatpush3.bf16.msra.mxu1 %v5338_v30  ;;  %4893 = vmatprep.mubr.msk.bf16.mxu1 %vm5501_vm1, %v5500_v15 }
 0x444   :  { %4886 = vmatmul.mubr.msk.bf16.vlgmr.msra.gmra.mrb[8].mxu0 %vm290_vm2, %v410_v34  ;;  %4891 = vmatprep.subr.bf16.mxu1 %v5500_v15 }
 0x445   :  { %4898 = vmatpush3.bf16.msra.mxu0 %v5339_v33  ;;  %4901 = vmatprep.mubr.msk.bf16.mxu0 %vm5501_vm1, %v5500_v15 }
 0x446   :  { %4899 = vmatprep.subr.bf16.mxu0 %v5500_v15 }
 0x447   :  { %4892 = vmatpush3.bf16.msra.mxu1 %v5340_v35 }
 0x448   :  { %4905 = vmatprep.subr.bf16.mxu1 %v5500_v15 }
 0x449   :  { %4900 = vmatpush3.bf16.msra.mxu0 %v5341_v37  ;;  %v4431_v37 = vld [vmem:[%s6424_s6 + $0x4] sm:$0xf] }
 0x44a   :  { %4894 = vmatmul.mubr.msk.bf16.vlgmr.msra.gmra.mrb[16].mxu1 %vm67_vm0, %v5634_v36  ;;  %4913 = vmatprep.subr.bf16.mxu0 %v5500_v15 }
 0x44b   :  { %4906 = vmatpush3.bf16.msra.mxu1 %v5342_v38  ;;  %4909 = vmatprep.mubr.msk.bf16.mxu1 %vm5501_vm1, %v5500_v15 }
 0x44c   :  { %4902 = vmatmul.mubr.msk.bf16.vlgmr.msra.gmra.mrb[12].mxu0 %vm67_vm0, %v5634_v36  ;;  %4907 = vmatprep.subr.bf16.mxu1 %v5500_v15 }
 0x44d   :  { %4915 = vmatprep.mubr.msk.bf16.mxu0 %vm5501_vm1, %v5500_v15 }
 0x44f   :  { %4908 = vmatpush3.bf16.msra.mxu1 %v5343_v39 }
 0x450   :  { %4919 = vmatprep.subr.bf16.mxu1 %v5500_v15 }
 0x452   :  { %4910 = vmatmul.mubr.msk.bf16.vlgmr.msra.gmra.mrb[20].mxu1 %vm67_vm0, %v5634_v36 }
 0x453   :  { %4921 = vmatprep.mubr.msk.bf16.mxu1 %vm5501_vm1, %v5500_v15 }
 0x515   :  { %v5718_v40 = vpop.f32.mrb[12].mxu1 }
 0x516   :  { %v4881_v41 = vpop.f32.mrb[13].mxu1 }
 0x517   :  { %v457_v42 = vpop.f32.mrb[14].mxu1  ;;  %v5720_v43 = vpop.f32.mrb[8].mxu0  ;;  %v506_v41 = vld [vmem:[%s6424_s6] sm:$0xf] }
 0x518   :  { %v507_v44 = vpack.c.bf16 %v5720_v43, %v5718_v40  ;;  %v4882_v45 = vpop.f32.mrb[15].mxu1  ;;  %v4887_v46 = vpop.f32.mrb[9].mxu0 }
 0x519   :  { %v503_v47 = vpop.f32.mrb[10].mxu0  ;;  %v907_v46 = vsel %vm416_vm3, %v4431_v37, 0 }
 0x51a   :  { %v4888_v48 = vpop.f32.mrb[11].mxu0 }
 0x51b   :  { %v954_v48 = vsel %vm416_vm3, %v506_v41, 0 }
 0x51d   :  { %v559_v49 = vpop.f32.mrb[16].mxu1 }
 0x51e   :  { %v4895_v50 = vpop.f32.mrb[17].mxu1  ;;  %v682_v2 = vpack.c.bf16 %v559_v49, %v559_v49  ;;  %v5344_v49 = vld [vmem:[%s6421_s4 + $0x20] sm:$0xff]  }
 0x51f   :  { %v562_v51 = vpop.f32.mrb[18].mxu1  ;;  %v617_v52 = vpop.f32.mrb[12].mxu0  ;;  %v5345_v50 = vld [vmem:[%s6421_s4 + $0x28] sm:$0xff]  }
 0x520   :  { %v684_v53 = vpack.c.bf16 %v617_v52, %v617_v52  ;;  %v4896_v54 = vpop.f32.mrb[19].mxu1  ;;  %v4903_v55 = vpop.f32.mrb[13].mxu0  ;;  %v683_v5 = vpack.c.bf16 %v562_v51, %v562_v51  ;;  %v5346_v52 = vld [vmem:[%s6441_s30 + $0x20] sm:$0xff]  }
 0x521   :  { %v620_v56 = vpop.f32.mrb[14].mxu0 }
 0x522   :  { %v690_v57 = vsel %vm290_vm2, %v684_v53, 0  ;;  %v685_v58 = vpack.c.bf16 %v620_v56, %v620_v56  ;;  %v4904_v59 = vpop.f32.mrb[15].mxu0 }
 0x523   :  { %4914 = vmatpush3.bf16.xpose.msra.mxu0 %v690_v57 }
 0x524   :  { %v736_v60 = vsel %vm290_vm2, %v685_v58, 0  ;;  %4925 = vmatprep.subr.bf16.mxu0 %v5500_v15  ;;  %v5347_v58 = vld [vmem:[%s6441_s30 + $0x28] sm:$0xff]  }
 0x525   :  { %v675_v61 = vpop.f32.mrb[20].mxu1  ;;  %4920 = vmatpush3.bf16.xpose.msra.mxu1 %v736_v60  ;;  %v5348_v60 = vld [vmem:[%s6420_s5 + $0x20] sm:$0xff]  }
 0x526   :  { %v806_v62 = vpack.c.bf16 %v675_v61, %v675_v61  ;;  %v4911_v63 = vpop.f32.mrb[21].mxu1  ;;  %4931 = vmatprep.subr.bf16.mxu1 %v5500_v15 }
 0x527   :  { %v678_v1 = vpop.f32.mrb[22].mxu1 }
 0x528   :  { %v807_v3 = vpack.c.bf16 %v678_v1, %v678_v1  ;;  %v4912_v4 = vpop.f32.mrb[23].mxu1  ;;  %v812_v6 = vsel %vm416_vm3, %v806_v62, 0  ;;  %v5349_v1 = vld [vmem:[%s6420_s5 + $0x28] sm:$0xff]  }
 0x52a   :  { %4916 = vmatmul.mubr.msk.bf16.vlgmr.msra.gmra.mrb[16].mxu0 %vm290_vm2, %v682_v2  ;;  %v858_v7 = vsel %vm416_vm3, %v807_v3, 0 }
 0x52b   :  { %4926 = vmatpush3.bf16.msra.mxu0 %v812_v6  ;;  %4927 = vmatprep.mubr.msk.bf16.mxu0 %vm5501_vm1, %v5500_v15 }
 0x52c   :  { %4922 = vmatmul.mubr.msk.bf16.vlgmr.msra.gmra.mrb[24].mxu1 %vm290_vm2, %v683_v5  ;;  %4937 = vmatprep.subr.bf16.mxu0 %v5500_v15 }
 0x52d   :  { %4932 = vmatpush3.bf16.msra.mxu1 %v858_v7  ;;  %4933 = vmatprep.mubr.msk.bf16.mxu1 %vm5501_vm1, %v5500_v15 }
 0x52e   :  { %4943 = vmatprep.subr.bf16.mxu1 %v5500_v15 }
 0x5fd   :  { %v726_v8 = vpop.f32.mrb[16].mxu0 }
 0x5fe   :  { %v778_v9 = vmul.f32 0.35355338, %v726_v8  ;;  %v4917_v10 = vpop.f32.mrb[17].mxu0 }
 0x5ff   :  { %v729_v11 = vpop.f32.mrb[18].mxu0  ;;  %v772_v12 = vpop.f32.mrb[24].mxu1 }
 0x600   :  { %v779_v13 = vmul.f32 0.35355338, %v772_v12  ;;  %v4918_v14 = vpop.f32.mrb[19].mxu0  ;;  %v4923_v16 = vpop.f32.mrb[25].mxu1  ;;  %v780_v17 = vadd.f32 %v778_v9, %v5668_v0 }
 0x601   :  { %v775_v18 = vpop.f32.mrb[26].mxu1 }
 0x602   :  { %v4924_v19 = vpop.f32.mrb[27].mxu1  ;;  %v782_v20 = vsel %vm290_vm2, %v780_v17, -inf  ;;  %v781_v21 = vadd.f32 %v779_v13, %v5668_v0 }
 0x603   :  { %783 = vmax.xlane.f32.xlu0 %v782_v20 }
 0x604   :  { %v785_v22 = vsel %vm290_vm2, %v781_v21, -inf }
 0x605   :  { %786 = vmax.xlane.f32.xlu1 %v785_v22 }
 0x690   :  { %v784_v23 = vpop.xlane.xlu0 %783 }
 0x691   :  { %v788_v24 = vsub.f32 %v780_v17, %v784_v23 }
 0x692   :  { %v787_v25 = vpop.xlane.xlu1 %786 }
 0x693   :  { %v790_v26 = vmul.f32 1.442695, %v788_v24  ;;  %v789_v27 = vsub.f32 %v781_v21, %v787_v25 }
 0x695   :  { %5418 = vpow2.f32 %v790_v26  ;;  %v792_v28 = vmul.f32 1.442695, %v789_v27 }
 0x697   :  { %5420 = vpow2.f32 %v792_v28 }
 0x69f   :  { %v5419_v29 = vpop.eup %5418 }
 0x6a0   :  { %v794_v30 = vsel %vm290_vm2, %v5419_v29, 0.0 }
 0x6a1   :  { %v5421_v31 = vpop.eup %5420  ;;  %795 = vadd.xlane.f32.xlu0 %v794_v30 }
 0x6a2   :  { %v797_v32 = vsel %vm290_vm2, %v5421_v31, 0.0 }
 0x6a3   :  { %798 = vadd.xlane.f32.xlu1 %v797_v32 }
 0x72e   :  { %v796_v33 = vpop.xlane.xlu0 %795 }
 0x72f   :  { %5422 = vrcp.f32 %v796_v33 }
 0x730   :  { %v799_v34 = vpop.xlane.xlu1 %798 }
 0x731   :  { %5424 = vrcp.f32 %v799_v34 }
 0x739   :  { %v5423_v35 = vpop.eup %5422 }
 0x73a   :  { %v801_v38 = vmul.f32 %v5423_v35, %v5419_v29 }
 0x73b   :  { %v5425_v39 = vpop.eup %5424 }
 0x73c   :  { %v803_v42 = vmul.f32 %v5425_v39, %v5421_v31  ;;  %v804_v45 = vpack.c.bf16 %v801_v38, %v801_v38 }
 0x73e   :  { %4928 = vmatmul.mubr.msk.bf16.vlgmr.msra.gmra.mrb[20].mxu0 %vm290_vm2, %v804_v45  ;;  %v805_v47 = vpack.c.bf16 %v803_v42, %v803_v42 }
 0x73f   :  { %4938 = vmatpush3.bf16.msra.mxu0 %v907_v46  ;;  %4939 = vmatprep.mubr.msk.bf16.mxu0 %vm5501_vm1, %v5500_v15 }
 0x740   :  { %4934 = vmatmul.mubr.msk.bf16.vlgmr.msra.gmra.mrb[28].mxu1 %vm290_vm2, %v805_v47  ;;  %4949 = vmatprep.subr.bf16.mxu0 %v5500_v15 }
 0x741   :  { %4944 = vmatpush3.bf16.msra.mxu1 %v954_v48  ;;  %4945 = vmatprep.mubr.msk.bf16.mxu1 %vm5501_vm1, %v5500_v15 }
 0x742   :  { %4957 = vmatprep.subr.bf16.mxu1 %v5500_v15 }
 0x748   :  { %4946 = vmatmul.mubr.msk.bf16.vlgmr.msra.gmra.mrb[32].mxu1 %vm290_vm2, %v507_v44 }
 0x749   :  { %4958 = vmatpush3.bf16.msra.mxu1 %v5344_v49  ;;  %4961 = vmatprep.mubr.msk.bf16.mxu1 %vm5501_vm1, %v5500_v15 }
 0x74a   :  { %4959 = vmatprep.subr.bf16.mxu1 %v5500_v15 }
 0x74d   :  { %4960 = vmatpush3.bf16.msra.mxu1 %v5345_v50 }
 0x74e   :  { %4973 = vmatprep.subr.bf16.mxu1 %v5500_v15 }
 0x750   :  { %4962 = vmatmul.mubr.msk.bf16.vlgmr.msra.gmra.mrb[36].mxu1 %vm67_vm0, %v5634_v36 }
 0x751   :  { %4975 = vmatprep.mubr.msk.bf16.mxu1 %vm5501_vm1, %v5500_v15 }
 0x811   :  { %v848_v40 = vpop.f32.mrb[20].mxu0 }
 0x812   :  { %v4929_v43 = vpop.f32.mrb[21].mxu0 }
 0x813   :  { %v851_v44 = vpop.f32.mrb[22].mxu0  ;;  %v894_v51 = vpop.f32.mrb[28].mxu1 }
 0x814   :  { %v902_v53 = vpack.c.bf16 %v894_v51, %v848_v40  ;;  %v4930_v54 = vpop.f32.mrb[23].mxu0  ;;  %v4935_v55 = vpop.f32.mrb[29].mxu1 }
 0x815   :  { %v897_v56 = vpop.f32.mrb[30].mxu1 }
 0x816   :  { %v4936_v57 = vpop.f32.mrb[31].mxu1  ;;  %4940 = vmatmul.mubr.msk.bf16.vlgmr.msra.gmra.mrb[24].mxu0 %vm290_vm2, %v902_v53 }
 0x817   :  { %4950 = vmatpush3.bf16.msra.mxu0 %v5346_v52  ;;  %4953 = vmatprep.mubr.msk.bf16.mxu0 %vm5501_vm1, %v5500_v15 }
 0x818   :  { %4951 = vmatprep.subr.bf16.mxu0 %v5500_v15 }
 0x81b   :  { %4952 = vmatpush3.bf16.msra.mxu0 %v5347_v58  ;;  %v990_v59 = vpop.f32.mrb[32].mxu1 }
 0x81c   :  { %v4947_v61 = vpop.f32.mrb[33].mxu1  ;;  %4965 = vmatprep.subr.bf16.mxu0 %v5500_v15 }
 0x81d   :  { %v993_v62 = vpop.f32.mrb[34].mxu1 }
 0x81e   :  { %v4948_v63 = vpop.f32.mrb[35].mxu1  ;;  %4954 = vmatmul.mubr.msk.bf16.vlgmr.msra.gmra.mrb[28].mxu0 %vm67_vm0, %v5634_v36 }
 0x81f   :  { %4966 = vmatpush3.bf16.msra.mxu0 %v5348_v60  ;;  %4969 = vmatprep.mubr.msk.bf16.mxu0 %vm5501_vm1, %v5500_v15 }
 0x820   :  { %4967 = vmatprep.subr.bf16.mxu0 %v5500_v15 }
 0x823   :  { %4968 = vmatpush3.bf16.msra.mxu0 %v5349_v1  ;;  %v1106_v2 = vpop.f32.mrb[36].mxu1 }
 0x824   :  { %v1173_v3 = vpack.c.bf16 %v1106_v2, %v1106_v2  ;;  %v4963_v4 = vpop.f32.mrb[37].mxu1  ;;  %4979 = vmatprep.subr.bf16.mxu0 %v5500_v15  ;;  %v5350_v2 = vld [vmem:[%s6441_s30 + $0x30] sm:$0xff]  }
 0x825   :  { %v1109_v5 = vpop.f32.mrb[38].mxu1  ;;  %v5351_v4 = vld [vmem:[%s6441_s30 + $0x38] sm:$0xff]  }
 0x826   :  { %v1179_v6 = vsel %vm290_vm2, %v1173_v3, 0  ;;  %v4964_v7 = vpop.f32.mrb[39].mxu1  ;;  %4970 = vmatmul.mubr.msk.bf16.vlgmr.msra.gmra.mrb[32].mxu0 %vm67_vm0, %v5634_v36  ;;  %v1174_v8 = vpack.c.bf16 %v1109_v5, %v1109_v5  ;;  %v5352_v5 = vld [vmem:[%s6420_s5 + $0x30] sm:$0xff]  }
 0x827   :  { %4974 = vmatpush3.bf16.xpose.msra.mxu1 %v1179_v6  ;;  %4981 = vmatprep.mubr.msk.bf16.mxu0 %vm5501_vm1, %v5500_v15  ;;  %v5353_v6 = vld [vmem:[%s6420_s5 + $0x38] sm:$0xff]  }
 0x828   :  { %4985 = vmatprep.subr.bf16.mxu1 %v5500_v15  ;;  %v1225_v9 = vsel %vm290_vm2, %v1174_v8, 0 }
 0x82c   :  { %4980 = vmatpush3.bf16.xpose.msra.mxu0 %v1225_v9 }
 0x82d   :  { %4991 = vmatprep.subr.bf16.mxu0 %v5500_v15 }
 0x8e9   :  { %v943_v10 = vpop.f32.mrb[24].mxu0 }
 0x8ea   :  { %v5809_v11 = vadd.f32 %v990_v59, %v943_v10  ;;  %v4941_v12 = vpop.f32.mrb[25].mxu0  ;;  %v4459_v59 = vld [vmem:[%s6424_s6 + $0x8] sm:$0xf] }
 0x8eb   :  { %v946_v13 = vpop.f32.mrb[26].mxu0  ;;  %v1396_v1 = vsel %vm416_vm3, %v4459_v59, 0  ;;  %v5354_v12 = vld [vmem:[%s6421_s4 + $0x30] sm:$0xff]  }
 0x8ec   :  { %v5811_v14 = vadd.f32 %v993_v62, %v946_v13  ;;  %v4942_v16 = vpop.f32.mrb[27].mxu0 }
 0x8f1   :  { %v1048_v17 = vpop.f32.mrb[28].mxu0 }
 0x8f2   :  { %v1171_v18 = vpack.c.bf16 %v1048_v17, %v1048_v17  ;;  %v4955_v19 = vpop.f32.mrb[29].mxu0 }
 0x8f3   :  { %v1051_v20 = vpop.f32.mrb[30].mxu0 }
 0x8f4   :  { %v1172_v21 = vpack.c.bf16 %v1051_v20, %v1051_v20  ;;  %v4956_v22 = vpop.f32.mrb[31].mxu0  ;;  %4976 = vmatmul.mubr.msk.bf16.vlgmr.msra.gmra.mrb[40].mxu1 %vm290_vm2, %v1171_v18  ;;  %v5355_v20 = vld [vmem:[%s6421_s4 + $0x38] sm:$0xff]  }
 0x8f5   :  { %4987 = vmatprep.mubr.msk.bf16.mxu1 %vm5501_vm1, %v5500_v15 }
 0x8f6   :  { %4982 = vmatmul.mubr.msk.bf16.vlgmr.msra.gmra.mrb[36].mxu0 %vm290_vm2, %v1172_v21 }
 0x8f7   :  { %4993 = vmatprep.mubr.msk.bf16.mxu0 %vm5501_vm1, %v5500_v15 }
 0x8f9   :  { %v1164_v23 = vpop.f32.mrb[32].mxu0 }
 0x8fa   :  { %v1295_v24 = vpack.c.bf16 %v1164_v23, %v1164_v23  ;;  %v4971_v25 = vpop.f32.mrb[33].mxu0 }
 0x8fb   :  { %v1167_v26 = vpop.f32.mrb[34].mxu0 }
 0x8fc   :  { %v1301_v27 = vsel %vm416_vm3, %v1295_v24, 0  ;;  %v1296_v28 = vpack.c.bf16 %v1167_v26, %v1167_v26  ;;  %v4972_v29 = vpop.f32.mrb[35].mxu0 }
 0x8fd   :  { %4986 = vmatpush3.bf16.msra.mxu1 %v1301_v27 }
 0x8fe   :  { %v1347_v30 = vsel %vm416_vm3, %v1296_v28, 0  ;;  %4997 = vmatprep.subr.bf16.mxu1 %v5500_v15 }
 0x8ff   :  { %4992 = vmatpush3.bf16.msra.mxu0 %v1347_v30 }
 0x900   :  { %5003 = vmatprep.subr.bf16.mxu0 %v5500_v15 }
 0x9c7   :  { %v1215_v31 = vpop.f32.mrb[40].mxu1 }
 0x9c8   :  { %v1267_v32 = vmul.f32 0.35355338, %v1215_v31  ;;  %v4977_v33 = vpop.f32.mrb[41].mxu1 }
 0x9c9   :  { %v1218_v34 = vpop.f32.mrb[42].mxu1  ;;  %v1261_v35 = vpop.f32.mrb[36].mxu0 }
 0x9ca   :  { %v1268_v37 = vmul.f32 0.35355338, %v1261_v35  ;;  %v4978_v38 = vpop.f32.mrb[43].mxu1  ;;  %v4983_v39 = vpop.f32.mrb[37].mxu0  ;;  %v1269_v41 = vadd.f32 %v1267_v32, %v5668_v0 }
 0x9cb   :  { %v1264_v42 = vpop.f32.mrb[38].mxu0 }
 0x9cc   :  { %v4984_v45 = vpop.f32.mrb[39].mxu0  ;;  %v1271_v46 = vsel %vm290_vm2, %v1269_v41, -inf  ;;  %v1270_v47 = vadd.f32 %v1268_v37, %v5668_v0 }
 0x9cd   :  { %1272 = vmax.xlane.f32.xlu0 %v1271_v46 }
 0x9ce   :  { %v1274_v48 = vsel %vm290_vm2, %v1270_v47, -inf }
 0x9cf   :  { %1275 = vmax.xlane.f32.xlu1 %v1274_v48 }
 0xa5a   :  { %v1273_v49 = vpop.xlane.xlu0 %1272 }
 0xa5b   :  { %v1277_v50 = vsub.f32 %v1269_v41, %v1273_v49 }
 0xa5c   :  { %v1276_v40 = vpop.xlane.xlu1 %1275 }
 0xa5d   :  { %v1279_v43 = vmul.f32 1.442695, %v1277_v50  ;;  %v1278_v44 = vsub.f32 %v1270_v47, %v1276_v40 }
 0xa5f   :  { %5426 = vpow2.f32 %v1279_v43  ;;  %v1281_v51 = vmul.f32 1.442695, %v1278_v44 }
 0xa61   :  { %5428 = vpow2.f32 %v1281_v51 }
 0xa69   :  { %v5427_v52 = vpop.eup %5426 }
 0xa6a   :  { %v1283_v53 = vsel %vm290_vm2, %v5427_v52, 0.0 }
 0xa6b   :  { %v5429_v54 = vpop.eup %5428  ;;  %1284 = vadd.xlane.f32.xlu0 %v1283_v53 }
 0xa6c   :  { %v1286_v55 = vsel %vm290_vm2, %v5429_v54, 0.0 }
 0xa6d   :  { %1287 = vadd.xlane.f32.xlu1 %v1286_v55 }
 0xaf8   :  { %v1285_v56 = vpop.xlane.xlu0 %1284 }
 0xaf9   :  { %5430 = vrcp.f32 %v1285_v56 }
 0xafa   :  { %v1288_v57 = vpop.xlane.xlu1 %1287 }
 0xafb   :  { %5432 = vrcp.f32 %v1288_v57 }
 0xb03   :  { %v5431_v58 = vpop.eup %5430 }
 0xb04   :  { %v1290_v60 = vmul.f32 %v5431_v58, %v5427_v52 }
 0xb05   :  { %v5433_v61 = vpop.eup %5432 }
 0xb06   :  { %v1292_v62 = vmul.f32 %v5433_v61, %v5429_v54  ;;  %v1293_v63 = vpack.c.bf16 %v1290_v60, %v1290_v60 }
 0xb08   :  { %4988 = vmatmul.mubr.msk.bf16.vlgmr.msra.gmra.mrb[44].mxu1 %vm290_vm2, %v1293_v63  ;;  %v1294_v3 = vpack.c.bf16 %v1292_v62, %v1292_v62 }
 0xb09   :  { %4998 = vmatpush3.bf16.msra.mxu1 %v1396_v1  ;;  %4999 = vmatprep.mubr.msk.bf16.mxu1 %vm5501_vm1, %v5500_v15 }
 0xb0a   :  { %4994 = vmatmul.mubr.msk.bf16.vlgmr.msra.gmra.mrb[40].mxu0 %vm290_vm2, %v1294_v3  ;;  %5011 = vmatprep.subr.bf16.mxu1 %v5500_v15 }
 0xb0b   :  { %5004 = vmatpush3.bf16.msra.mxu0 %v5350_v2  ;;  %5007 = vmatprep.mubr.msk.bf16.mxu0 %vm5501_vm1, %v5500_v15 }
 0xb0c   :  { %5005 = vmatprep.subr.bf16.mxu0 %v5500_v15 }
 0xb0f   :  { %5006 = vmatpush3.bf16.msra.mxu0 %v5351_v4 }
 0xb10   :  { %5019 = vmatprep.subr.bf16.mxu0 %v5500_v15 }
 0xb12   :  { %5008 = vmatmul.mubr.msk.bf16.vlgmr.msra.gmra.mrb[44].mxu0 %vm67_vm0, %v5634_v36 }
 0xb13   :  { %5020 = vmatpush3.bf16.msra.mxu0 %v5352_v5  ;;  %5023 = vmatprep.mubr.msk.bf16.mxu0 %vm5501_vm1, %v5500_v15 }
 0xb14   :  { %5021 = vmatprep.subr.bf16.mxu0 %v5500_v15 }
 0xb17   :  { %5022 = vmatpush3.bf16.msra.mxu0 %v5353_v6 }
 0xb18   :  { %5033 = vmatprep.subr.bf16.mxu0 %v5500_v15 }
 0xb1a   :  { %5024 = vmatmul.mubr.msk.bf16.vlgmr.msra.gmra.mrb[48].mxu0 %vm67_vm0, %v5634_v36 }
 0xb1b   :  { %5035 = vmatprep.mubr.msk.bf16.mxu0 %vm5501_vm1, %v5500_v15 }
 0xbdb   :  { %v1337_v7 = vpop.f32.mrb[44].mxu1 }
 0xbdc   :  { %v4989_v8 = vpop.f32.mrb[45].mxu1 }
 0xbdd   :  { %v1340_v9 = vpop.f32.mrb[46].mxu1  ;;  %v1383_v10 = vpop.f32.mrb[40].mxu0 }
 0xbde   :  { %v1391_v13 = vpack.c.bf16 %v1383_v10, %v1337_v7  ;;  %v4990_v16 = vpop.f32.mrb[47].mxu1  ;;  %v4995_v17 = vpop.f32.mrb[41].mxu0 }
 0xbdf   :  { %v1386_v18 = vpop.f32.mrb[42].mxu0 }
 0xbe0   :  { %v4996_v19 = vpop.f32.mrb[43].mxu0  ;;  %5000 = vmatmul.mubr.msk.bf16.vlgmr.msra.gmra.mrb[48].mxu1 %vm290_vm2, %v1391_v13 }
 0xbe1   :  { %5012 = vmatpush3.bf16.msra.mxu1 %v5354_v12  ;;  %5015 = vmatprep.mubr.msk.bf16.mxu1 %vm5501_vm1, %v5500_v15  ;;  %v4486_v12 = vld [vmem:[%s6424_s6 + $0xc] sm:$0xf] }
 0xbe2   :  { %5013 = vmatprep.subr.bf16.mxu1 %v5500_v15  ;;  %v1840_v19 = vsel %vm416_vm3, %v4486_v12, 0  ;;  %v5360_v12 = vld [vmem:[%s6429_s12 + $0x10] sm:$0xff]  }
 0xbe5   :  { %v1492_v21 = vpop.f32.mrb[44].mxu0  ;;  %5014 = vmatpush3.bf16.msra.mxu1 %v5355_v20 }
 0xbe6   :  { %v5009_v22 = vpop.f32.mrb[45].mxu0  ;;  %5027 = vmatprep.subr.bf16.mxu1 %v5500_v15 }
 0xbe7   :  { %v1495_v23 = vpop.f32.mrb[46].mxu0 }
 0xbe8   :  { %v5010_v24 = vpop.f32.mrb[47].mxu0  ;;  %5016 = vmatmul.mubr.msk.bf16.vlgmr.msra.gmra.mrb[52].mxu1 %vm67_vm0, %v5634_v36  ;;  %v1616_v47 = vpack.c.bf16 %v1495_v23, %v1495_v23 }
 0xbe9   :  { %5029 = vmatprep.mubr.msk.bf16.mxu1 %vm5501_vm1, %v5500_v15 }
 0xbed   :  { %v1608_v25 = vpop.f32.mrb[48].mxu0 }
 0xbee   :  { %v5025_v26 = vpop.f32.mrb[49].mxu0 }
 0xbef   :  { %v1611_v27 = vpop.f32.mrb[50].mxu0 }
 0xbf0   :  { %v5026_v28 = vpop.f32.mrb[51].mxu0  ;;  %v1740_v46 = vpack.c.bf16 %v1611_v27, %v1611_v27 }
 0xbf2   :  { %v1791_v49 = vsel %vm416_vm3, %v1740_v46, 0 }
 0xcb3   :  { %v1432_v29 = vpop.f32.mrb[48].mxu1 }
 0xcb4   :  { %v5880_v30 = vadd.f32 %v1432_v29, %v5809_v11  ;;  %v5001_v31 = vpop.f32.mrb[49].mxu1  ;;  %v1739_v11 = vpack.c.bf16 %v1608_v25, %v1608_v25 }
 0xcb5   :  { %v1435_v32 = vpop.f32.mrb[50].mxu1 }
 0xcb6   :  { %v5883_v33 = vadd.f32 %v1435_v32, %v5811_v14  ;;  %v5002_v34 = vpop.f32.mrb[51].mxu1  ;;  %v1615_v14 = vpack.c.bf16 %v1492_v21, %v1492_v21  ;;  %v1745_v48 = vsel %vm416_vm3, %v1739_v11, 0 }
 0xcbb   :  { %v1550_v35 = vpop.f32.mrb[52].mxu1 }
 0xcbc   :  { %v1617_v37 = vpack.c.bf16 %v1550_v35, %v1550_v35  ;;  %v5017_v36 = vpop.f32.mrb[53].mxu1  ;;  %v4488_v35 = vld [vmem:[%s6425_s7] ss:$0 sm:$0xff] }
 0xcbd   :  { %v1553_v38 = vpop.f32.mrb[54].mxu1  ;;  %v5498_v36 = vld [vmem:[%s6440_s26] sm:$0xff] }
 0xcbe   :  { %v1623_v39 = vsel %vm290_vm2, %v1617_v37, 0  ;;  %v1618_v41 = vpack.c.bf16 %v1553_v38, %v1553_v38  ;;  %v5018_v42 = vpop.f32.mrb[55].mxu1 }
 0xcbf   :  { %5028 = vmatpush3.bf16.xpose.msra.mxu1 %v1623_v39 }
 0xcc0   :  { %v1669_v45 = vsel %vm290_vm2, %v1618_v41, 0  ;;  %5039 = vmatprep.subr.bf16.mxu1 %v5500_v15 }
 0xcc1   :  { %5034 = vmatpush3.bf16.xpose.msra.mxu0 %v1669_v45 }
 0xcc2   :  { %5045 = vmatprep.subr.bf16.mxu0 %v5500_v15 }
 0xcc6   :  { %5030 = vmatmul.mubr.msk.bf16.vlgmr.msra.gmra.mrb[56].mxu1 %vm290_vm2, %v1615_v14 }
 0xcc7   :  { %5040 = vmatpush3.bf16.msra.mxu1 %v1745_v48  ;;  %5041 = vmatprep.mubr.msk.bf16.mxu1 %vm5501_vm1, %v5500_v15 }
 0xcc8   :  { %5036 = vmatmul.mubr.msk.bf16.vlgmr.msra.gmra.mrb[52].mxu0 %vm290_vm2, %v1616_v47  ;;  %5051 = vmatprep.subr.bf16.mxu1 %v5500_v15 }
 0xcc9   :  { %5046 = vmatpush3.bf16.msra.mxu0 %v1791_v49  ;;  %5047 = vmatprep.mubr.msk.bf16.mxu0 %vm5501_vm1, %v5500_v15 }
 0xcca   :  { %5057 = vmatprep.subr.bf16.mxu0 %v5500_v15 }
 0xd99   :  { %v1659_v50 = vpop.f32.mrb[56].mxu1 }
 0xd9a   :  { %v1711_v40 = vmul.f32 0.35355338, %v1659_v50  ;;  %v5031_v43 = vpop.f32.mrb[57].mxu1 }
 0xd9b   :  { %v1662_v44 = vpop.f32.mrb[58].mxu1  ;;  %v1705_v51 = vpop.f32.mrb[52].mxu0 }
 0xd9c   :  { %v1712_v52 = vmul.f32 0.35355338, %v1705_v51  ;;  %v5032_v53 = vpop.f32.mrb[59].mxu1  ;;  %v5037_v54 = vpop.f32.mrb[53].mxu0  ;;  %v1713_v55 = vadd.f32 %v1711_v40, %v5668_v0 }
 0xd9d   :  { %v1708_v56 = vpop.f32.mrb[54].mxu0  ;;  %v5356_v53 = vld [vmem:[%s6426_s10] sm:$0xff]   ;;  %v5357_v54 = vld [vmem:[%s6426_s10 + $0x8] sm:$0xff]  }
 0xd9e   :  { %v5038_v57 = vpop.f32.mrb[55].mxu0  ;;  %v1715_v58 = vsel %vm290_vm2, %v1713_v55, -inf  ;;  %v1714_v59 = vadd.f32 %v1712_v52, %v5668_v0 }
 0xd9f   :  { %1716 = vmax.xlane.f32.xlu0 %v1715_v58 }
 0xda0   :  { %v1718_v60 = vsel %vm290_vm2, %v1714_v59, -inf }
 0xda1   :  { %1719 = vmax.xlane.f32.xlu1 %v1718_v60 }
 0xe2c   :  { %v1717_v61 = vpop.xlane.xlu0 %1716 }
 0xe2d   :  { %v1721_v62 = vsub.f32 %v1713_v55, %v1717_v61 }
 0xe2e   :  { %v1720_v63 = vpop.xlane.xlu1 %1719 }
 0xe2f   :  { %v1723_v1 = vmul.f32 1.442695, %v1721_v62  ;;  %v1722_v2 = vsub.f32 %v1714_v59, %v1720_v63  ;;  %v4489_v62 = vld [vmem:[%s6427_s8] ss:$0 sm:$0xff] }
 0xe31   :  { %5434 = vpow2.f32 %v1723_v1  ;;  %v1725_v3 = vmul.f32 1.442695, %v1722_v2 }
 0xe33   :  { %5436 = vpow2.f32 %v1725_v3 }
 0xe3b   :  { %v5435_v4 = vpop.eup %5434 }
 0xe3c   :  { %v1727_v5 = vsel %vm290_vm2, %v5435_v4, 0.0 }
 0xe3d   :  { %v5437_v6 = vpop.eup %5436  ;;  %1728 = vadd.xlane.f32.xlu0 %v1727_v5 }
 0xe3e   :  { %v1730_v7 = vsel %vm290_vm2, %v5437_v6, 0.0 }
 0xe3f   :  { %1731 = vadd.xlane.f32.xlu1 %v1730_v7 }
 0xeca   :  { %v1729_v8 = vpop.xlane.xlu0 %1728 }
 0xecb   :  { %5438 = vrcp.f32 %v1729_v8 }
 0xecc   :  { %v1732_v9 = vpop.xlane.xlu1 %1731 }
 0xecd   :  { %5440 = vrcp.f32 %v1732_v9  ;;  %v5358_v9 = vld [vmem:[%s6429_s12] sm:$0xff]  }
 0xed5   :  { %v5439_v10 = vpop.eup %5438 }
 0xed6   :  { %v1734_v13 = vmul.f32 %v5439_v10, %v5435_v4  ;;  %v4490_v4 = vld [vmem:[%s6428_s9] ss:$0 sm:$0xff]  ;;  %v5359_v10 = vld [vmem:[%s6429_s12 + $0x8] sm:$0xff]  }
 0xed7   :  { %v5441_v16 = vpop.eup %5440 }
 0xed8   :  { %v1736_v17 = vmul.f32 %v5441_v16, %v5437_v6  ;;  %v1737_v18 = vpack.c.bf16 %v1734_v13, %v1734_v13  ;;  %v5361_v13 = vld [vmem:[%s6429_s12 + $0x18] sm:$0xff]   ;;  %v5362_v16 = vld [vmem:[%s6429_s12 + $0x20] sm:$0xff]  }
 0xeda   :  { %5042 = vmatmul.mubr.msk.bf16.vlgmr.msra.gmra.mrb[60].mxu1 %vm290_vm2, %v1737_v18  ;;  %v1738_v20 = vpack.c.bf16 %v1736_v17, %v1736_v17  ;;  %v5363_v17 = vld [vmem:[%s6429_s12 + $0x28] sm:$0xff]   ;;  %v5364_v18 = vld [vmem:[%s6429_s12 + $0x30] sm:$0xff]  }
 0xedb   :  { %5052 = vmatpush3.bf16.msra.mxu1 %v1840_v19  ;;  %5053 = vmatprep.mubr.msk.bf16.mxu1 %vm5501_vm1, %v5500_v15  ;;  %v5365_v19 = vld [vmem:[%s6429_s12 + $0x38] sm:$0xff]  }
 0xedc   :  { %5048 = vmatmul.mubr.msk.bf16.vlgmr.msra.gmra.mrb[56].mxu0 %vm290_vm2, %v1738_v20  ;;  %5065 = vmatprep.subr.bf16.mxu1 %v5500_v15  ;;  %v4491_v20 = vld [vmem:[%s6430_s11] ss:$0 sm:$0xff] }
 0xedd   :  { %5061 = vmatprep.mubr.msk.bf16.mxu0 %vm5501_vm1, %v5500_v15  ;;  %5058 = vmatpush3.bf16.msra.mxu0 %v5356_v53 }
 0xede   :  { %5059 = vmatprep.subr.bf16.mxu0 %v5500_v15 }
 0xee1   :  { %5060 = vmatpush3.bf16.msra.mxu0 %v5357_v54 }
 0xee2   :  { %5085 = vmatprep.subr.bf16.mxu0 %v5500_v15 }
 0xfad   :  { %v1781_v21 = vpop.f32.mrb[60].mxu1 }
 0xfae   :  { %v5043_v22 = vpop.f32.mrb[61].mxu1 }
 0xfaf   :  { %v1784_v23 = vpop.f32.mrb[62].mxu1  ;;  %v1827_v24 = vpop.f32.mrb[56].mxu0 }
 0xfb0   :  { %v1835_v25 = vpack.c.bf16 %v1827_v24, %v1781_v21  ;;  %v5044_v26 = vpop.f32.mrb[63].mxu1  ;;  %v5049_v27 = vpop.f32.mrb[57].mxu0 }
 0xfb1   :  { %v1830_v28 = vpop.f32.mrb[58].mxu0 }
 0xfb2   :  { %v5050_v29 = vpop.f32.mrb[59].mxu0  ;;  %5054 = vmatmul.mubr.msk.bf16.vlgmr.msra.gmra.mrb[64].mxu1 %vm290_vm2, %v1835_v25 }
 0xfb3   :  { %5081 = vmatprep.mubr.msk.bf16.mxu1 %vm5501_vm1, %v5500_v15  ;;  %5066 = vmatpush3.bf16.msra.mxu1 %v5358_v9 }
 0xfb4   :  { %5067 = vmatprep.subr.bf16.mxu1 %v5500_v15 }
 0xfb7   :  { %5068 = vmatpush3.bf16.msra.mxu1 %v5359_v10 }
 0xfb8   :  { %5069 = vmatprep.subr.bf16.mxu1 %v5500_v15 }
 0xfbb   :  { %5070 = vmatpush3.bf16.msra.mxu1 %v5360_v12  ;;  %v4506_v12 = vld [vmem:[%s6422_s1 + $0x1] ss:$0 sm:$0xff] }
 0xfbc   :  { %5071 = vmatprep.subr.bf16.mxu1 %v5500_v15 }
 0xfbf   :  { %5072 = vmatpush3.bf16.msra.mxu1 %v5361_v13 }
 0xfc0   :  { %5073 = vmatprep.subr.bf16.mxu1 %v5500_v15 }
 0xfc3   :  { %5074 = vmatpush3.bf16.msra.mxu1 %v5362_v16 }
 0xfc4   :  { %5075 = vmatprep.subr.bf16.mxu1 %v5500_v15 }
 0xfc7   :  { %5076 = vmatpush3.bf16.msra.mxu1 %v5363_v17 }
 0xfc8   :  { %5077 = vmatprep.subr.bf16.mxu1 %v5500_v15 }
 0xfcb   :  { %5078 = vmatpush3.bf16.msra.mxu1 %v5364_v18 }
 0xfcc   :  { %5079 = vmatprep.subr.bf16.mxu1 %v5500_v15 }
 0xfcf   :  { %5080 = vmatpush3.bf16.msra.mxu1 %v5365_v19  ;;  %v4507_v19 = vld [vmem:[%s6423_s2 + $0x1] ss:$0 sm:$0xff] }
 0xfd0   :  { %5115 = vmatprep.subr.bf16.mxu1 %v5500_v15 }
0x1085   :  { %v1876_v31 = vpop.f32.mrb[64].mxu1 }
0x1086   :  { %v1883_v32 = vadd.f32 %v1876_v31, %v5880_v30  ;;  %v5055_v34 = vpop.f32.mrb[65].mxu1  ;;  %v5499_v30 = vld [vmem:[%s6440_s26 + $0x8] sm:$0xff] }
0x1087   :  { %v1879_v37 = vpop.f32.mrb[66].mxu1 }
0x1088   :  { %v1885_v38 = vadd.f32 %v5498_v36, %v1883_v32  ;;  %v1884_v39 = vadd.f32 %v1879_v37, %v5883_v33  ;;  %v5056_v41 = vpop.f32.mrb[67].mxu1 }
0x108a   :  { %v5927_v42 = vadd.f32 %v4488_v35, %v1885_v38  ;;  %v1886_v45 = vadd.f32 %v5499_v30, %v1884_v39 }
0x108c   :  { %v5932_v11 = vadd.f32 %v4488_v35, %v1886_v45  ;;  %v1898_v14 = vsel %vm67_vm0, %v5927_v42, 0.0 }
0x108d   :  { %1899 = vadd.xlane.f32.xlu0 %v1898_v14 }
0x108e   :  { %v1901_v46 = vsel %vm67_vm0, %v5932_v11, 0.0 }
0x108f   :  { %1902 = vadd.xlane.f32.xlu1 %v1901_v46 }
0x111a   :  { %v1900_v47 = vpop.xlane.xlu0 %1899 }
0x111b   :  { %v1904_v33 = vmul.f32 0.03125, %v1900_v47 }
0x111c   :  { %v1903_v48 = vpop.xlane.xlu1 %1902 }
0x111d   :  { %v1906_v49 = vsub.f32 %v5927_v42, %v1904_v33  ;;  %v1905_v50 = vmul.f32 0.03125, %v1903_v48 }
0x111f   :  { %v1907_v40 = vsub.f32 %v5932_v11, %v1905_v50  ;;  %v1908_v43 = vmul.f32 %v1906_v49, %v1906_v49  ;;  %v4503_v50 = vld [vmem:[%s6431_s13] ss:$0 sm:$0xff] }
0x1121   :  { %v1910_v44 = vsel %vm67_vm0, %v1908_v43, 0.0  ;;  %v1909_v51 = vmul.f32 %v1907_v40, %v1907_v40 }
0x1122   :  { %1911 = vadd.xlane.f32.xlu0 %v1910_v44 }
0x1123   :  { %v1913_v52 = vsel %vm67_vm0, %v1909_v51, 0.0 }
0x1124   :  { %1914 = vadd.xlane.f32.xlu1 %v1913_v52 }
0x11af   :  { %v1912_v55 = vpop.xlane.xlu0 %1911 }
0x11b0   :  { %v1916_v56 = vmul.f32 0.03125, %v1912_v55 }
0x11b1   :  { %v1915_v57 = vpop.xlane.xlu1 %1914 }
0x11b2   :  { %v1918_v58 = vadd.f32 1e-05, %v1916_v56  ;;  %v1917_v59 = vmul.f32 0.03125, %v1915_v57 }
0x11b4   :  { %5442 = vrsqrt.f32 %v1918_v58  ;;  %v1919_v60 = vadd.f32 1e-05, %v1917_v59 }
0x11b6   :  { %5444 = vrsqrt.f32 %v1919_v60 }
0x11be   :  { %v5443_v61 = vpop.eup %5442 }
0x11bf   :  { %v1922_v63 = vmul.f32 %v5443_v61, %v1906_v49 }
0x11c0   :  { %v5445_v1 = vpop.eup %5444 }
0x11c1   :  { %v1930_v2 = vmul.f32 %v4489_v62, %v1922_v63  ;;  %v1923_v3 = vmul.f32 %v5445_v1, %v1907_v40 }
0x11c3   :  { %v1931_v5 = vmul.f32 %v4489_v62, %v1923_v3  ;;  %v1938_v6 = vadd.f32 %v4490_v4, %v1930_v2  ;;  %v5366_v2 = vld [vmem:[%s6441_s30 + $0x40] sm:$0xff]   ;;  %v5367_v3 = vld [vmem:[%s6441_s30 + $0x48] sm:$0xff]  }
0x11c5   :  { %v1939_v7 = vadd.f32 %v4490_v4, %v1931_v5 }
0x11c7   :  { %v1944_v8 = vpack.c.bf16 %v1939_v7, %v1938_v6 }
0x11c9   :  { %5062 = vmatmul.mubr.msk.bf16.vlgmr.msra.gmra.mrb[60].mxu0 %vm67_vm0, %v1944_v8 }
0x11ca   :  { %5089 = vmatprep.mubr.msk.bf16.mxu0 %vm5501_vm1, %v5500_v15  ;;  %5086 = vmatpush3.bf16.msra.mxu0 %v5366_v2 }
0x11cb   :  { %5087 = vmatprep.subr.bf16.mxu0 %v5500_v15 }
0x11ce   :  { %5088 = vmatpush3.bf16.msra.mxu0 %v5367_v3 }
0x11cf   :  { %5093 = vmatprep.subr.bf16.mxu0 %v5500_v15 }
0x129c   :  { %v2001_v21 = vpop.f32.mrb[60].mxu0 }
0x129d   :  { %v2002_v22 = vadd.f32 %v4491_v20, %v2001_v21  ;;  %v5063_v23 = vpop.f32.mrb[61].mxu0 }
0x129e   :  { %v2004_v24 = vpop.f32.mrb[62].mxu0  ;;  %v5368_v23 = vld [vmem:[%s6421_s4 + $0x40] sm:$0xff]  }
0x129f   :  { %v2010_v25 = vmul.f32 0.044715, %v2002_v22  ;;  %v2005_v26 = vadd.f32 %v4491_v20, %v2004_v24  ;;  %v5064_v27 = vpop.f32.mrb[63].mxu0  ;;  %v2008_v45 = vmul.f32 0.5, %v2002_v22 }
0x12a0   :  { %v5371_v27 = vld [vmem:[%s6420_s5 + $0x48] sm:$0xff]  }
0x12a1   :  { %v2012_v28 = vmul.f32 %v2010_v25, %v2002_v22  ;;  %v2011_v29 = vmul.f32 0.044715, %v2005_v26  ;;  %v2009_v14 = vmul.f32 0.5, %v2005_v26  ;;  %v5369_v25 = vld [vmem:[%s6421_s4 + $0x48] sm:$0xff]  }
0x12a3   :  { %v2014_v31 = vmul.f32 %v2012_v28, %v2002_v22  ;;  %v2013_v32 = vmul.f32 %v2011_v29, %v2005_v26 }
0x12a5   :  { %v2016_v34 = vadd.f32 %v2014_v31, %v2002_v22  ;;  %v2015_v35 = vmul.f32 %v2013_v32, %v2005_v26 }
0x12a7   :  { %v2018_v37 = vmul.f32 0.7978846, %v2016_v34  ;;  %v2017_v36 = vadd.f32 %v2015_v35, %v2005_v26  ;;  %v5370_v26 = vld [vmem:[%s6420_s5 + $0x40] sm:$0xff]  }
0x12a9   :  { %5446 = vtanh.f32 %v2018_v37  ;;  %v2019_v38 = vmul.f32 0.7978846, %v2017_v36 }
0x12ab   :  { %5448 = vtanh.f32 %v2019_v38 }
0x12b3   :  { %v5447_v39 = vpop.eup %5446 }
0x12b4   :  { %v2022_v41 = vadd.f32 1.0, %v5447_v39 }
0x12b5   :  { %v5449_v30 = vpop.eup %5448 }
0x12b6   :  { %v2023_v46 = vadd.f32 1.0, %v5449_v30  ;;  %v2024_v47 = vmul.f32 %v2022_v41, %v2008_v45 }
0x12b8   :  { %v2025_v33 = vmul.f32 %v2023_v46, %v2009_v14 }
0x12ba   :  { %v2042_v48 = vpack.c.bf16 %v2025_v33, %v2024_v47 }
0x12bc   :  { %5082 = vmatmul.mubr.bf16.vlgmr.msra.gmra.mrb[68].mxu1 %v2042_v48 }
0x12bd   :  { %5117 = vmatprep.mubr.msk.bf16.mxu1 %vm5501_vm1, %v5500_v15 }
0x138f   :  { %v2125_v49 = vpop.f32.mrb[68].mxu1 }
0x1390   :  { %v2132_v40 = vadd.f32 %v2125_v49, %v5927_v42  ;;  %v5083_v43 = vpop.f32.mrb[69].mxu1 }
0x1391   :  { %v2128_v44 = vpop.f32.mrb[70].mxu1 }
0x1392   :  { %v6000_v51 = vadd.f32 %v4503_v50, %v2132_v40  ;;  %v2133_v52 = vadd.f32 %v2128_v44, %v5932_v11  ;;  %v5084_v53 = vpop.f32.mrb[71].mxu1 }
0x1394   :  { %v6003_v54 = vadd.f32 %v4503_v50, %v2133_v52  ;;  %v2147_v55 = vsel %vm67_vm0, %v6000_v51, 0.0 }
0x1395   :  { %2148 = vadd.xlane.f32.xlu0 %v2147_v55 }
0x1396   :  { %v2150_v56 = vsel %vm67_vm0, %v6003_v54, 0.0 }
0x1397   :  { %2151 = vadd.xlane.f32.xlu1 %v2150_v56 }
0x1422   :  { %v2149_v57 = vpop.xlane.xlu0 %2148 }
0x1423   :  { %v2153_v58 = vmul.f32 0.03125, %v2149_v57 }
0x1424   :  { %v2152_v42 = vpop.xlane.xlu1 %2151 }
0x1425   :  { %v2155_v59 = vsub.f32 %v6000_v51, %v2153_v58  ;;  %v2154_v60 = vmul.f32 0.03125, %v2152_v42 }
0x1427   :  { %v2156_v61 = vsub.f32 %v6003_v54, %v2154_v60  ;;  %v2157_v11 = vmul.f32 %v2155_v59, %v2155_v59 }
0x1429   :  { %v2159_v62 = vsel %vm67_vm0, %v2157_v11, 0.0  ;;  %v2158_v63 = vmul.f32 %v2156_v61, %v2156_v61 }
0x142a   :  { %2160 = vadd.xlane.f32.xlu0 %v2159_v62 }
0x142b   :  { %v2162_v1 = vsel %vm67_vm0, %v2158_v63, 0.0 }
0x142c   :  { %2163 = vadd.xlane.f32.xlu1 %v2162_v1 }
0x14b7   :  { %v2161_v4 = vpop.xlane.xlu0 %2160 }
0x14b8   :  { %v2165_v5 = vmul.f32 0.03125, %v2161_v4 }
0x14b9   :  { %v2164_v6 = vpop.xlane.xlu1 %2163 }
0x14ba   :  { %v2167_v7 = vadd.f32 1e-05, %v2165_v5  ;;  %v2166_v8 = vmul.f32 0.03125, %v2164_v6 }
0x14bc   :  { %5450 = vrsqrt.f32 %v2167_v7  ;;  %v2168_v9 = vadd.f32 1e-05, %v2166_v8 }
0x14be   :  { %5452 = vrsqrt.f32 %v2168_v9 }
0x14c6   :  { %v5451_v10 = vpop.eup %5450 }
0x14c7   :  { %v2171_v13 = vmul.f32 %v5451_v10, %v2155_v59 }
0x14c8   :  { %v5453_v16 = vpop.eup %5452 }
0x14c9   :  { %v2179_v17 = vmul.f32 %v4506_v12, %v2171_v13  ;;  %v2172_v18 = vmul.f32 %v5453_v16, %v2156_v61 }
0x14cb   :  { %v2180_v20 = vmul.f32 %v4506_v12, %v2172_v18  ;;  %v2187_v21 = vadd.f32 %v4507_v19, %v2179_v17 }
0x14cd   :  { %v2188_v22 = vadd.f32 %v4507_v19, %v2180_v20  ;;  %v5372_v19 = vld [vmem:[%s6441_s30 + $0x50] sm:$0xff]  }
0x14cf   :  { %v6030_v24 = vpack.c.bf16 %v2188_v22, %v2187_v21  ;;  %v5373_v22 = vld [vmem:[%s6421_s4 + $0x50] sm:$0xff]  }
0x14d1   :  { %5090 = vmatmul.mubr.msk.bf16.vlgmr.msra.gmra.mrb[64].mxu0 %vm67_vm0, %v6030_v24 }
0x14d2   :  { %5094 = vmatpush3.bf16.msra.mxu0 %v5368_v23  ;;  %5097 = vmatprep.mubr.msk.bf16.mxu0 %vm5501_vm1, %v5500_v15 }
0x14d3   :  { %5095 = vmatprep.subr.bf16.mxu0 %v5500_v15 }
0x14d6   :  { %5096 = vmatpush3.bf16.msra.mxu0 %v5369_v25  ;;  %v5374_v25 = vld [vmem:[%s6441_s30 + $0x58] sm:$0xff]  }
0x14d7   :  { %5101 = vmatprep.subr.bf16.mxu0 %v5500_v15 }
0x14d9   :  { %5098 = vmatmul.mubr.msk.bf16.vlgmr.msra.gmra.mrb[68].mxu0 %vm67_vm0, %v6030_v24 }
0x14da   :  { %5102 = vmatpush3.bf16.msra.mxu0 %v5370_v26  ;;  %5105 = vmatprep.mubr.msk.bf16.mxu0 %vm5501_vm1, %v5500_v15  ;;  %v5375_v26 = vld [vmem:[%s6421_s4 + $0x58] sm:$0xff]  }
0x14db   :  { %5103 = vmatprep.subr.bf16.mxu0 %v5500_v15 }
0x14de   :  { %5104 = vmatpush3.bf16.msra.mxu0 %v5371_v27  ;;  %v5376_v27 = vld [vmem:[%s6420_s5 + $0x50] sm:$0xff]  }
0x14df   :  { %5109 = vmatprep.subr.bf16.mxu0 %v5500_v15 }
0x14e1   :  { %5106 = vmatmul.mubr.msk.bf16.vlgmr.msra.gmra.mrb[72].mxu0 %vm67_vm0, %v6030_v24 }
0x14e2   :  { %5111 = vmatprep.mubr.msk.bf16.mxu0 %vm5501_vm1, %v5500_v15 }
0x15a4   :  { %v2244_v28 = vpop.f32.mrb[64].mxu0 }
0x15a5   :  { %v5091_v29 = vpop.f32.mrb[65].mxu0  ;;  %v2367_v14 = vpack.c.bf16 %v2244_v28, %v2244_v28  ;;  %v5377_v28 = vld [vmem:[%s6420_s5 + $0x58] sm:$0xff]  }
0x15a6   :  { %v2247_v31 = vpop.f32.mrb[66].mxu0 }
0x15a7   :  { %v5092_v32 = vpop.f32.mrb[67].mxu0  ;;  %v2368_v48 = vpack.c.bf16 %v2247_v31, %v2247_v31 }
0x15ac   :  { %v2302_v34 = vpop.f32.mrb[68].mxu0 }
0x15ad   :  { %v2369_v35 = vpack.c.bf16 %v2302_v34, %v2302_v34  ;;  %v5099_v37 = vpop.f32.mrb[69].mxu0 }
0x15ae   :  { %v2305_v36 = vpop.f32.mrb[70].mxu0 }
0x15af   :  { %v2375_v38 = vsel %vm290_vm2, %v2369_v35, 0  ;;  %v2370_v39 = vpack.c.bf16 %v2305_v36, %v2305_v36  ;;  %v5100_v41 = vpop.f32.mrb[71].mxu0 }
0x15b0   :  { %5110 = vmatpush3.bf16.xpose.msra.mxu0 %v2375_v38 }
0x15b1   :  { %v2421_v30 = vsel %vm290_vm2, %v2370_v39, 0  ;;  %5121 = vmatprep.subr.bf16.mxu0 %v5500_v15 }
0x15b2   :  { %5116 = vmatpush3.bf16.xpose.msra.mxu1 %v2421_v30 }
0x15b3   :  { %5127 = vmatprep.subr.bf16.mxu1 %v5500_v15 }
0x15b4   :  { %v2360_v45 = vpop.f32.mrb[72].mxu0 }
0x15b5   :  { %v2491_v46 = vpack.c.bf16 %v2360_v45, %v2360_v45  ;;  %v5107_v47 = vpop.f32.mrb[73].mxu0 }
0x15b6   :  { %v2363_v33 = vpop.f32.mrb[74].mxu0 }
0x15b7   :  { %v2497_v49 = vsel %vm416_vm3, %v2491_v46, 0  ;;  %v2492_v50 = vpack.c.bf16 %v2363_v33, %v2363_v33  ;;  %v5108_v40 = vpop.f32.mrb[75].mxu0  ;;  %5112 = vmatmul.mubr.msk.bf16.vlgmr.msra.gmra.mrb[76].mxu0 %vm290_vm2, %v2367_v14 }
0x15b8   :  { %5122 = vmatpush3.bf16.msra.mxu0 %v2497_v49  ;;  %5123 = vmatprep.mubr.msk.bf16.mxu0 %vm5501_vm1, %v5500_v15 }
0x15b9   :  { %v2543_v43 = vsel %vm416_vm3, %v2492_v50, 0  ;;  %5118 = vmatmul.mubr.msk.bf16.vlgmr.msra.gmra.mrb[72].mxu1 %vm290_vm2, %v2368_v48  ;;  %5133 = vmatprep.subr.bf16.mxu0 %v5500_v15 }
0x15ba   :  { %5128 = vmatpush3.bf16.msra.mxu1 %v2543_v43  ;;  %5129 = vmatprep.mubr.msk.bf16.mxu1 %vm5501_vm1, %v5500_v15 }
0x15bb   :  { %5141 = vmatprep.subr.bf16.mxu1 %v5500_v15 }
0x168a   :  { %v2411_v44 = vpop.f32.mrb[76].mxu0 }
0x168b   :  { %v2463_v52 = vmul.f32 0.35355338, %v2411_v44  ;;  %v5113_v53 = vpop.f32.mrb[77].mxu0 }
0x168c   :  { %v2414_v55 = vpop.f32.mrb[78].mxu0  ;;  %v2457_v56 = vpop.f32.mrb[72].mxu1 }
0x168d   :  { %v2464_v57 = vmul.f32 0.35355338, %v2457_v56  ;;  %v5114_v58 = vpop.f32.mrb[79].mxu0  ;;  %v5119_v42 = vpop.f32.mrb[73].mxu1  ;;  %v2465_v59 = vadd.f32 %v2463_v52, %v5668_v0 }
0x168e   :  { %v2460_v60 = vpop.f32.mrb[74].mxu1 }
0x168f   :  { %v5120_v61 = vpop.f32.mrb[75].mxu1  ;;  %v2467_v11 = vsel %vm290_vm2, %v2465_v59, -inf  ;;  %v2466_v62 = vadd.f32 %v2464_v57, %v5668_v0 }
0x1690   :  { %2468 = vmax.xlane.f32.xlu1 %v2467_v11 }
0x1691   :  { %v2470_v63 = vsel %vm290_vm2, %v2466_v62, -inf }
0x1692   :  { %2471 = vmax.xlane.f32.xlu0 %v2470_v63 }
0x171d   :  { %v2469_v1 = vpop.xlane.xlu1 %2468 }
0x171e   :  { %v2473_v2 = vsub.f32 %v2465_v59, %v2469_v1 }
0x171f   :  { %v2472_v3 = vpop.xlane.xlu0 %2471 }
0x1720   :  { %v2475_v4 = vmul.f32 1.442695, %v2473_v2  ;;  %v2474_v5 = vsub.f32 %v2466_v62, %v2472_v3 }
0x1722   :  { %5454 = vpow2.f32 %v2475_v4  ;;  %v2477_v6 = vmul.f32 1.442695, %v2474_v5 }
0x1724   :  { %5456 = vpow2.f32 %v2477_v6 }
0x172c   :  { %v5455_v7 = vpop.eup %5454 }
0x172d   :  { %v2479_v8 = vsel %vm290_vm2, %v5455_v7, 0.0 }
0x172e   :  { %v5457_v9 = vpop.eup %5456  ;;  %2480 = vadd.xlane.f32.xlu1 %v2479_v8 }
0x172f   :  { %v2482_v10 = vsel %vm290_vm2, %v5457_v9, 0.0 }
0x1730   :  { %2483 = vadd.xlane.f32.xlu0 %v2482_v10 }
0x17bb   :  { %v2481_v12 = vpop.xlane.xlu1 %2480 }
0x17bc   :  { %5458 = vrcp.f32 %v2481_v12 }
0x17bd   :  { %v2484_v13 = vpop.xlane.xlu0 %2483 }
0x17be   :  { %5460 = vrcp.f32 %v2484_v13 }
0x17c6   :  { %v5459_v16 = vpop.eup %5458 }
0x17c7   :  { %v2486_v17 = vmul.f32 %v5459_v16, %v5455_v7 }
0x17c8   :  { %v5461_v18 = vpop.eup %5460 }
0x17c9   :  { %v2488_v20 = vmul.f32 %v5461_v18, %v5457_v9  ;;  %v2489_v21 = vpack.c.bf16 %v2486_v17, %v2486_v17 }
0x17cb   :  { %5124 = vmatmul.mubr.msk.bf16.vlgmr.msra.gmra.mrb[80].mxu0 %vm290_vm2, %v2489_v21  ;;  %v2490_v23 = vpack.c.bf16 %v2488_v20, %v2488_v20 }
0x17cc   :  { %5134 = vmatpush3.bf16.msra.mxu0 %v5372_v19  ;;  %5137 = vmatprep.mubr.msk.bf16.mxu0 %vm5501_vm1, %v5500_v15 }
0x17cd   :  { %5130 = vmatmul.mubr.msk.bf16.vlgmr.msra.gmra.mrb[76].mxu1 %vm290_vm2, %v2490_v23  ;;  %5135 = vmatprep.subr.bf16.mxu0 %v5500_v15 }
0x17ce   :  { %5142 = vmatpush3.bf16.msra.mxu1 %v5373_v22  ;;  %5145 = vmatprep.mubr.msk.bf16.mxu1 %vm5501_vm1, %v5500_v15 }
0x17cf   :  { %5143 = vmatprep.subr.bf16.mxu1 %v5500_v15 }
0x17d0   :  { %5136 = vmatpush3.bf16.msra.mxu0 %v5374_v25 }
0x17d1   :  { %5149 = vmatprep.subr.bf16.mxu0 %v5500_v15 }
0x17d2   :  { %5144 = vmatpush3.bf16.msra.mxu1 %v5375_v26 }
0x17d3   :  { %5138 = vmatmul.mubr.msk.bf16.vlgmr.msra.gmra.mrb[84].mxu0 %vm67_vm0, %v6030_v24  ;;  %5157 = vmatprep.subr.bf16.mxu1 %v5500_v15 }
0x17d4   :  { %5150 = vmatpush3.bf16.msra.mxu0 %v5376_v27  ;;  %5153 = vmatprep.mubr.msk.bf16.mxu0 %vm5501_vm1, %v5500_v15 }
0x17d5   :  { %5146 = vmatmul.mubr.msk.bf16.vlgmr.msra.gmra.mrb[80].mxu1 %vm67_vm0, %v6030_v24  ;;  %5151 = vmatprep.subr.bf16.mxu0 %v5500_v15 }
0x17d6   :  { %5159 = vmatprep.mubr.msk.bf16.mxu1 %vm5501_vm1, %v5500_v15 }
0x17d8   :  { %5152 = vmatpush3.bf16.msra.mxu0 %v5377_v28  ;;  %v4559_v28 = vld [vmem:[%s6424_s6 + $0x14] sm:$0xf] }
0x17d9   :  { %5163 = vmatprep.subr.bf16.mxu0 %v5500_v15 }
0x17db   :  { %5154 = vmatmul.mubr.msk.bf16.vlgmr.msra.gmra.mrb[88].mxu0 %vm67_vm0, %v6030_v24 }
0x17dc   :  { %5165 = vmatprep.mubr.msk.bf16.mxu0 %vm5501_vm1, %v5500_v15 }
0x189e   :  { %v6119_v29 = vpop.f32.mrb[80].mxu0 }
0x189f   :  { %v5125_v31 = vpop.f32.mrb[81].mxu0 }
0x18a0   :  { %v2536_v32 = vpop.f32.mrb[82].mxu0  ;;  %v6121_v34 = vpop.f32.mrb[76].mxu1 }
0x18a1   :  { %v2587_v35 = vpack.c.bf16 %v6121_v34, %v6119_v29  ;;  %v5126_v37 = vpop.f32.mrb[83].mxu0  ;;  %v5131_v36 = vpop.f32.mrb[77].mxu1 }
0x18a2   :  { %v2582_v38 = vpop.f32.mrb[78].mxu1  ;;  %v4533_v37 = vld [vmem:[%s6424_s6 + $0x10] sm:$0xf] }
0x18a3   :  { %v5132_v39 = vpop.f32.mrb[79].mxu1 }
0x18a4   :  { %v2987_v39 = vsel %vm416_vm3, %v4559_v28, 0 }
0x18a6   :  { %v2639_v41 = vpop.f32.mrb[84].mxu0 }
0x18a7   :  { %v5139_v30 = vpop.f32.mrb[85].mxu0  ;;  %v2762_v56 = vpack.c.bf16 %v2639_v41, %v2639_v41 }
0x18a8   :  { %v2642_v45 = vpop.f32.mrb[86].mxu0  ;;  %v2697_v14 = vpop.f32.mrb[80].mxu1  ;;  %v3034_v30 = vsel %vm416_vm3, %v4533_v37, 0 }
0x18a9   :  { %v2764_v46 = vpack.c.bf16 %v2697_v14, %v2697_v14  ;;  %v5140_v47 = vpop.f32.mrb[87].mxu0  ;;  %v5147_v33 = vpop.f32.mrb[81].mxu1  ;;  %v2763_v42 = vpack.c.bf16 %v2642_v45, %v2642_v45  ;;  %v5378_v45 = vld [vmem:[%s6421_s4 + $0x60] sm:$0xff]   ;;  %v5379_v14 = vld [vmem:[%s6421_s4 + $0x68] sm:$0xff]  }
0x18aa   :  { %v2700_v48 = vpop.f32.mrb[82].mxu1  ;;  %v5380_v47 = vld [vmem:[%s6441_s30 + $0x60] sm:$0xff]  }
0x18ab   :  { %v2770_v49 = vsel %vm290_vm2, %v2764_v46, 0  ;;  %v2765_v50 = vpack.c.bf16 %v2700_v48, %v2700_v48  ;;  %v5148_v40 = vpop.f32.mrb[83].mxu1 }
0x18ac   :  { %5158 = vmatpush3.bf16.xpose.msra.mxu1 %v2770_v49 }
0x18ad   :  { %v2816_v43 = vsel %vm290_vm2, %v2765_v50, 0  ;;  %5169 = vmatprep.subr.bf16.mxu1 %v5500_v15 }
0x18ae   :  { %v2755_v44 = vpop.f32.mrb[88].mxu0  ;;  %5164 = vmatpush3.bf16.xpose.msra.mxu0 %v2816_v43  ;;  %v5381_v43 = vld [vmem:[%s6441_s30 + $0x68] sm:$0xff]  }
0x18af   :  { %v2886_v52 = vpack.c.bf16 %v2755_v44, %v2755_v44  ;;  %v5155_v53 = vpop.f32.mrb[89].mxu0  ;;  %5175 = vmatprep.subr.bf16.mxu0 %v5500_v15 }
0x18b0   :  { %v2758_v55 = vpop.f32.mrb[90].mxu0 }
0x18b1   :  { %v2887_v57 = vpack.c.bf16 %v2758_v55, %v2758_v55  ;;  %v5156_v58 = vpop.f32.mrb[91].mxu0  ;;  %v2892_v59 = vsel %vm416_vm3, %v2886_v52, 0  ;;  %v5382_v52 = vld [vmem:[%s6420_s5 + $0x60] sm:$0xff]  }
0x18b3   :  { %5160 = vmatmul.mubr.msk.bf16.vlgmr.msra.gmra.mrb[84].mxu1 %vm290_vm2, %v2762_v56  ;;  %v2938_v60 = vsel %vm416_vm3, %v2887_v57, 0  ;;  %v5383_v57 = vld [vmem:[%s6420_s5 + $0x68] sm:$0xff]  }
0x18b4   :  { %5170 = vmatpush3.bf16.msra.mxu1 %v2892_v59  ;;  %5171 = vmatprep.mubr.msk.bf16.mxu1 %vm5501_vm1, %v5500_v15 }
0x18b5   :  { %5166 = vmatmul.mubr.msk.bf16.vlgmr.msra.gmra.mrb[92].mxu0 %vm290_vm2, %v2763_v42  ;;  %5181 = vmatprep.subr.bf16.mxu1 %v5500_v15 }
0x18b6   :  { %5176 = vmatpush3.bf16.msra.mxu0 %v2938_v60  ;;  %5177 = vmatprep.mubr.msk.bf16.mxu0 %vm5501_vm1, %v5500_v15 }
0x18b7   :  { %5187 = vmatprep.subr.bf16.mxu0 %v5500_v15 }
0x1986   :  { %v2806_v61 = vpop.f32.mrb[84].mxu1 }
0x1987   :  { %v2858_v11 = vmul.f32 0.35355338, %v2806_v61  ;;  %v5161_v62 = vpop.f32.mrb[85].mxu1 }
0x1988   :  { %v2809_v63 = vpop.f32.mrb[86].mxu1  ;;  %v2852_v1 = vpop.f32.mrb[92].mxu0 }
0x1989   :  { %v2859_v2 = vmul.f32 0.35355338, %v2852_v1  ;;  %v5162_v3 = vpop.f32.mrb[87].mxu1  ;;  %v5167_v4 = vpop.f32.mrb[93].mxu0  ;;  %v2860_v5 = vadd.f32 %v2858_v11, %v5668_v0 }
0x198a   :  { %v2855_v6 = vpop.f32.mrb[94].mxu0 }
0x198b   :  { %v5168_v7 = vpop.f32.mrb[95].mxu0  ;;  %v2862_v8 = vsel %vm290_vm2, %v2860_v5, -inf  ;;  %v2861_v9 = vadd.f32 %v2859_v2, %v5668_v0 }
0x198c   :  { %2863 = vmax.xlane.f32.xlu0 %v2862_v8 }
0x198d   :  { %v2865_v10 = vsel %vm290_vm2, %v2861_v9, -inf }
0x198e   :  { %2866 = vmax.xlane.f32.xlu1 %v2865_v10 }
0x1a19   :  { %v2864_v12 = vpop.xlane.xlu0 %2863 }
0x1a1a   :  { %v2868_v13 = vsub.f32 %v2860_v5, %v2864_v12 }
0x1a1b   :  { %v2867_v16 = vpop.xlane.xlu1 %2866 }
0x1a1c   :  { %v2870_v17 = vmul.f32 1.442695, %v2868_v13  ;;  %v2869_v18 = vsub.f32 %v2861_v9, %v2867_v16 }
0x1a1e   :  { %5462 = vpow2.f32 %v2870_v17  ;;  %v2872_v19 = vmul.f32 1.442695, %v2869_v18 }
0x1a20   :  { %5464 = vpow2.f32 %v2872_v19 }
0x1a28   :  { %v5463_v20 = vpop.eup %5462 }
0x1a29   :  { %v2874_v21 = vsel %vm290_vm2, %v5463_v20, 0.0 }
0x1a2a   :  { %v5465_v22 = vpop.eup %5464  ;;  %2875 = vadd.xlane.f32.xlu0 %v2874_v21 }
0x1a2b   :  { %v2877_v23 = vsel %vm290_vm2, %v5465_v22, 0.0 }
0x1a2c   :  { %2878 = vadd.xlane.f32.xlu1 %v2877_v23 }
0x1ab7   :  { %v2876_v25 = vpop.xlane.xlu0 %2875 }
0x1ab8   :  { %5466 = vrcp.f32 %v2876_v25 }
0x1ab9   :  { %v2879_v26 = vpop.xlane.xlu1 %2878 }
0x1aba   :  { %5468 = vrcp.f32 %v2879_v26 }
0x1ac2   :  { %v5467_v27 = vpop.eup %5466 }
0x1ac3   :  { %v2881_v31 = vmul.f32 %v5467_v27, %v5463_v20 }
0x1ac4   :  { %v5469_v32 = vpop.eup %5468 }
0x1ac5   :  { %v2883_v36 = vmul.f32 %v5469_v32, %v5465_v22  ;;  %v2884_v38 = vpack.c.bf16 %v2881_v31, %v2881_v31 }
0x1ac7   :  { %5172 = vmatmul.mubr.msk.bf16.vlgmr.msra.gmra.mrb[88].mxu1 %vm290_vm2, %v2884_v38  ;;  %v2885_v41 = vpack.c.bf16 %v2883_v36, %v2883_v36 }
0x1ac8   :  { %5182 = vmatpush3.bf16.msra.mxu1 %v2987_v39  ;;  %5183 = vmatprep.mubr.msk.bf16.mxu1 %vm5501_vm1, %v5500_v15 }
0x1ac9   :  { %5178 = vmatmul.mubr.msk.bf16.vlgmr.msra.gmra.mrb[96].mxu0 %vm290_vm2, %v2885_v41  ;;  %5193 = vmatprep.subr.bf16.mxu1 %v5500_v15 }
0x1aca   :  { %5188 = vmatpush3.bf16.msra.mxu0 %v3034_v30  ;;  %5189 = vmatprep.mubr.msk.bf16.mxu0 %vm5501_vm1, %v5500_v15 }
0x1acb   :  { %5201 = vmatprep.subr.bf16.mxu0 %v5500_v15 }
0x1ad1   :  { %5190 = vmatmul.mubr.msk.bf16.vlgmr.msra.gmra.mrb[100].mxu0 %vm290_vm2, %v2587_v35 }
0x1ad2   :  { %5202 = vmatpush3.bf16.msra.mxu0 %v5378_v45  ;;  %5205 = vmatprep.mubr.msk.bf16.mxu0 %vm5501_vm1, %v5500_v15 }
0x1ad3   :  { %5203 = vmatprep.subr.bf16.mxu0 %v5500_v15 }
0x1ad6   :  { %5204 = vmatpush3.bf16.msra.mxu0 %v5379_v14 }
0x1ad7   :  { %5217 = vmatprep.subr.bf16.mxu0 %v5500_v15 }
0x1ad9   :  { %5206 = vmatmul.mubr.msk.bf16.vlgmr.msra.gmra.mrb[104].mxu0 %vm67_vm0, %v6030_v24 }
0x1ada   :  { %5219 = vmatprep.mubr.msk.bf16.mxu0 %vm5501_vm1, %v5500_v15 }
0x1b9a   :  { %v2928_v29 = vpop.f32.mrb[88].mxu1 }
0x1b9b   :  { %v5173_v34 = vpop.f32.mrb[89].mxu1 }
0x1b9c   :  { %v2931_v35 = vpop.f32.mrb[90].mxu1  ;;  %v2974_v46 = vpop.f32.mrb[96].mxu0 }
0x1b9d   :  { %v2982_v33 = vpack.c.bf16 %v2974_v46, %v2928_v29  ;;  %v5174_v48 = vpop.f32.mrb[91].mxu1  ;;  %v5179_v49 = vpop.f32.mrb[97].mxu0 }
0x1b9e   :  { %v2977_v50 = vpop.f32.mrb[98].mxu0 }
0x1b9f   :  { %v5180_v40 = vpop.f32.mrb[99].mxu0  ;;  %5184 = vmatmul.mubr.msk.bf16.vlgmr.msra.gmra.mrb[92].mxu1 %vm290_vm2, %v2982_v33 }
0x1ba0   :  { %5194 = vmatpush3.bf16.msra.mxu1 %v5380_v47  ;;  %5197 = vmatprep.mubr.msk.bf16.mxu1 %vm5501_vm1, %v5500_v15 }
0x1ba1   :  { %5195 = vmatprep.subr.bf16.mxu1 %v5500_v15 }
0x1ba4   :  { %5196 = vmatpush3.bf16.msra.mxu1 %v5381_v43  ;;  %v3070_v44 = vpop.f32.mrb[100].mxu0 }
0x1ba5   :  { %v5191_v53 = vpop.f32.mrb[101].mxu0  ;;  %5209 = vmatprep.subr.bf16.mxu1 %v5500_v15 }
0x1ba6   :  { %v3073_v55 = vpop.f32.mrb[102].mxu0  ;;  %v4587_v53 = vld [vmem:[%s6424_s6 + $0x18] sm:$0xf] }
0x1ba7   :  { %v5192_v56 = vpop.f32.mrb[103].mxu0  ;;  %5198 = vmatmul.mubr.msk.bf16.vlgmr.msra.gmra.mrb[96].mxu1 %vm67_vm0, %v6030_v24 }
0x1ba8   :  { %5210 = vmatpush3.bf16.msra.mxu1 %v5382_v52  ;;  %5213 = vmatprep.mubr.msk.bf16.mxu1 %vm5501_vm1, %v5500_v15 }
0x1ba9   :  { %5211 = vmatprep.subr.bf16.mxu1 %v5500_v15 }
0x1bac   :  { %5212 = vmatpush3.bf16.msra.mxu1 %v5383_v57  ;;  %v3186_v58 = vpop.f32.mrb[104].mxu0 }
0x1bad   :  { %v3253_v42 = vpack.c.bf16 %v3186_v58, %v3186_v58  ;;  %v5207_v59 = vpop.f32.mrb[105].mxu0  ;;  %5223 = vmatprep.subr.bf16.mxu1 %v5500_v15 }
0x1bae   :  { %v3189_v60 = vpop.f32.mrb[106].mxu0  ;;  %v5384_v59 = vld [vmem:[%s6441_s30 + $0x70] sm:$0xff]  }
0x1baf   :  { %v3259_v61 = vsel %vm290_vm2, %v3253_v42, 0  ;;  %v5208_v11 = vpop.f32.mrb[107].mxu0  ;;  %5214 = vmatmul.mubr.msk.bf16.vlgmr.msra.gmra.mrb[100].mxu1 %vm67_vm0, %v6030_v24  ;;  %v3254_v62 = vpack.c.bf16 %v3189_v60, %v3189_v60  ;;  %v3476_v42 = vsel %vm416_vm3, %v4587_v53, 0 }
0x1bb0   :  { %5218 = vmatpush3.bf16.xpose.msra.mxu0 %v3259_v61  ;;  %5225 = vmatprep.mubr.msk.bf16.mxu1 %vm5501_vm1, %v5500_v15  ;;  %v5385_v61 = vld [vmem:[%s6441_s30 + $0x78] sm:$0xff]   ;;  %v5386_v11 = vld [vmem:[%s6420_s5 + $0x70] sm:$0xff]  }
0x1bb1   :  { %5229 = vmatprep.subr.bf16.mxu0 %v5500_v15  ;;  %v3305_v63 = vsel %vm290_vm2, %v3254_v62, 0  ;;  %v5387_v62 = vld [vmem:[%s6420_s5 + $0x78] sm:$0xff]  }
0x1bb5   :  { %5224 = vmatpush3.bf16.xpose.msra.mxu1 %v3305_v63 }
0x1bb6   :  { %5235 = vmatprep.subr.bf16.mxu1 %v5500_v15 }
0x1c72   :  { %v3023_v1 = vpop.f32.mrb[92].mxu1 }
0x1c73   :  { %v6210_v2 = vadd.f32 %v3070_v44, %v3023_v1  ;;  %v5185_v3 = vpop.f32.mrb[93].mxu1 }
0x1c74   :  { %v3026_v4 = vpop.f32.mrb[94].mxu1 }
0x1c75   :  { %v6212_v5 = vadd.f32 %v3073_v55, %v3026_v4  ;;  %v5186_v6 = vpop.f32.mrb[95].mxu1 }
0x1c76   :  { %v5388_v6 = vld [vmem:[%s6421_s4 + $0x70] sm:$0xff]  }
0x1c7a   :  { %v3128_v7 = vpop.f32.mrb[96].mxu1 }
0x1c7b   :  { %v3251_v8 = vpack.c.bf16 %v3128_v7, %v3128_v7  ;;  %v5199_v9 = vpop.f32.mrb[97].mxu1 }
0x1c7c   :  { %v3131_v10 = vpop.f32.mrb[98].mxu1 }
0x1c7d   :  { %v3252_v12 = vpack.c.bf16 %v3131_v10, %v3131_v10  ;;  %v5200_v13 = vpop.f32.mrb[99].mxu1  ;;  %5220 = vmatmul.mubr.msk.bf16.vlgmr.msra.gmra.mrb[108].mxu0 %vm290_vm2, %v3251_v8 }
0x1c7e   :  { %5231 = vmatprep.mubr.msk.bf16.mxu0 %vm5501_vm1, %v5500_v15  ;;  %v5389_v13 = vld [vmem:[%s6421_s4 + $0x78] sm:$0xff]  }
0x1c7f   :  { %5226 = vmatmul.mubr.msk.bf16.vlgmr.msra.gmra.mrb[104].mxu1 %vm290_vm2, %v3252_v12 }
0x1c80   :  { %5237 = vmatprep.mubr.msk.bf16.mxu1 %vm5501_vm1, %v5500_v15 }
0x1c82   :  { %v3244_v16 = vpop.f32.mrb[100].mxu1 }
0x1c83   :  { %v3375_v17 = vpack.c.bf16 %v3244_v16, %v3244_v16  ;;  %v5215_v18 = vpop.f32.mrb[101].mxu1 }
0x1c84   :  { %v3247_v19 = vpop.f32.mrb[102].mxu1 }
0x1c85   :  { %v3381_v20 = vsel %vm416_vm3, %v3375_v17, 0  ;;  %v3376_v21 = vpack.c.bf16 %v3247_v19, %v3247_v19  ;;  %v5216_v22 = vpop.f32.mrb[103].mxu1 }
0x1c86   :  { %5230 = vmatpush3.bf16.msra.mxu0 %v3381_v20 }
0x1c87   :  { %v3427_v23 = vsel %vm416_vm3, %v3376_v21, 0  ;;  %5241 = vmatprep.subr.bf16.mxu0 %v5500_v15 }
0x1c88   :  { %5236 = vmatpush3.bf16.msra.mxu1 %v3427_v23 }
0x1c89   :  { %5247 = vmatprep.subr.bf16.mxu1 %v5500_v15 }
0x1d50   :  { %v3295_v25 = vpop.f32.mrb[108].mxu0 }
0x1d51   :  { %v3347_v26 = vmul.f32 0.35355338, %v3295_v25  ;;  %v5221_v27 = vpop.f32.mrb[109].mxu0 }
0x1d52   :  { %v3298_v28 = vpop.f32.mrb[110].mxu0  ;;  %v3341_v31 = vpop.f32.mrb[104].mxu1 }
0x1d53   :  { %v3348_v32 = vmul.f32 0.35355338, %v3341_v31  ;;  %v5222_v37 = vpop.f32.mrb[111].mxu0  ;;  %v5227_v36 = vpop.f32.mrb[105].mxu1  ;;  %v3349_v38 = vadd.f32 %v3347_v26, %v5668_v0 }
0x1d54   :  { %v3344_v39 = vpop.f32.mrb[106].mxu1 }
0x1d55   :  { %v5228_v41 = vpop.f32.mrb[107].mxu1  ;;  %v3351_v30 = vsel %vm290_vm2, %v3349_v38, -inf  ;;  %v3350_v45 = vadd.f32 %v3348_v32, %v5668_v0 }
0x1d56   :  { %3352 = vmax.xlane.f32.xlu0 %v3351_v30 }
0x1d57   :  { %v3354_v14 = vsel %vm290_vm2, %v3350_v45, -inf }
0x1d58   :  { %3355 = vmax.xlane.f32.xlu1 %v3354_v14 }
0x1de3   :  { %v3353_v29 = vpop.xlane.xlu0 %3352 }
0x1de4   :  { %v3357_v34 = vsub.f32 %v3349_v38, %v3353_v29 }
0x1de5   :  { %v3356_v35 = vpop.xlane.xlu1 %3355 }
0x1de6   :  { %v3359_v46 = vmul.f32 1.442695, %v3357_v34  ;;  %v3358_v47 = vsub.f32 %v3350_v45, %v3356_v35 }
0x1de8   :  { %5470 = vpow2.f32 %v3359_v46  ;;  %v3361_v33 = vmul.f32 1.442695, %v3358_v47 }
0x1dea   :  { %5472 = vpow2.f32 %v3361_v33 }
0x1df2   :  { %v5471_v48 = vpop.eup %5470 }
0x1df3   :  { %v3363_v49 = vsel %vm290_vm2, %v5471_v48, 0.0 }
0x1df4   :  { %v5473_v50 = vpop.eup %5472  ;;  %3364 = vadd.xlane.f32.xlu0 %v3363_v49 }
0x1df5   :  { %v3366_v40 = vsel %vm290_vm2, %v5473_v50, 0.0 }
0x1df6   :  { %3367 = vadd.xlane.f32.xlu1 %v3366_v40 }
0x1e81   :  { %v3365_v43 = vpop.xlane.xlu0 %3364 }
0x1e82   :  { %5474 = vrcp.f32 %v3365_v43 }
0x1e83   :  { %v3368_v44 = vpop.xlane.xlu1 %3367 }
0x1e84   :  { %5476 = vrcp.f32 %v3368_v44 }
0x1e8c   :  { %v5475_v52 = vpop.eup %5474 }
0x1e8d   :  { %v3370_v55 = vmul.f32 %v5475_v52, %v5471_v48 }
0x1e8e   :  { %v5477_v56 = vpop.eup %5476 }
0x1e8f   :  { %v3372_v57 = vmul.f32 %v5477_v56, %v5473_v50  ;;  %v3373_v58 = vpack.c.bf16 %v3370_v55, %v3370_v55 }
0x1e91   :  { %5232 = vmatmul.mubr.msk.bf16.vlgmr.msra.gmra.mrb[112].mxu0 %vm290_vm2, %v3373_v58  ;;  %v3374_v60 = vpack.c.bf16 %v3372_v57, %v3372_v57 }
0x1e92   :  { %5242 = vmatpush3.bf16.msra.mxu0 %v3476_v42  ;;  %5243 = vmatprep.mubr.msk.bf16.mxu0 %vm5501_vm1, %v5500_v15 }
0x1e93   :  { %5238 = vmatmul.mubr.msk.bf16.vlgmr.msra.gmra.mrb[108].mxu1 %vm290_vm2, %v3374_v60  ;;  %5255 = vmatprep.subr.bf16.mxu0 %v5500_v15 }
0x1e94   :  { %5248 = vmatpush3.bf16.msra.mxu1 %v5384_v59  ;;  %5251 = vmatprep.mubr.msk.bf16.mxu1 %vm5501_vm1, %v5500_v15 }
0x1e95   :  { %5249 = vmatprep.subr.bf16.mxu1 %v5500_v15 }
0x1e98   :  { %5250 = vmatpush3.bf16.msra.mxu1 %v5385_v61 }
0x1e99   :  { %5263 = vmatprep.subr.bf16.mxu1 %v5500_v15 }
0x1e9b   :  { %5252 = vmatmul.mubr.msk.bf16.vlgmr.msra.gmra.mrb[112].mxu1 %vm67_vm0, %v6030_v24 }
0x1e9c   :  { %5264 = vmatpush3.bf16.msra.mxu1 %v5386_v11  ;;  %5267 = vmatprep.mubr.msk.bf16.mxu1 %vm5501_vm1, %v5500_v15 }
0x1e9d   :  { %5265 = vmatprep.subr.bf16.mxu1 %v5500_v15 }
0x1ea0   :  { %5266 = vmatpush3.bf16.msra.mxu1 %v5387_v62 }
0x1ea1   :  { %5277 = vmatprep.subr.bf16.mxu1 %v5500_v15 }
0x1ea3   :  { %5268 = vmatmul.mubr.msk.bf16.vlgmr.msra.gmra.mrb[116].mxu1 %vm67_vm0, %v6030_v24 }
0x1ea4   :  { %5279 = vmatprep.mubr.msk.bf16.mxu1 %vm5501_vm1, %v5500_v15 }
0x1f64   :  { %v3417_v63 = vpop.f32.mrb[112].mxu0 }
0x1f65   :  { %v5233_v1 = vpop.f32.mrb[113].mxu0 }
0x1f66   :  { %v3420_v3 = vpop.f32.mrb[114].mxu0  ;;  %v3463_v4 = vpop.f32.mrb[108].mxu1 }
0x1f67   :  { %v3471_v7 = vpack.c.bf16 %v3463_v4, %v3417_v63  ;;  %v5234_v8 = vpop.f32.mrb[115].mxu0  ;;  %v5239_v9 = vpop.f32.mrb[109].mxu1 }
0x1f68   :  { %v3466_v10 = vpop.f32.mrb[110].mxu1 }
0x1f69   :  { %v5240_v12 = vpop.f32.mrb[111].mxu1  ;;  %5244 = vmatmul.mubr.msk.bf16.vlgmr.msra.gmra.mrb[116].mxu0 %vm290_vm2, %v3471_v7  ;;  %v4614_v7 = vld [vmem:[%s6424_s6 + $0x1c] sm:$0xf] }
0x1f6a   :  { %5256 = vmatpush3.bf16.msra.mxu0 %v5388_v6  ;;  %5259 = vmatprep.mubr.msk.bf16.mxu0 %vm5501_vm1, %v5500_v15 }
0x1f6b   :  { %5257 = vmatprep.subr.bf16.mxu0 %v5500_v15 }
0x1f6e   :  { %v3572_v16 = vpop.f32.mrb[112].mxu1  ;;  %5258 = vmatpush3.bf16.msra.mxu0 %v5389_v13  ;;  %v3920_v13 = vsel %vm416_vm3, %v4614_v7, 0  ;;  %v5397_v7 = vld [vmem:[%s6429_s12 + $0x68] sm:$0xff]  }
0x1f6f   :  { %v5253_v17 = vpop.f32.mrb[113].mxu1  ;;  %5271 = vmatprep.subr.bf16.mxu0 %v5500_v15 }
0x1f70   :  { %v3575_v18 = vpop.f32.mrb[114].mxu1 }
0x1f71   :  { %v5254_v19 = vpop.f32.mrb[115].mxu1  ;;  %5260 = vmatmul.mubr.msk.bf16.vlgmr.msra.gmra.mrb[120].mxu0 %vm67_vm0, %v6030_v24  ;;  %v3696_v29 = vpack.c.bf16 %v3575_v18, %v3575_v18 }
0x1f72   :  { %5273 = vmatprep.mubr.msk.bf16.mxu0 %vm5501_vm1, %v5500_v15 }
0x1f76   :  { %v3688_v20 = vpop.f32.mrb[116].mxu1 }
0x1f77   :  { %v5269_v21 = vpop.f32.mrb[117].mxu1 }
0x1f78   :  { %v3691_v22 = vpop.f32.mrb[118].mxu1 }
0x1f79   :  { %v5270_v23 = vpop.f32.mrb[119].mxu1  ;;  %v3820_v14 = vpack.c.bf16 %v3691_v22, %v3691_v22 }
0x1f7b   :  { %v3871_v35 = vsel %vm416_vm3, %v3820_v14, 0 }
0x203c   :  { %v3512_v25 = vpop.f32.mrb[116].mxu0 }
0x203d   :  { %v6281_v26 = vadd.f32 %v3512_v25, %v6210_v2  ;;  %v5245_v27 = vpop.f32.mrb[117].mxu0  ;;  %v3819_v2 = vpack.c.bf16 %v3688_v20, %v3688_v20 }
0x203e   :  { %v3515_v28 = vpop.f32.mrb[118].mxu0 }
0x203f   :  { %v6284_v31 = vadd.f32 %v3515_v28, %v6212_v5  ;;  %v5246_v32 = vpop.f32.mrb[119].mxu0  ;;  %v3695_v5 = vpack.c.bf16 %v3572_v16, %v3572_v16  ;;  %v3825_v34 = vsel %vm416_vm3, %v3819_v2, 0 }
0x2044   :  { %v3630_v37 = vpop.f32.mrb[120].mxu0 }
0x2045   :  { %v3697_v36 = vpack.c.bf16 %v3630_v37, %v3630_v37  ;;  %v5261_v24 = vpop.f32.mrb[121].mxu0 }
0x2046   :  { %v3633_v38 = vpop.f32.mrb[122].mxu0 }
0x2047   :  { %v3703_v39 = vsel %vm290_vm2, %v3697_v36, 0  ;;  %v3698_v41 = vpack.c.bf16 %v3633_v38, %v3633_v38  ;;  %v5262_v30 = vpop.f32.mrb[123].mxu0  ;;  %v4617_v36 = vld [vmem:[%s6425_s7 + $0x1] ss:$0 sm:$0xff] }
0x2048   :  { %5272 = vmatpush3.bf16.xpose.msra.mxu0 %v3703_v39 }
0x2049   :  { %v3749_v45 = vsel %vm290_vm2, %v3698_v41, 0  ;;  %5283 = vmatprep.subr.bf16.mxu0 %v5500_v15 }
0x204a   :  { %5278 = vmatpush3.bf16.xpose.msra.mxu1 %v3749_v45 }
0x204b   :  { %5289 = vmatprep.subr.bf16.mxu1 %v5500_v15 }
0x204f   :  { %5274 = vmatmul.mubr.msk.bf16.vlgmr.msra.gmra.mrb[124].mxu0 %vm290_vm2, %v3695_v5 }
0x2050   :  { %5284 = vmatpush3.bf16.msra.mxu0 %v3825_v34  ;;  %5285 = vmatprep.mubr.msk.bf16.mxu0 %vm5501_vm1, %v5500_v15 }
0x2051   :  { %5280 = vmatmul.mubr.msk.bf16.vlgmr.msra.gmra.mrb[120].mxu1 %vm290_vm2, %v3696_v29  ;;  %5295 = vmatprep.subr.bf16.mxu0 %v5500_v15 }
0x2052   :  { %5290 = vmatpush3.bf16.msra.mxu1 %v3871_v35  ;;  %5291 = vmatprep.mubr.msk.bf16.mxu1 %vm5501_vm1, %v5500_v15 }
0x2053   :  { %5301 = vmatprep.subr.bf16.mxu1 %v5500_v15 }
0x2122   :  { %v3739_v46 = vpop.f32.mrb[124].mxu0 }
0x2123   :  { %v3791_v47 = vmul.f32 0.35355338, %v3739_v46  ;;  %v5275_v33 = vpop.f32.mrb[125].mxu0 }
0x2124   :  { %v3742_v48 = vpop.f32.mrb[126].mxu0  ;;  %v3785_v49 = vpop.f32.mrb[120].mxu1 }
0x2125   :  { %v3792_v50 = vmul.f32 0.35355338, %v3785_v49  ;;  %v5276_v40 = vpop.f32.mrb[127].mxu0  ;;  %v5281_v43 = vpop.f32.mrb[121].mxu1  ;;  %v3793_v44 = vadd.f32 %v3791_v47, %v5668_v0  ;;  %v5390_v48 = vld [vmem:[%s6426_s10 + $0x10] sm:$0xff]   ;;  %v5391_v49 = vld [vmem:[%s6426_s10 + $0x18] sm:$0xff]  }
0x2126   :  { %v3788_v52 = vpop.f32.mrb[122].mxu1 }
0x2127   :  { %v5282_v53 = vpop.f32.mrb[123].mxu1  ;;  %v3795_v55 = vsel %vm290_vm2, %v3793_v44, -inf  ;;  %v3794_v56 = vadd.f32 %v3792_v50, %v5668_v0 }
0x2128   :  { %3796 = vmax.xlane.f32.xlu0 %v3795_v55 }
0x2129   :  { %v3798_v57 = vsel %vm290_vm2, %v3794_v56, -inf }
0x212a   :  { %3799 = vmax.xlane.f32.xlu1 %v3798_v57 }
0x21b5   :  { %v3797_v58 = vpop.xlane.xlu0 %3796 }
0x21b6   :  { %v3801_v42 = vsub.f32 %v3793_v44, %v3797_v58 }
0x21b7   :  { %v3800_v59 = vpop.xlane.xlu1 %3799 }
0x21b8   :  { %v3803_v60 = vmul.f32 1.442695, %v3801_v42  ;;  %v3802_v61 = vsub.f32 %v3794_v56, %v3800_v59  ;;  %v4620_v56 = vld [vmem:[%s6427_s8 + $0x1] ss:$0 sm:$0xff] }
0x21ba   :  { %5478 = vpow2.f32 %v3803_v60  ;;  %v3805_v11 = vmul.f32 1.442695, %v3802_v61  ;;  %v4621_v60 = vld [vmem:[%s6428_s9 + $0x1] ss:$0 sm:$0xff] }
0x21bc   :  { %5480 = vpow2.f32 %v3805_v11 }
0x21c4   :  { %v5479_v62 = vpop.eup %5478 }
0x21c5   :  { %v3807_v63 = vsel %vm290_vm2, %v5479_v62, 0.0 }
0x21c6   :  { %v5481_v1 = vpop.eup %5480  ;;  %3808 = vadd.xlane.f32.xlu0 %v3807_v63 }
0x21c7   :  { %v3810_v3 = vsel %vm290_vm2, %v5481_v1, 0.0 }
0x21c8   :  { %3811 = vadd.xlane.f32.xlu1 %v3810_v3  ;;  %v5393_v3 = vld [vmem:[%s6429_s12 + $0x48] sm:$0xff]  }
0x2253   :  { %v3809_v0 = vpop.xlane.xlu0 %3808 }
0x2254   :  { %5482 = vrcp.f32 %v3809_v0  ;;  %v5394_v0 = vld [vmem:[%s6429_s12 + $0x50] sm:$0xff]  }
0x2255   :  { %v3812_v4 = vpop.xlane.xlu1 %3811 }
0x2256   :  { %5484 = vrcp.f32 %v3812_v4  ;;  %v5395_v4 = vld [vmem:[%s6429_s12 + $0x58] sm:$0xff]  }
0x225e   :  { %v5483_v6 = vpop.eup %5482 }
0x225f   :  { %v3814_v8 = vmul.f32 %v5483_v6, %v5479_v62  ;;  %v5396_v6 = vld [vmem:[%s6429_s12 + $0x60] sm:$0xff]  }
0x2260   :  { %v5485_v9 = vpop.eup %5484 }
0x2261   :  { %v3816_v10 = vmul.f32 %v5485_v9, %v5481_v1  ;;  %v3817_v12 = vpack.c.bf16 %v3814_v8, %v3814_v8  ;;  %v5392_v1 = vld [vmem:[%s6429_s12 + $0x40] sm:$0xff]   ;;  %v5398_v8 = vld [vmem:[%s6429_s12 + $0x70] sm:$0xff]   ;;  %v5399_v9 = vld [vmem:[%s6429_s12 + $0x78] sm:$0xff]  }
0x2263   :  { %5286 = vmatmul.mubr.msk.bf16.vlgmr.msra.gmra.mrb[128].mxu0 %vm290_vm2, %v3817_v12  ;;  %v3818_v16 = vpack.c.bf16 %v3816_v10, %v3816_v10  ;;  %v4627_v10 = vld [vmem:[%s6430_s11 + $0x1] ss:$0 sm:$0xff] }
0x2264   :  { %5296 = vmatpush3.bf16.msra.mxu0 %v3920_v13  ;;  %5297 = vmatprep.mubr.msk.bf16.mxu0 %vm5501_vm1, %v5500_v15 }
0x2265   :  { %5292 = vmatmul.mubr.msk.bf16.vlgmr.msra.gmra.mrb[124].mxu1 %vm290_vm2, %v3818_v16  ;;  %5309 = vmatprep.subr.bf16.mxu0 %v5500_v15 }
0x2266   :  { %5305 = vmatprep.mubr.msk.bf16.mxu1 %vm5501_vm1, %v5500_v15  ;;  %5302 = vmatpush3.bf16.msra.mxu1 %v5390_v48 }
0x2267   :  { %5303 = vmatprep.subr.bf16.mxu1 %v5500_v15 }
0x226a   :  { %5304 = vmatpush3.bf16.msra.mxu1 %v5391_v49 }
0x2336   :  { %v3861_v17 = vpop.f32.mrb[128].mxu0 }
0x2337   :  { %v5287_v18 = vpop.f32.mrb[129].mxu0 }
0x2338   :  { %v3864_v19 = vpop.f32.mrb[130].mxu0  ;;  %v3907_v20 = vpop.f32.mrb[124].mxu1 }
0x2339   :  { %v3915_v21 = vpack.c.bf16 %v3907_v20, %v3861_v17  ;;  %v5288_v22 = vpop.f32.mrb[131].mxu0  ;;  %v5293_v23 = vpop.f32.mrb[125].mxu1 }
0x233a   :  { %v3910_v25 = vpop.f32.mrb[126].mxu1 }
0x233b   :  { %v5294_v27 = vpop.f32.mrb[127].mxu1  ;;  %5298 = vmatmul.mubr.msk.bf16.vlgmr.msra.gmra.mrb[132].mxu0 %vm290_vm2, %v3915_v21 }
0x233c   :  { %5325 = vmatprep.mubr.msk.bf16.mxu0 %vm5501_vm1, %v5500_v15  ;;  %5310 = vmatpush3.bf16.msra.mxu0 %v5392_v1 }
0x233d   :  { %5311 = vmatprep.subr.bf16.mxu0 %v5500_v15 }
0x2340   :  { %5312 = vmatpush3.bf16.msra.mxu0 %v5393_v3 }
0x2341   :  { %5313 = vmatprep.subr.bf16.mxu0 %v5500_v15 }
0x2344   :  { %5314 = vmatpush3.bf16.msra.mxu0 %v5394_v0 }
0x2345   :  { %5315 = vmatprep.subr.bf16.mxu0 %v5500_v15 }
0x2348   :  { %5316 = vmatpush3.bf16.msra.mxu0 %v5395_v4 }
0x2349   :  { %5317 = vmatprep.subr.bf16.mxu0 %v5500_v15 }
0x234c   :  { %5318 = vmatpush3.bf16.msra.mxu0 %v5396_v6 }
0x234d   :  { %5319 = vmatprep.subr.bf16.mxu0 %v5500_v15 }
0x2350   :  { %5320 = vmatpush3.bf16.msra.mxu0 %v5397_v7 }
0x2351   :  { %5321 = vmatprep.subr.bf16.mxu0 %v5500_v15 }
0x2354   :  { %5322 = vmatpush3.bf16.msra.mxu0 %v5398_v8 }
0x2355   :  { %5323 = vmatprep.subr.bf16.mxu0 %v5500_v15 }
0x2358   :  { %5324 = vmatpush3.bf16.msra.mxu0 %v5399_v9  ;;  %v4657_v9 = vld [vmem:[%s6433_s14] ss:$0 sm:$0xff] }
0x240e   :  { %v3956_v28 = vpop.f32.mrb[132].mxu0 }
0x240f   :  { %v3963_v32 = vadd.f32 %v3956_v28, %v6281_v26  ;;  %v5299_v37 = vpop.f32.mrb[133].mxu0 }
0x2410   :  { %v3959_v24 = vpop.f32.mrb[134].mxu0 }
0x2411   :  { %v3965_v38 = vadd.f32 %v3963_v32, %v6000_v51  ;;  %v3964_v39 = vadd.f32 %v3959_v24, %v6284_v31  ;;  %v5300_v41 = vpop.f32.mrb[135].mxu0 }
0x2413   :  { %v6326_v30 = vadd.f32 %v4617_v36, %v3965_v38  ;;  %v3966_v45 = vadd.f32 %v3964_v39, %v6003_v54 }
0x2415   :  { %v6329_v2 = vadd.f32 %v4617_v36, %v3966_v45  ;;  %v3981_v26 = vsel %vm67_vm0, %v6326_v30, 0.0 }
0x2416   :  { %3982 = vadd.xlane.f32.xlu0 %v3981_v26 }
0x2417   :  { %v3984_v5 = vsel %vm67_vm0, %v6329_v2, 0.0 }
0x2418   :  { %3985 = vadd.xlane.f32.xlu1 %v3984_v5 }
0x24a3   :  { %v3983_v14 = vpop.xlane.xlu0 %3982 }
0x24a4   :  { %v3987_v29 = vmul.f32 0.03125, %v3983_v14 }
0x24a5   :  { %v3986_v51 = vpop.xlane.xlu1 %3985 }
0x24a6   :  { %v3989_v31 = vsub.f32 %v6326_v30, %v3987_v29  ;;  %v3988_v34 = vmul.f32 0.03125, %v3986_v51  ;;  %v4656_v51 = vld [vmem:[%s6431_s13 + $0x1] ss:$0 sm:$0xff] }
0x24a8   :  { %v3990_v35 = vsub.f32 %v6329_v2, %v3988_v34  ;;  %v3991_v46 = vmul.f32 %v3989_v31, %v3989_v31 }
0x24aa   :  { %v3993_v54 = vsel %vm67_vm0, %v3991_v46, 0.0  ;;  %v3992_v47 = vmul.f32 %v3990_v35, %v3990_v35 }
0x24ab   :  { %3994 = vadd.xlane.f32.xlu0 %v3993_v54 }
0x24ac   :  { %v3996_v33 = vsel %vm67_vm0, %v3992_v47, 0.0 }
0x24ad   :  { %3997 = vadd.xlane.f32.xlu1 %v3996_v33 }
0x2538   :  { %v3995_v50 = vpop.xlane.xlu0 %3994 }
0x2539   :  { %v3999_v40 = vmul.f32 0.03125, %v3995_v50 }
0x253a   :  { %v3998_v43 = vpop.xlane.xlu1 %3997 }
0x253b   :  { %v4001_v44 = vadd.f32 1e-05, %v3999_v40  ;;  %v4000_v52 = vmul.f32 0.03125, %v3998_v43 }
0x253d   :  { %5486 = vrsqrt.f32 %v4001_v44  ;;  %v4002_v53 = vadd.f32 1e-05, %v4000_v52 }
0x253f   :  { %5488 = vrsqrt.f32 %v4002_v53 }
0x2547   :  { %v5487_v55 = vpop.eup %5486 }
0x2548   :  { %v4005_v57 = vmul.f32 %v5487_v55, %v3989_v31 }
0x2549   :  { %v5489_v58 = vpop.eup %5488 }
0x254a   :  { %v4013_v42 = vmul.f32 %v4620_v56, %v4005_v57  ;;  %v4006_v59 = vmul.f32 %v5489_v58, %v3990_v35 }
0x254c   :  { %v4014_v61 = vmul.f32 %v4620_v56, %v4006_v59  ;;  %v4021_v11 = vadd.f32 %v4621_v60, %v4013_v42  ;;  %v5402_v59 = vld [vmem:[%s6432_s16 + $0x4] ss:$8 sps:$4 sm:$0xff]  }
0x254d   :  { %4334 = vmatprep.subr.bf16.mxu1 %v5402_v59 }
0x254e   :  { %v4022_v62 = vadd.f32 %v4621_v60, %v4014_v61  ;;  %v5400_v60 = vld [vmem:[%s6432_s16] ss:$8 sps:$4 sm:$0xff]   ;;  %v5403_v61 = vld [vmem:[%s6432_s16 + $0x10] ss:$8 sps:$4 sm:$0xff]  }
0x2550   :  { %v4028_v63 = vpack.c.bf16 %v4022_v62, %v4021_v11  ;;  %v5405_v11 = vld [vmem:[%s6432_s16 + $0x14] ss:$8 sps:$4 sm:$0xff]   ;;  %v5502_v62 = vmov 0  }
0x2552   :  { %5306 = vmatmul.mubr.msk.bf16.vlgmr.msra.gmra.mrb[128].mxu1 %vm67_vm0, %v4028_v63 }
0x2553   :  { %4335 = vmatpush1.bf16.msra.mxu1 %v5400_v60  ;;  %4366 = vmatprep.mubr.bf16.mxu1 %v5502_v62 }
0x2554   :  { %4336 = vmatprep.subr.bf16.mxu1 %v5405_v11 }
0x2557   :  { %4337 = vmatpush1.bf16.msra.mxu1 %v5403_v61 }
0x2625   :  { %v4086_v12 = vpop.f32.mrb[128].mxu1 }
0x2626   :  { %v4087_v13 = vadd.f32 %v4627_v10, %v4086_v12  ;;  %v5307_v16 = vpop.f32.mrb[129].mxu1  ;;  %v4658_v12 = vld [vmem:[%s6434_s15] ss:$0 sm:$0xff] }
0x2627   :  { %v4089_v17 = vpop.f32.mrb[130].mxu1 }
0x2628   :  { %v4095_v18 = vmul.f32 0.044715, %v4087_v13  ;;  %v4090_v19 = vadd.f32 %v4627_v10, %v4089_v17  ;;  %v5308_v20 = vpop.f32.mrb[131].mxu1  ;;  %v4093_v39 = vmul.f32 0.5, %v4087_v13 }
0x262a   :  { %v4097_v21 = vmul.f32 %v4095_v18, %v4087_v13  ;;  %v4096_v22 = vmul.f32 0.044715, %v4090_v19  ;;  %v4094_v41 = vmul.f32 0.5, %v4090_v19 }
0x262c   :  { %v4099_v23 = vmul.f32 %v4097_v21, %v4087_v13  ;;  %v4098_v25 = vmul.f32 %v4096_v22, %v4090_v19 }
0x262e   :  { %v4101_v27 = vadd.f32 %v4099_v23, %v4087_v13  ;;  %v4100_v28 = vmul.f32 %v4098_v25, %v4090_v19 }
0x2630   :  { %v4103_v32 = vmul.f32 0.7978846, %v4101_v27  ;;  %v4102_v15 = vadd.f32 %v4100_v28, %v4090_v19 }
0x2632   :  { %5490 = vtanh.f32 %v4103_v32  ;;  %v4104_v37 = vmul.f32 0.7978846, %v4102_v15 }
0x2634   :  { %5492 = vtanh.f32 %v4104_v37 }
0x263c   :  { %v5491_v36 = vpop.eup %5490 }
0x263d   :  { %v4107_v24 = vadd.f32 1.0, %v5491_v36 }
0x263e   :  { %v5493_v38 = vpop.eup %5492 }
0x263f   :  { %v4108_v45 = vadd.f32 1.0, %v5493_v38  ;;  %v4109_v26 = vmul.f32 %v4107_v24, %v4093_v39 }
0x2641   :  { %v4110_v5 = vmul.f32 %v4108_v45, %v4094_v41 }
0x2643   :  { %v4128_v14 = vpack.c.bf16 %v4110_v5, %v4109_v26 }
0x2645   :  { %5326 = vmatmul.mubr.bf16.vlgmr.msra.gmra.mrb[136].mxu0 %v4128_v14 }
0x2718   :  { %v4211_v29 = vpop.f32.mrb[136].mxu0 }
0x2719   :  { %v4218_v31 = vadd.f32 %v4211_v29, %v6326_v30  ;;  %v5327_v34 = vpop.f32.mrb[137].mxu0 }
0x271a   :  { %v4214_v35 = vpop.f32.mrb[138].mxu0 }
0x271b   :  { %v4219_v46 = vadd.f32 %v4214_v35, %v6329_v2  ;;  %v5328_v54 = vpop.f32.mrb[139].mxu0  ;;  %v4228_v47 = vadd.f32 %v4656_v51, %v4218_v31 }
0x271d   :  { %v4229_v33 = vadd.f32 %v4656_v51, %v4219_v46  ;;  %v4238_v48 = vsel %vm4237_vm5, %v4228_v47, 0.0 }
0x271e   :  { %4239 = vadd.xlane.f32.xlu1 %v4238_v48 }
0x271f   :  { %v4234_v49 = vrot.slane %v4229_v33, 7 }
0x2721   :  { %v4242_v50 = vsel %vm4241_vm6, %v4234_v49, 0.0 }
0x2722   :  { %4243 = vadd.xlane.f32.xlu0 %v4242_v50 }
0x27ab   :  { %v4240_v40 = vpop.xlane.xlu1 %4239 }
0x27ac   :  { %v4245_v43 = vmul.f32 0.03125, %v4240_v40 }
0x27ae   :  { %v4252_v44 = vsub.f32 %v4228_v47, %v4245_v43 }
0x27af   :  { %v4244_v30 = vpop.xlane.xlu0 %4243 }
0x27b0   :  { %v4246_v52 = vmul.f32 0.03125, %v4244_v30  ;;  %v4254_v53 = vmul.f32 %v4252_v44, %v4252_v44 }
0x27b2   :  { %v4249_v55 = vrot.slane %v4246_v52, 1  ;;  %v4261_v2 = vsel %vm4237_vm5, %v4254_v53, 0.0 }
0x27b3   :  { %4262 = vadd.xlane.f32.xlu1 %v4261_v2 }
0x27b4   :  { %v4253_v56 = vsub.f32 %v4229_v33, %v4249_v55 }
0x27b6   :  { %v4255_v57 = vmul.f32 %v4253_v56, %v4253_v56 }
0x27b8   :  { %v4258_v58 = vrot.slane %v4255_v57, 7 }
0x27ba   :  { %v4264_v42 = vsel %vm4241_vm6, %v4258_v58, 0.0 }
0x27bb   :  { %4265 = vadd.xlane.f32.xlu0 %v4264_v42 }
0x2840   :  { %v4263_v63 = vpop.xlane.xlu1 %4262 }
0x2841   :  { %v4267_v1 = vmul.f32 0.03125, %v4263_v63 }
0x2843   :  { %v4269_v3 = vadd.f32 1e-05, %v4267_v1 }
0x2845   :  { %5494 = vrsqrt.f32 %v4269_v3 }
0x2848   :  { %v4266_v0 = vpop.xlane.xlu0 %4265 }
0x2849   :  { %v4268_v4 = vmul.f32 0.03125, %v4266_v0 }
0x284b   :  { %v4270_v6 = vadd.f32 1e-05, %v4268_v4 }
0x284d   :  { %5496 = vrsqrt.f32 %v4270_v6 }
0x284f   :  { %v5495_v7 = vpop.eup %5494 }
0x2850   :  { %v4278_v8 = vmul.f32 %v5495_v7, %v4252_v44 }
0x2852   :  { %v4286_v10 = vmul.f32 %v4657_v9, %v4278_v8 }
0x2854   :  { %v4294_v16 = vadd.f32 %v4658_v12, %v4286_v10 }
0x2856   :  { %v4300_v19 = vpack.c.bf16 %v4294_v16, %v4294_v16 }
0x2857   :  { %v5497_v13 = vpop.eup %5496 }
0x2858   :  { %v4275_v17 = vrot.slane %v5497_v13, 1  ;;  %v4304_v22 = vunpack.c.l.b16 %v4300_v19 }
0x285a   :  { %v4279_v18 = vmul.f32 %v4275_v17, %v4253_v56  ;;  %v4306_v27 = vrot.slane %v4304_v22, 7 }
0x285c   :  { %v4287_v20 = vmul.f32 %v4657_v9, %v4279_v18 }
0x285e   :  { %v4295_v21 = vadd.f32 %v4658_v12, %v4287_v20 }
0x2860   :  { %v4301_v23 = vpack.c.bf16 %v4295_v21, %v4295_v21 }
0x2862   :  { %v4305_v25 = vunpack.c.l.b16 %v4301_v23 }
0x2864   :  { %v4307_v28 = vrot.slane %v4305_v25, 6 }
0x2866   :  { %v4309_v32 = vsel %vm4308_vm7, %v4307_v28, %v4306_v27 }
0x2867   :  { %v4310_v15 = vpack.c.b16 %v4309_v32, %v4309_v32 }
0x2869   :  { %4663 = vmatmul.mubr.msk.bf16.vlgmr.msra.gmra.mrb[132].mxu1 %vm67_vm0, %v4310_v15 }
0x293c   :  { %v4368_v37 = vpop.f32.mrb[132].mxu1 }
0x293d   :  { %v4370_v36 = vpop.f32.mrb[133].mxu1 }
0x293e   :  { %v4377_v24 = vcombine.low %v4368_v37, %v4370_v36  ;;  %v4372_v38 = vpop.f32.mrb[134].mxu1 }
0x293f   :  { %v4373_v39 = vpop.f32.mrb[135].mxu1 }
0x2940   :  { %4664 = vst.sshfl [vmem:[%s6435_s17] sm:$0x33 pattern:$0x76325410] %v4377_v24 }

</bundles_post_ra>
